<compile_context>
chip_gen: v7x
topology: tpu7x:2x2x1
jax: 0.10.0
libtpu: 0.0.40
codegen_flags: <defaults>
</compile_context>

<pallas_src>
import functools

import jax
import jax.numpy as jnp
from jax.experimental import pallas as pl
from jax.experimental.pallas import tpu as pltpu


LPAD = 8  # sublane-aligned left margin for the zero-padded activation scratches


# ----------------------------------------------------------------------------
# Fully fused CNN7 forward kernel: one batch element per grid step, everything
# resident in VMEM.
# ----------------------------------------------------------------------------
def cnn7_kernel(x_ref, w1t_ref, b1_ref, w2_ref, b2_ref, w3_ref, b3_ref,
                fc1w_ref, fc1b_ref, fc2w_ref, fc2b_ref, fc3w_ref, fc3b_ref,
                o_ref,
                xpad_ref, pad1_ref, pad2_ref,
                *, L, pools):
    p1, p2, p3 = pools
    L1 = L // p1
    L2 = L1 // p2
    L3 = L2 // p3
    f32 = jnp.float32

    def fill_padded(pad_ref, interior, n):
        # zero halo rows + (aligned) interior store -> conv taps are static slices
        c = pad_ref.shape[1]
        pad_ref[LPAD - 1:LPAD, :] = jnp.zeros((1, c), f32)
        pad_ref[LPAD + n:LPAD + n + 1, :] = jnp.zeros((1, c), f32)
        pad_ref[LPAD:LPAD + n, :] = interior

    def taps(pad_ref, n):
        return (pad_ref[LPAD - 1:LPAD - 1 + n, :],   # x[l-1]
                pad_ref[LPAD:LPAD + n, :],           # x[l]
                pad_ref[LPAD + 1:LPAD + 1 + n, :])   # x[l+1]

    # ---- conv1 (Cin = 1): three VPU broadcast mul-adds, then maxpool(5) ----
    fill_padded(xpad_ref, x_ref[0], L)                               # (L, 1)
    t0, t1, t2 = taps(xpad_ref, L)
    y1 = (t0 * w1t_ref[0:1, :] + t1 * w1t_ref[1:2, :] + t2 * w1t_ref[2:3, :]
          + b1_ref[...])                                             # (L, 128)
    p1_out = jnp.max(y1.reshape(L1, p1, y1.shape[1]), axis=1)        # (L1, 128)

    # ---- conv2: single im2col MXU matmul (L1, 3*128) @ (384, 256), maxpool(2) ----
    fill_padded(pad1_ref, p1_out, L1)
    a2 = jnp.concatenate(taps(pad1_ref, L1), axis=1)                 # (L1, 384)
    y2 = jnp.dot(a2, w2_ref[...], preferred_element_type=f32) + b2_ref[...]
    p2_out = jnp.max(y2.reshape(L2, p2, y2.shape[1]), axis=1)        # (L2, 256)

    # ---- conv3: single im2col MXU matmul (L2, 3*256) @ (768, 16) ----
    fill_padded(pad2_ref, p2_out, L2)
    a3 = jnp.concatenate(taps(pad2_ref, L2), axis=1)                 # (L2, 768)
    y3 = jnp.dot(a3, w3_ref[...], preferred_element_type=f32) + b3_ref[...]   # (L2, 16)

    # ---- maxpool(2) + flatten fused into fc1: pooled position l (length-major
    # flatten slot l*16+c) multiplies fc1 weight rows [16l, 16l+16).  Avoids the
    # sublane->lane flatten reshape and any lane-sparse intermediate store. ----
    c3 = y3.shape[1]
    h = fc1b_ref[...]                                                # (1, 128)
    for l in range(L3):
        row = y3[p3 * l:p3 * l + 1, :]
        for j in range(1, p3):
            row = jnp.maximum(row, y3[p3 * l + j:p3 * l + j + 1, :])
        h = h + jnp.dot(row, fc1w_ref[c3 * l:c3 * (l + 1), :],
                        preferred_element_type=f32)
    h = jnp.maximum(h, 0.0)                                          # ReLU
    h = jnp.maximum(jnp.dot(h, fc2w_ref[...], preferred_element_type=f32)
                    + fc2b_ref[...], 0.0)                            # ReLU
    o = jnp.dot(h, fc3w_ref[...], preferred_element_type=f32) + fc3b_ref[...]
    o_ref[0] = o.astype(o_ref.dtype)                                 # only HBM store: (1, 2)


# ----------------------------------------------------------------------------
# One-time parameter layout preparation (hoisted out of the forward hot path).
# ----------------------------------------------------------------------------
def prepare_params(params):
    def im2col_w(w):  # PyTorch (Cout, Cin, 3) -> stacked-tap (3*Cin, Cout)
        return jnp.concatenate([w[:, :, k].T for k in range(w.shape[2])], axis=0)

    cout3 = params["w3"].shape[0]
    fc1_w = params["fc1_w"]
    lp = fc1_w.shape[1] // cout3
    return {
        "w1t": params["w1"][:, 0, :].T,                      # (3, 128): row k = tap-k weights
        "b1": params["b1"].reshape(1, -1),
        "w2c": im2col_w(params["w2"]),                       # (384, 256)
        "b2": params["b2"].reshape(1, -1),
        "w3c": im2col_w(params["w3"]),                       # (768, 16)
        "b3": params["b3"].reshape(1, -1),
        # re-order fc1 columns from PyTorch's channel-major (c*lp + l) flatten to the
        # kernel's length-major (l*c + c) flatten, and pre-transpose to (in, out).
        "fc1w": fc1_w.reshape(-1, cout3, lp).transpose(2, 1, 0).reshape(lp * cout3, -1),
        "fc1b": params["fc1_b"].reshape(1, -1),
        "fc2w": params["fc2_w"].T,
        "fc2b": params["fc2_b"].reshape(1, -1),
        "fc3w": params["fc3_w"].T,
        "fc3b": params["fc3_b"].reshape(1, -1),
    }


# ----------------------------------------------------------------------------
# Forward pass: single fused pallas_call, grid over batch only.
# ----------------------------------------------------------------------------
def cnn7_forward(x_ncl, prep, *, pools=(5, 2, 2)):
    n, cin, L = x_ncl.shape
    assert cin == 1
    x_nl1 = jnp.transpose(x_ncl, (0, 2, 1))                  # NCL -> (N, L, 1)
    L1 = L // pools[0]
    L2 = L1 // pools[1]
    c1 = prep["w1t"].shape[1]
    c2 = prep["w2c"].shape[1]
    n_out = prep["fc3w"].shape[1]

    weight_names = ("w1t", "b1", "w2c", "b2", "w3c", "b3",
                    "fc1w", "fc1b", "fc2w", "fc2b", "fc3w", "fc3b")
    weights = [prep[k] for k in weight_names]

    def full_spec(a):
        nd = a.ndim
        return pl.BlockSpec(a.shape, lambda i, _nd=nd: (0,) * _nd)

    kernel = functools.partial(cnn7_kernel, L=L, pools=pools)
    out = pl.pallas_call(
        kernel,
        out_shape=jax.ShapeDtypeStruct((n, 1, n_out), jnp.float32),
        grid=(n,),
        in_specs=[pl.BlockSpec((1, L, 1), lambda i: (i, 0, 0))]
                 + [full_spec(w) for w in weights],
        out_specs=pl.BlockSpec((1, 1, n_out), lambda i: (i, 0, 0)),
        scratch_shapes=[
            pltpu.VMEM((LPAD + L + 1, 1), jnp.float32),      # padded conv1 input
            pltpu.VMEM((LPAD + L1 + 1, c1), jnp.float32),    # padded conv2 input
            pltpu.VMEM((LPAD + L2 + 1, c2), jnp.float32),    # padded conv3 input
        ],
        compiler_params=pltpu.CompilerParams(dimension_semantics=("parallel",)),
    )(x_nl1, *weights)
    return out.reshape(n, n_out)


# ----------------------------------------------------------------------------
# Parameters (deterministic, PyTorch-style shapes / fan-in uniform init).
# ----------------------------------------------------------------------------
def init_params(key, fc_in):
    def u(k, shape, fan_in):
        bound = 1.0 / float(fan_in) ** 0.5
        return jax.random.uniform(k, shape, jnp.float32, -bound, bound)

    ks = jax.random.split(key, 14)
    p = {}
    p["w1"], p["b1"] = u(ks[0], (128, 1, 3), 3), u(ks[1], (128,), 3)
    p["w2"], p["b2"] = u(ks[2], (256, 128, 3), 128 * 3), u(ks[3], (256,), 128 * 3)
    p["w3"], p["b3"] = u(ks[4], (16, 256, 3), 256 * 3), u(ks[5], (16,), 256 * 3)
    # conv4 is declared in the PyTorch __init__ but never used in forward(); kept for parity.
    p["w4"], p["b4"] = u(ks[6], (10, 16, 3), 16 * 3), u(ks[7], (10,), 16 * 3)
    p["fc1_w"], p["fc1_b"] = u(ks[8], (128, fc_in), fc_in), u(ks[9], (128,), fc_in)
    p["fc2_w"], p["fc2_b"] = u(ks[10], (16, 128), 128), u(ks[11], (16,), 128)
    p["fc3_w"], p["fc3_b"] = u(ks[12], (2, 16), 16), u(ks[13], (2,), 16)
    return p


# Pure-JAX reference (PyTorch semantics, NCL layout) for correctness checking.
def cnn7_reference(x_ncl, params):
    def conv(x, w, b):
        y = jax.lax.conv_general_dilated(
            x, w, window_strides=(1,), padding=((1, 1),),
            dimension_numbers=("NCH", "OIH", "NCH"))
        return y + b[None, :, None]

    def pool(x, k):
        return jax.lax.reduce_window(x, -jnp.inf, jax.lax.max,
                                     (1, 1, k), (1, 1, k), "VALID")

    x = pool(conv(x_ncl, params["w1"], params["b1"]), 5)
    x = pool(conv(x, params["w2"], params["b2"]), 2)
    x = pool(conv(x, params["w3"], params["b3"]), 2)
    x = x.reshape(x.shape[0], -1)                            # channel-major flatten
    x = jnp.maximum(x @ params["fc1_w"].T + params["fc1_b"], 0.0)
    x = jnp.maximum(x @ params["fc2_w"].T + params["fc2_b"], 0.0)
    return x @ params["fc3_w"].T + params["fc3_b"]


if __name__ == "__main__":
    key = jax.random.PRNGKey(0)
    k_x, k_p = jax.random.split(key)

    N, L = 2, 200                                            # PyTorch-style input (N, 1, L)
    x = jax.random.normal(k_x, (N, 1, L), dtype=jnp.float32)

    # TODO(synk): the original forward's `x.view(batch, 10*60)` is inconsistent with
    # conv3's 16-channel output (conv4 is skipped, so 16*L' can never be 600); fc1's
    # in_features is therefore sized to the actual flattened conv3 output.
    fc_in = 16 * (L // 5 // 2 // 2)                          # = 160
    params = init_params(k_p, fc_in)
    prep = prepare_params(params)                            # one-time weight layout prep

    fwd = jax.jit(cnn7_forward)
    out = jax.block_until_ready(fwd(x, prep))

    ref = cnn7_reference(x, params)
    assert out.shape == (N, 2), out.shape
    assert jnp.allclose(out, ref, rtol=1e-4, atol=1e-4), (out, ref)
    print("KERNEL_OK")
</pallas_src>

<mosaic_0001>
module attributes {stable_mosaic.version = 11 : i64} {
  func.func @cnn7_kernel(%arg0: i32, %arg1: memref<1x200x1xf32, #tpu.memory_space<vmem>>, %arg2: memref<3x128xf32, #tpu.memory_space<vmem>>, %arg3: memref<1x128xf32, #tpu.memory_space<vmem>>, %arg4: memref<384x256xf32, #tpu.memory_space<vmem>>, %arg5: memref<1x256xf32, #tpu.memory_space<vmem>>, %arg6: memref<768x16xf32, #tpu.memory_space<vmem>>, %arg7: memref<1x16xf32, #tpu.memory_space<vmem>>, %arg8: memref<160x128xf32, #tpu.memory_space<vmem>>, %arg9: memref<1x128xf32, #tpu.memory_space<vmem>>, %arg10: memref<128x16xf32, #tpu.memory_space<vmem>>, %arg11: memref<1x16xf32, #tpu.memory_space<vmem>>, %arg12: memref<16x2xf32, #tpu.memory_space<vmem>>, %arg13: memref<1x2xf32, #tpu.memory_space<vmem>>, %arg14: memref<1x1x2xf32, #tpu.memory_space<vmem>>, %arg15: memref<209x1xf32, #tpu.memory_space<vmem>>, %arg16: memref<49x128xf32, #tpu.memory_space<vmem>>, %arg17: memref<29x256xf32, #tpu.memory_space<vmem>>) attributes {dimension_semantics = [#tpu.dimension_semantics<parallel>], iteration_bounds = array<i64: 2>, scalar_prefetch = 0 : i64, scratch_operands = 3 : i64, tpu.core_type = #tpu.core_type<tc>, window_params = [{transform_indices = @transform_0, window_bounds = array<i64: 1, 200, 1>}, {pipeline_mode = #tpu.pipeline_mode<synchronous>, transform_indices = @transform_1, window_bounds = array<i64: 3, 128>}, {pipeline_mode = #tpu.pipeline_mode<synchronous>, transform_indices = @transform_2, window_bounds = array<i64: 1, 128>}, {pipeline_mode = #tpu.pipeline_mode<synchronous>, transform_indices = @transform_3, window_bounds = array<i64: 384, 256>}, {pipeline_mode = #tpu.pipeline_mode<synchronous>, transform_indices = @transform_4, window_bounds = array<i64: 1, 256>}, {pipeline_mode = #tpu.pipeline_mode<synchronous>, transform_indices = @transform_5, window_bounds = array<i64: 768, 16>}, {pipeline_mode = #tpu.pipeline_mode<synchronous>, transform_indices = @transform_6, window_bounds = array<i64: 1, 16>}, {pipeline_mode = #tpu.pipeline_mode<synchronous>, transform_indices = @transform_7, window_bounds = array<i64: 160, 128>}, {pipeline_mode = #tpu.pipeline_mode<synchronous>, transform_indices = @transform_8, window_bounds = array<i64: 1, 128>}, {pipeline_mode = #tpu.pipeline_mode<synchronous>, transform_indices = @transform_9, window_bounds = array<i64: 128, 16>}, {pipeline_mode = #tpu.pipeline_mode<synchronous>, transform_indices = @transform_10, window_bounds = array<i64: 1, 16>}, {pipeline_mode = #tpu.pipeline_mode<synchronous>, transform_indices = @transform_11, window_bounds = array<i64: 16, 2>}, {pipeline_mode = #tpu.pipeline_mode<synchronous>, transform_indices = @transform_12, window_bounds = array<i64: 1, 2>}, {transform_indices = @transform_13, window_bounds = array<i64: 1, 1, 2>}]} {
    %c0 = arith.constant 0 : index
    %c0_0 = arith.constant 0 : index
    %c0_1 = arith.constant 0 : index
    %0 = vector.load %arg1[%c0, %c0_0, %c0_1] : memref<1x200x1xf32, #tpu.memory_space<vmem>>, vector<1x200x1xf32>
    %1 = vector.shape_cast %0 : vector<1x200x1xf32> to vector<200x1xf32>
    %cst = arith.constant 0.000000e+00 : f32
    %2 = vector.broadcast %cst : f32 to vector<1x1xf32>
    %c7 = arith.constant 7 : index
    %c0_2 = arith.constant 0 : index
    %3 = vector.load %arg15[%c7, %c0_2] : memref<209x1xf32, #tpu.memory_space<vmem>>, vector<1x1xf32>
    tpu.vector_store %arg15[%c7, %c0_2], %2 {strides = array<i32>} : memref<209x1xf32, #tpu.memory_space<vmem>>, vector<1x1xf32>,
    %cst_3 = arith.constant 0.000000e+00 : f32
    %4 = vector.broadcast %cst_3 : f32 to vector<1x1xf32>
    %c208 = arith.constant 208 : index
    %c0_4 = arith.constant 0 : index
    %5 = vector.load %arg15[%c208, %c0_4] : memref<209x1xf32, #tpu.memory_space<vmem>>, vector<1x1xf32>
    tpu.vector_store %arg15[%c208, %c0_4], %4 {strides = array<i32>} : memref<209x1xf32, #tpu.memory_space<vmem>>, vector<1x1xf32>,
    %c8 = arith.constant 8 : index
    %c0_5 = arith.constant 0 : index
    %6 = vector.load %arg15[%c8, %c0_5] : memref<209x1xf32, #tpu.memory_space<vmem>>, vector<200x1xf32>
    tpu.vector_store %arg15[%c8, %c0_5], %1 {strides = array<i32>} : memref<209x1xf32, #tpu.memory_space<vmem>>, vector<200x1xf32>,
    %c7_6 = arith.constant 7 : index
    %c0_7 = arith.constant 0 : index
    %7 = vector.load %arg15[%c7_6, %c0_7] : memref<209x1xf32, #tpu.memory_space<vmem>>, vector<200x1xf32>
    %c8_8 = arith.constant 8 : index
    %c0_9 = arith.constant 0 : index
    %8 = vector.load %arg15[%c8_8, %c0_9] : memref<209x1xf32, #tpu.memory_space<vmem>>, vector<200x1xf32>
    %c9 = arith.constant 9 : index
    %c0_10 = arith.constant 0 : index
    %9 = vector.load %arg15[%c9, %c0_10] : memref<209x1xf32, #tpu.memory_space<vmem>>, vector<200x1xf32>
    %c0_11 = arith.constant 0 : index
    %c0_12 = arith.constant 0 : index
    %10 = vector.load %arg2[%c0_11, %c0_12] : memref<3x128xf32, #tpu.memory_space<vmem>>, vector<1x128xf32>
    %11 = vector.broadcast %7 : vector<200x1xf32> to vector<200x128xf32>
    %12 = vector.broadcast %10 : vector<1x128xf32> to vector<200x128xf32>
    %13 = arith.mulf %11, %12 : vector<200x128xf32>
    %c1 = arith.constant 1 : index
    %c0_13 = arith.constant 0 : index
    %14 = vector.load %arg2[%c1, %c0_13] : memref<3x128xf32, #tpu.memory_space<vmem>>, vector<1x128xf32>
    %15 = vector.broadcast %8 : vector<200x1xf32> to vector<200x128xf32>
    %16 = vector.broadcast %14 : vector<1x128xf32> to vector<200x128xf32>
    %17 = arith.mulf %15, %16 : vector<200x128xf32>
    %18 = arith.addf %13, %17 : vector<200x128xf32>
    %c2 = arith.constant 2 : index
    %c0_14 = arith.constant 0 : index
    %19 = vector.load %arg2[%c2, %c0_14] : memref<3x128xf32, #tpu.memory_space<vmem>>, vector<1x128xf32>
    %20 = vector.broadcast %9 : vector<200x1xf32> to vector<200x128xf32>
    %21 = vector.broadcast %19 : vector<1x128xf32> to vector<200x128xf32>
    %22 = arith.mulf %20, %21 : vector<200x128xf32>
    %23 = arith.addf %18, %22 : vector<200x128xf32>
    %c0_15 = arith.constant 0 : index
    %c0_16 = arith.constant 0 : index
    %24 = vector.load %arg3[%c0_15, %c0_16] : memref<1x128xf32, #tpu.memory_space<vmem>>, vector<1x128xf32>
    %25 = vector.broadcast %24 : vector<1x128xf32> to vector<200x128xf32>
    %26 = arith.addf %23, %25 : vector<200x128xf32>
    %27 = vector.shape_cast %26 : vector<200x128xf32> to vector<40x5x128xf32>
    %cst_17 = arith.constant dense<0xFF800000> : vector<40x128xf32>
    %28 = vector.multi_reduction <maximumf>, %27, %cst_17 [1] : vector<40x5x128xf32> to vector<40x128xf32>
    %cst_18 = arith.constant 0.000000e+00 : f32
    %29 = vector.broadcast %cst_18 : f32 to vector<1x128xf32>
    %c7_19 = arith.constant 7 : index
    %c0_20 = arith.constant 0 : index
    %30 = vector.load %arg16[%c7_19, %c0_20] : memref<49x128xf32, #tpu.memory_space<vmem>>, vector<1x128xf32>
    tpu.vector_store %arg16[%c7_19, %c0_20], %29 {strides = array<i32>} : memref<49x128xf32, #tpu.memory_space<vmem>>, vector<1x128xf32>,
    %cst_21 = arith.constant 0.000000e+00 : f32
    %31 = vector.broadcast %cst_21 : f32 to vector<1x128xf32>
    %c48 = arith.constant 48 : index
    %c0_22 = arith.constant 0 : index
    %32 = vector.load %arg16[%c48, %c0_22] : memref<49x128xf32, #tpu.memory_space<vmem>>, vector<1x128xf32>
    tpu.vector_store %arg16[%c48, %c0_22], %31 {strides = array<i32>} : memref<49x128xf32, #tpu.memory_space<vmem>>, vector<1x128xf32>,
    %c8_23 = arith.constant 8 : index
    %c0_24 = arith.constant 0 : index
    %33 = vector.load %arg16[%c8_23, %c0_24] : memref<49x128xf32, #tpu.memory_space<vmem>>, vector<40x128xf32>
    tpu.vector_store %arg16[%c8_23, %c0_24], %28 {strides = array<i32>} : memref<49x128xf32, #tpu.memory_space<vmem>>, vector<40x128xf32>,
    %c7_25 = arith.constant 7 : index
    %c0_26 = arith.constant 0 : index
    %34 = vector.load %arg16[%c7_25, %c0_26] : memref<49x128xf32, #tpu.memory_space<vmem>>, vector<40x128xf32>
    %c8_27 = arith.constant 8 : index
    %c0_28 = arith.constant 0 : index
    %35 = vector.load %arg16[%c8_27, %c0_28] : memref<49x128xf32, #tpu.memory_space<vmem>>, vector<40x128xf32>
    %c9_29 = arith.constant 9 : index
    %c0_30 = arith.constant 0 : index
    %36 = vector.load %arg16[%c9_29, %c0_30] : memref<49x128xf32, #tpu.memory_space<vmem>>, vector<40x128xf32>
    %37 = tpu.concatenate %34, %35, %36 in 1 : vector<40x128xf32>, vector<40x128xf32>, vector<40x128xf32> -> vector<40x384xf32>
    %c0_31 = arith.constant 0 : index
    %c0_32 = arith.constant 0 : index
    %38 = vector.load %arg4[%c0_31, %c0_32] : memref<384x256xf32, #tpu.memory_space<vmem>>, vector<384x256xf32>
    %cst_33 = arith.constant dense<0.000000e+00> : vector<40x256xf32>
    %39 = tpu.matmul %37, %38, %cst_33 {dimension_numbers = #tpu.dot_dimension_numbers<[1], [0], [0], [1], [0, 0, 1, 1], [], []>} : vector<40x384xf32>, vector<384x256xf32>, vector<40x256xf32> -> vector<40x256xf32>
    %c0_34 = arith.constant 0 : index
    %c0_35 = arith.constant 0 : index
    %40 = vector.load %arg5[%c0_34, %c0_35] : memref<1x256xf32, #tpu.memory_space<vmem>>, vector<1x256xf32>
    %41 = vector.broadcast %40 : vector<1x256xf32> to vector<40x256xf32>
    %42 = arith.addf %39, %41 : vector<40x256xf32>
    %43 = vector.shape_cast %42 : vector<40x256xf32> to vector<20x2x256xf32>
    %cst_36 = arith.constant dense<0xFF800000> : vector<20x256xf32>
    %44 = vector.multi_reduction <maximumf>, %43, %cst_36 [1] : vector<20x2x256xf32> to vector<20x256xf32>
    %cst_37 = arith.constant 0.000000e+00 : f32
    %45 = vector.broadcast %cst_37 : f32 to vector<1x256xf32>
    %c7_38 = arith.constant 7 : index
    %c0_39 = arith.constant 0 : index
    %46 = vector.load %arg17[%c7_38, %c0_39] : memref<29x256xf32, #tpu.memory_space<vmem>>, vector<1x256xf32>
    tpu.vector_store %arg17[%c7_38, %c0_39], %45 {strides = array<i32>} : memref<29x256xf32, #tpu.memory_space<vmem>>, vector<1x256xf32>,
    %cst_40 = arith.constant 0.000000e+00 : f32
    %47 = vector.broadcast %cst_40 : f32 to vector<1x256xf32>
    %c28 = arith.constant 28 : index
    %c0_41 = arith.constant 0 : index
    %48 = vector.load %arg17[%c28, %c0_41] : memref<29x256xf32, #tpu.memory_space<vmem>>, vector<1x256xf32>
    tpu.vector_store %arg17[%c28, %c0_41], %47 {strides = array<i32>} : memref<29x256xf32, #tpu.memory_space<vmem>>, vector<1x256xf32>,
    %c8_42 = arith.constant 8 : index
    %c0_43 = arith.constant 0 : index
    %49 = vector.load %arg17[%c8_42, %c0_43] : memref<29x256xf32, #tpu.memory_space<vmem>>, vector<20x256xf32>
    tpu.vector_store %arg17[%c8_42, %c0_43], %44 {strides = array<i32>} : memref<29x256xf32, #tpu.memory_space<vmem>>, vector<20x256xf32>,
    %c7_44 = arith.constant 7 : index
    %c0_45 = arith.constant 0 : index
    %50 = vector.load %arg17[%c7_44, %c0_45] : memref<29x256xf32, #tpu.memory_space<vmem>>, vector<20x256xf32>
    %c8_46 = arith.constant 8 : index
    %c0_47 = arith.constant 0 : index
    %51 = vector.load %arg17[%c8_46, %c0_47] : memref<29x256xf32, #tpu.memory_space<vmem>>, vector<20x256xf32>
    %c9_48 = arith.constant 9 : index
    %c0_49 = arith.constant 0 : index
    %52 = vector.load %arg17[%c9_48, %c0_49] : memref<29x256xf32, #tpu.memory_space<vmem>>, vector<20x256xf32>
    %53 = tpu.concatenate %50, %51, %52 in 1 : vector<20x256xf32>, vector<20x256xf32>, vector<20x256xf32> -> vector<20x768xf32>
    %c0_50 = arith.constant 0 : index
    %c0_51 = arith.constant 0 : index
    %54 = vector.load %arg6[%c0_50, %c0_51] : memref<768x16xf32, #tpu.memory_space<vmem>>, vector<768x16xf32>
    %cst_52 = arith.constant dense<0.000000e+00> : vector<20x16xf32>
    %55 = tpu.matmul %53, %54, %cst_52 {dimension_numbers = #tpu.dot_dimension_numbers<[1], [0], [0], [1], [0, 0, 1, 1], [], []>} : vector<20x768xf32>, vector<768x16xf32>, vector<20x16xf32> -> vector<20x16xf32>
    %c0_53 = arith.constant 0 : index
    %c0_54 = arith.constant 0 : index
    %56 = vector.load %arg7[%c0_53, %c0_54] : memref<1x16xf32, #tpu.memory_space<vmem>>, vector<1x16xf32>
    %57 = vector.broadcast %56 : vector<1x16xf32> to vector<20x16xf32>
    %58 = arith.addf %55, %57 : vector<20x16xf32>
    %c0_55 = arith.constant 0 : index
    %c0_56 = arith.constant 0 : index
    %59 = vector.load %arg9[%c0_55, %c0_56] : memref<1x128xf32, #tpu.memory_space<vmem>>, vector<1x128xf32>
    %60 = vector.extract_strided_slice %58 {offsets = [0, 0], sizes = [1, 16], strides = [1, 1]} : vector<20x16xf32> to vector<1x16xf32>
    %61 = vector.extract_strided_slice %58 {offsets = [1, 0], sizes = [1, 16], strides = [1, 1]} : vector<20x16xf32> to vector<1x16xf32>
    %62 = arith.maximumf %60, %61 : vector<1x16xf32>
    %c0_57 = arith.constant 0 : index
    %c0_58 = arith.constant 0 : index
    %63 = vector.load %arg8[%c0_57, %c0_58] : memref<160x128xf32, #tpu.memory_space<vmem>>, vector<16x128xf32>
    %cst_59 = arith.constant dense<0.000000e+00> : vector<1x128xf32>
    %64 = tpu.matmul %62, %63, %cst_59 {dimension_numbers = #tpu.dot_dimension_numbers<[1], [0], [0], [1], [0, 0, 1, 1], [], []>} : vector<1x16xf32>, vector<16x128xf32>, vector<1x128xf32> -> vector<1x128xf32>
    %65 = arith.addf %59, %64 : vector<1x128xf32>
    %66 = vector.extract_strided_slice %58 {offsets = [2, 0], sizes = [1, 16], strides = [1, 1]} : vector<20x16xf32> to vector<1x16xf32>
    %67 = vector.extract_strided_slice %58 {offsets = [3, 0], sizes = [1, 16], strides = [1, 1]} : vector<20x16xf32> to vector<1x16xf32>
    %68 = arith.maximumf %66, %67 : vector<1x16xf32>
    %c16 = arith.constant 16 : index
    %c0_60 = arith.constant 0 : index
    %69 = vector.load %arg8[%c16, %c0_60] : memref<160x128xf32, #tpu.memory_space<vmem>>, vector<16x128xf32>
    %cst_61 = arith.constant dense<0.000000e+00> : vector<1x128xf32>
    %70 = tpu.matmul %68, %69, %cst_61 {dimension_numbers = #tpu.dot_dimension_numbers<[1], [0], [0], [1], [0, 0, 1, 1], [], []>} : vector<1x16xf32>, vector<16x128xf32>, vector<1x128xf32> -> vector<1x128xf32>
    %71 = arith.addf %65, %70 : vector<1x128xf32>
    %72 = vector.extract_strided_slice %58 {offsets = [4, 0], sizes = [1, 16], strides = [1, 1]} : vector<20x16xf32> to vector<1x16xf32>
    %73 = vector.extract_strided_slice %58 {offsets = [5, 0], sizes = [1, 16], strides = [1, 1]} : vector<20x16xf32> to vector<1x16xf32>
    %74 = arith.maximumf %72, %73 : vector<1x16xf32>
    %c32 = arith.constant 32 : index
    %c0_62 = arith.constant 0 : index
    %75 = vector.load %arg8[%c32, %c0_62] : memref<160x128xf32, #tpu.memory_space<vmem>>, vector<16x128xf32>
    %cst_63 = arith.constant dense<0.000000e+00> : vector<1x128xf32>
    %76 = tpu.matmul %74, %75, %cst_63 {dimension_numbers = #tpu.dot_dimension_numbers<[1], [0], [0], [1], [0, 0, 1, 1], [], []>} : vector<1x16xf32>, vector<16x128xf32>, vector<1x128xf32> -> vector<1x128xf32>
    %77 = arith.addf %71, %76 : vector<1x128xf32>
    %78 = vector.extract_strided_slice %58 {offsets = [6, 0], sizes = [1, 16], strides = [1, 1]} : vector<20x16xf32> to vector<1x16xf32>
    %79 = vector.extract_strided_slice %58 {offsets = [7, 0], sizes = [1, 16], strides = [1, 1]} : vector<20x16xf32> to vector<1x16xf32>
    %80 = arith.maximumf %78, %79 : vector<1x16xf32>
    %c48_64 = arith.constant 48 : index
    %c0_65 = arith.constant 0 : index
    %81 = vector.load %arg8[%c48_64, %c0_65] : memref<160x128xf32, #tpu.memory_space<vmem>>, vector<16x128xf32>
    %cst_66 = arith.constant dense<0.000000e+00> : vector<1x128xf32>
    %82 = tpu.matmul %80, %81, %cst_66 {dimension_numbers = #tpu.dot_dimension_numbers<[1], [0], [0], [1], [0, 0, 1, 1], [], []>} : vector<1x16xf32>, vector<16x128xf32>, vector<1x128xf32> -> vector<1x128xf32>
    %83 = arith.addf %77, %82 : vector<1x128xf32>
    %84 = vector.extract_strided_slice %58 {offsets = [8, 0], sizes = [1, 16], strides = [1, 1]} : vector<20x16xf32> to vector<1x16xf32>
    %85 = vector.extract_strided_slice %58 {offsets = [9, 0], sizes = [1, 16], strides = [1, 1]} : vector<20x16xf32> to vector<1x16xf32>
    %86 = arith.maximumf %84, %85 : vector<1x16xf32>
    %c64 = arith.constant 64 : index
    %c0_67 = arith.constant 0 : index
    %87 = vector.load %arg8[%c64, %c0_67] : memref<160x128xf32, #tpu.memory_space<vmem>>, vector<16x128xf32>
    %cst_68 = arith.constant dense<0.000000e+00> : vector<1x128xf32>
    %88 = tpu.matmul %86, %87, %cst_68 {dimension_numbers = #tpu.dot_dimension_numbers<[1], [0], [0], [1], [0, 0, 1, 1], [], []>} : vector<1x16xf32>, vector<16x128xf32>, vector<1x128xf32> -> vector<1x128xf32>
    %89 = arith.addf %83, %88 : vector<1x128xf32>
    %90 = vector.extract_strided_slice %58 {offsets = [10, 0], sizes = [1, 16], strides = [1, 1]} : vector<20x16xf32> to vector<1x16xf32>
    %91 = vector.extract_strided_slice %58 {offsets = [11, 0], sizes = [1, 16], strides = [1, 1]} : vector<20x16xf32> to vector<1x16xf32>
    %92 = arith.maximumf %90, %91 : vector<1x16xf32>
    %c80 = arith.constant 80 : index
    %c0_69 = arith.constant 0 : index
    %93 = vector.load %arg8[%c80, %c0_69] : memref<160x128xf32, #tpu.memory_space<vmem>>, vector<16x128xf32>
    %cst_70 = arith.constant dense<0.000000e+00> : vector<1x128xf32>
    %94 = tpu.matmul %92, %93, %cst_70 {dimension_numbers = #tpu.dot_dimension_numbers<[1], [0], [0], [1], [0, 0, 1, 1], [], []>} : vector<1x16xf32>, vector<16x128xf32>, vector<1x128xf32> -> vector<1x128xf32>
    %95 = arith.addf %89, %94 : vector<1x128xf32>
    %96 = vector.extract_strided_slice %58 {offsets = [12, 0], sizes = [1, 16], strides = [1, 1]} : vector<20x16xf32> to vector<1x16xf32>
    %97 = vector.extract_strided_slice %58 {offsets = [13, 0], sizes = [1, 16], strides = [1, 1]} : vector<20x16xf32> to vector<1x16xf32>
    %98 = arith.maximumf %96, %97 : vector<1x16xf32>
    %c96 = arith.constant 96 : index
    %c0_71 = arith.constant 0 : index
    %99 = vector.load %arg8[%c96, %c0_71] : memref<160x128xf32, #tpu.memory_space<vmem>>, vector<16x128xf32>
    %cst_72 = arith.constant dense<0.000000e+00> : vector<1x128xf32>
    %100 = tpu.matmul %98, %99, %cst_72 {dimension_numbers = #tpu.dot_dimension_numbers<[1], [0], [0], [1], [0, 0, 1, 1], [], []>} : vector<1x16xf32>, vector<16x128xf32>, vector<1x128xf32> -> vector<1x128xf32>
    %101 = arith.addf %95, %100 : vector<1x128xf32>
    %102 = vector.extract_strided_slice %58 {offsets = [14, 0], sizes = [1, 16], strides = [1, 1]} : vector<20x16xf32> to vector<1x16xf32>
    %103 = vector.extract_strided_slice %58 {offsets = [15, 0], sizes = [1, 16], strides = [1, 1]} : vector<20x16xf32> to vector<1x16xf32>
    %104 = arith.maximumf %102, %103 : vector<1x16xf32>
    %c112 = arith.constant 112 : index
    %c0_73 = arith.constant 0 : index
    %105 = vector.load %arg8[%c112, %c0_73] : memref<160x128xf32, #tpu.memory_space<vmem>>, vector<16x128xf32>
    %cst_74 = arith.constant dense<0.000000e+00> : vector<1x128xf32>
    %106 = tpu.matmul %104, %105, %cst_74 {dimension_numbers = #tpu.dot_dimension_numbers<[1], [0], [0], [1], [0, 0, 1, 1], [], []>} : vector<1x16xf32>, vector<16x128xf32>, vector<1x128xf32> -> vector<1x128xf32>
    %107 = arith.addf %101, %106 : vector<1x128xf32>
    %108 = vector.extract_strided_slice %58 {offsets = [16, 0], sizes = [1, 16], strides = [1, 1]} : vector<20x16xf32> to vector<1x16xf32>
    %109 = vector.extract_strided_slice %58 {offsets = [17, 0], sizes = [1, 16], strides = [1, 1]} : vector<20x16xf32> to vector<1x16xf32>
    %110 = arith.maximumf %108, %109 : vector<1x16xf32>
    %c128 = arith.constant 128 : index
    %c0_75 = arith.constant 0 : index
    %111 = vector.load %arg8[%c128, %c0_75] : memref<160x128xf32, #tpu.memory_space<vmem>>, vector<16x128xf32>
    %cst_76 = arith.constant dense<0.000000e+00> : vector<1x128xf32>
    %112 = tpu.matmul %110, %111, %cst_76 {dimension_numbers = #tpu.dot_dimension_numbers<[1], [0], [0], [1], [0, 0, 1, 1], [], []>} : vector<1x16xf32>, vector<16x128xf32>, vector<1x128xf32> -> vector<1x128xf32>
    %113 = arith.addf %107, %112 : vector<1x128xf32>
    %114 = vector.extract_strided_slice %58 {offsets = [18, 0], sizes = [1, 16], strides = [1, 1]} : vector<20x16xf32> to vector<1x16xf32>
    %115 = vector.extract_strided_slice %58 {offsets = [19, 0], sizes = [1, 16], strides = [1, 1]} : vector<20x16xf32> to vector<1x16xf32>
    %116 = arith.maximumf %114, %115 : vector<1x16xf32>
    %c144 = arith.constant 144 : index
    %c0_77 = arith.constant 0 : index
    %117 = vector.load %arg8[%c144, %c0_77] : memref<160x128xf32, #tpu.memory_space<vmem>>, vector<16x128xf32>
    %cst_78 = arith.constant dense<0.000000e+00> : vector<1x128xf32>
    %118 = tpu.matmul %116, %117, %cst_78 {dimension_numbers = #tpu.dot_dimension_numbers<[1], [0], [0], [1], [0, 0, 1, 1], [], []>} : vector<1x16xf32>, vector<16x128xf32>, vector<1x128xf32> -> vector<1x128xf32>
    %119 = arith.addf %113, %118 : vector<1x128xf32>
    %cst_79 = arith.constant 0.000000e+00 : f32
    %120 = vector.broadcast %cst_79 : f32 to vector<1x128xf32>
    %121 = arith.maximumf %119, %120 : vector<1x128xf32>
    %c0_80 = arith.constant 0 : index
    %c0_81 = arith.constant 0 : index
    %122 = vector.load %arg10[%c0_80, %c0_81] : memref<128x16xf32, #tpu.memory_space<vmem>>, vector<128x16xf32>
    %cst_82 = arith.constant dense<0.000000e+00> : vector<1x16xf32>
    %123 = tpu.matmul %121, %122, %cst_82 {dimension_numbers = #tpu.dot_dimension_numbers<[1], [0], [0], [1], [0, 0, 1, 1], [], []>} : vector<1x128xf32>, vector<128x16xf32>, vector<1x16xf32> -> vector<1x16xf32>
    %c0_83 = arith.constant 0 : index
    %c0_84 = arith.constant 0 : index
    %124 = vector.load %arg11[%c0_83, %c0_84] : memref<1x16xf32, #tpu.memory_space<vmem>>, vector<1x16xf32>
    %125 = arith.addf %123, %124 : vector<1x16xf32>
    %cst_85 = arith.constant 0.000000e+00 : f32
    %126 = vector.broadcast %cst_85 : f32 to vector<1x16xf32>
    %127 = arith.maximumf %125, %126 : vector<1x16xf32>
    %c0_86 = arith.constant 0 : index
    %c0_87 = arith.constant 0 : index
    %128 = vector.load %arg12[%c0_86, %c0_87] : memref<16x2xf32, #tpu.memory_space<vmem>>, vector<16x2xf32>
    %cst_88 = arith.constant dense<0.000000e+00> : vector<1x2xf32>
    %129 = tpu.matmul %127, %128, %cst_88 {dimension_numbers = #tpu.dot_dimension_numbers<[1], [0], [0], [1], [0, 0, 1, 1], [], []>} : vector<1x16xf32>, vector<16x2xf32>, vector<1x2xf32> -> vector<1x2xf32>
    %c0_89 = arith.constant 0 : index
    %c0_90 = arith.constant 0 : index
    %130 = vector.load %arg13[%c0_89, %c0_90] : memref<1x2xf32, #tpu.memory_space<vmem>>, vector<1x2xf32>
    %131 = arith.addf %129, %130 : vector<1x2xf32>
    %c0_91 = arith.constant 0 : index
    %c0_92 = arith.constant 0 : index
    %c0_93 = arith.constant 0 : index
    %132 = vector.load %arg14[%c0_91, %c0_92, %c0_93] : memref<1x1x2xf32, #tpu.memory_space<vmem>>, vector<1x1x2xf32>
    %133 = vector.shape_cast %132 : vector<1x1x2xf32> to vector<1x2xf32>
    %134 = vector.shape_cast %131 : vector<1x2xf32> to vector<1x1x2xf32>
    tpu.vector_store %arg14[%c0_91, %c0_92, %c0_93], %134 {strides = array<i32>} : memref<1x1x2xf32, #tpu.memory_space<vmem>>, vector<1x1x2xf32>,
    return
  }
  func.func @transform_0(%arg0: i32) -> (i32, i32, i32) {
    %c0_i32 = arith.constant 0 : i32
    %c0_i32_0 = arith.constant 0 : i32
    %c0_i32_1 = arith.constant 0 : i32
    return %arg0, %c0_i32, %c0_i32_0 : i32, i32, i32
  }
  func.func @transform_1(%arg0: i32) -> (i32, i32) {
    %c0_i32 = arith.constant 0 : i32
    %c0_i32_0 = arith.constant 0 : i32
    %c0_i32_1 = arith.constant 0 : i32
    return %c0_i32, %c0_i32_0 : i32, i32
  }
  func.func @transform_2(%arg0: i32) -> (i32, i32) {
    %c0_i32 = arith.constant 0 : i32
    %c0_i32_0 = arith.constant 0 : i32
    %c0_i32_1 = arith.constant 0 : i32
    return %c0_i32, %c0_i32_0 : i32, i32
  }
  func.func @transform_3(%arg0: i32) -> (i32, i32) {
    %c0_i32 = arith.constant 0 : i32
    %c0_i32_0 = arith.constant 0 : i32
    %c0_i32_1 = arith.constant 0 : i32
    return %c0_i32, %c0_i32_0 : i32, i32
  }
  func.func @transform_4(%arg0: i32) -> (i32, i32) {
    %c0_i32 = arith.constant 0 : i32
    %c0_i32_0 = arith.constant 0 : i32
    %c0_i32_1 = arith.constant 0 : i32
    return %c0_i32, %c0_i32_0 : i32, i32
  }
  func.func @transform_5(%arg0: i32) -> (i32, i32) {
    %c0_i32 = arith.constant 0 : i32
    %c0_i32_0 = arith.constant 0 : i32
    %c0_i32_1 = arith.constant 0 : i32
    return %c0_i32, %c0_i32_0 : i32, i32
  }
  func.func @transform_6(%arg0: i32) -> (i32, i32) {
    %c0_i32 = arith.constant 0 : i32
    %c0_i32_0 = arith.constant 0 : i32
    %c0_i32_1 = arith.constant 0 : i32
    return %c0_i32, %c0_i32_0 : i32, i32
  }
  func.func @transform_7(%arg0: i32) -> (i32, i32) {
    %c0_i32 = arith.constant 0 : i32
    %c0_i32_0 = arith.constant 0 : i32
    %c0_i32_1 = arith.constant 0 : i32
    return %c0_i32, %c0_i32_0 : i32, i32
  }
  func.func @transform_8(%arg0: i32) -> (i32, i32) {
    %c0_i32 = arith.constant 0 : i32
    %c0_i32_0 = arith.constant 0 : i32
    %c0_i32_1 = arith.constant 0 : i32
    return %c0_i32, %c0_i32_0 : i32, i32
  }
  func.func @transform_9(%arg0: i32) -> (i32, i32) {
    %c0_i32 = arith.constant 0 : i32
    %c0_i32_0 = arith.constant 0 : i32
    %c0_i32_1 = arith.constant 0 : i32
    return %c0_i32, %c0_i32_0 : i32, i32
  }
  func.func @transform_10(%arg0: i32) -> (i32, i32) {
    %c0_i32 = arith.constant 0 : i32
    %c0_i32_0 = arith.constant 0 : i32
    %c0_i32_1 = arith.constant 0 : i32
    return %c0_i32, %c0_i32_0 : i32, i32
  }
  func.func @transform_11(%arg0: i32) -> (i32, i32) {
    %c0_i32 = arith.constant 0 : i32
    %c0_i32_0 = arith.constant 0 : i32
    %c0_i32_1 = arith.constant 0 : i32
    return %c0_i32, %c0_i32_0 : i32, i32
  }
  func.func @transform_12(%arg0: i32) -> (i32, i32) {
    %c0_i32 = arith.constant 0 : i32
    %c0_i32_0 = arith.constant 0 : i32
    %c0_i32_1 = arith.constant 0 : i32
    return %c0_i32, %c0_i32_0 : i32, i32
  }
  func.func @transform_13(%arg0: i32) -> (i32, i32, i32) {
    %c0_i32 = arith.constant 0 : i32
    %c0_i32_0 = arith.constant 0 : i32
    %c0_i32_1 = arith.constant 0 : i32
    return %arg0, %c0_i32, %c0_i32_0 : i32, i32, i32
  }
}

</mosaic_0001>

<bundles_post_ra>
// kernel: cnn7_forward.1
= control target key start
LH: loop header
LB: loop body
LE: loop exit
PB: predicated region body
PF: predicated region fallthrough
CT: control target
= control target key end

     0   :  { %s9731_s0 = inlined_call_operand.vmem [shape: f32[2,200,1], index: 0, kind: input, shape index: {}]   ;;  %s9732_s1 = inlined_call_operand.vmem [shape: f32[3,128], index: 1, kind: input, shape index: {}]   ;;  %s9733_s2 = inlined_call_operand.vmem [shape: f32[1,128], index: 2, kind: input, shape index: {}]   ;;  %s9734_s3 = inlined_call_operand.vmem [shape: f32[384,256], index: 3, kind: input, shape index: {}]   ;;  %s9735_s4 = inlined_call_operand.vmem [shape: f32[1,256], index: 4, kind: input, shape index: {}]   ;;  %s9736_s5 = inlined_call_operand.vmem [shape: f32[768,16], index: 5, kind: input, shape index: {}]   ;;  %s9737_s6 = inlined_call_operand.vmem [shape: f32[1,16], index: 6, kind: input, shape index: {}]   ;;  %s9738_s7 = inlined_call_operand.vmem [shape: f32[160,128], index: 7, kind: input, shape index: {}]   ;;  %s9739_s8 = inlined_call_operand.vmem [shape: f32[1,128], index: 8, kind: input, shape index: {}]   ;;  %s9740_s9 = inlined_call_operand.vmem [shape: f32[128,16], index: 9, kind: input, shape index: {}]   ;;  %s9741_s10 = inlined_call_operand.vmem [shape: f32[1,16], index: 10, kind: input, shape index: {}]   ;;  %s9742_s11 = inlined_call_operand.vmem [shape: f32[16,2], index: 11, kind: input, shape index: {}]   ;;  %s9743_s12 = inlined_call_operand.vmem [shape: f32[1,2], index: 12, kind: input, shape index: {}]   ;;  %s9744_s13 = inlined_call_operand.hbm [shape: f32[2,1,2], index: 13, kind: output, shape index: {}]  }
   0x1   :  { %9746 = sst [smem:[#allocation10_spill]] %s9731_s0 }
   0x2   :  { %18 = vsyncpa [#allocation6], 0 }
   0x3   :  { %20 = vsyncpa [#allocation6 + $0x1], 0  ;;  %s7605_s25 = smov 0   ;;  %s7607_s26 = smov 0  }
   0x4   :  { %s7609_s27 = smov 0   ;;  %s7611_s28 = smov 0  }
   0x5 LB: > { %9747 = sst [smem:[#allocation8_spill]] %s7522_s27  ;;  %s7626_s29 = sadd.s32 4294967295, %s7526_s28   ;;  %s7526_s28 = sphi %s7611_s28, %s9756_s28   ;;  %s7522_s27 = sphi %s7609_s27, %s9753_s27   ;;  %s7518_s26 = sphi %s7607_s26, %s9755_s26   ;;  %s7514_s25 = sphi %s7605_s25, %s9754_s25  }
   0x6   : > { %s6792_s30 = sadd.s32 4294967294, %s7526_s28   ;;  %s7630_s14 = sadd.s32 1, %s7526_s28  }
   0x7   : > { %s311_s15 = sadd.s32 1, %s7522_s27  ;;  %s308_s16 = ssub.s32 %s7526_s28, %s7630_s14 }
   0x8   : > { %p321_p0 = scmp.ne.s32.totalorder %s7522_s27, %s7518_s26  ;;  %p309_p1 = scmp.eq.s32.totalorder %s308_s16, 0 }
   0x9   : > { %p322_p2 = scmp.eq.s32.totalorder %s7626_s29, 1  ;;  %p327_p3 = scmp.ne.s32.totalorder %s7518_s26, %s7514_s25 }
   0xa   : > { %p328_p4 = scmp.eq.s32.totalorder %s6792_s30, 1  ;;  %p6795_p7 = scmp.ge.s32.totalorder %s7526_s28, 1 }
   0xb   : > { %s7641_s17 = scalar_select %p309_p1, %s7522_s27, %s311_s15  }
   0xc   : > { %p7643_p5 = por %p322_p2, %p321_p0  ;;  %p7647_p6 = por %p328_p4, %p327_p3 }
   0xd   : > { %9748 = sst [smem:[#allocation9_spill]] %s7641_s17  ;;  %p390_p8 = scmp.lt.s32.totalorder %s7526_s28, 3 }
   0xf   : > { %p391_p9 = pnand %p6795_p7, %p390_p8 }
  0x10   : > { %p433_p10 = scmp.lt.s32.totalorder (!%p391_p9), %s7626_s29, 1  ;;  %vm463_vm0 = vcmask (!%p391_p9), 0   ;;  %v7528_v0 = vmov (!%p391_p9), 0   ;;  %v7529_v1 = vmov (!%p391_p9), 0.0   ;;  %vm466_vm1 = vcmask (!%p391_p9), 7168   ;;  %s9751_s0 = sld [smem:[#allocation10_spill]] (!%p391_p9) }
  0x11   : > { %394 = sbr.rel (%p391_p9) target bundleno = 1817 (0x719), region = 72  ;;  %7456 = vset.pattern.permute.xlu1 (!%p391_p9), %v7528_v0  ;;  %7455 = vset.pattern.permute.xlu0 (!%p391_p9), %v7528_v0  ;;  %464 = vst.msk [vmem:[#allocation2 + $0x7] sm:$0x1] (!%p391_p9), %vm463_vm0, %v7529_v1  ;;  %465 = vst.msk [vmem:[#allocation2 + $0xd0] sm:$0x1] (!%p391_p9), %vm463_vm0, %v7529_v1  ;;  %v4355_v42 = vld [vmem:[%s9734_s3 + $0x8] sm:$0xff] (!%p391_p9) }
  0x12   : > { %4245 = vst [vmem:[#allocation3 + $0x7] sm:$0x1] (!%p391_p9), %v7529_v1  ;;  %4246 = vst [vmem:[#allocation3 + $0x30] sm:$0x1] (!%p391_p9), %v7529_v1  ;;  %v4357_v43 = vld [vmem:[%s9734_s3 + $0x18] sm:$0xff] (!%p391_p9)  ;;  %v4354_v44 = vld [vmem:[%s9734_s3] sm:$0xff] (!%p391_p9) }
  0x13   : > { %v7121_v45 = vpack.c.bf16 (!%p391_p9), %v4357_v43, %v4355_v42  ;;  %v4356_v46 = vld [vmem:[%s9734_s3 + $0x10] sm:$0xff] (!%p391_p9)  ;;  %v4359_v48 = vld [vmem:[%s9734_s3 + $0x28] sm:$0xff] (!%p391_p9)  ;;  %v4361_v50 = vld [vmem:[%s9734_s3 + $0x38] sm:$0xff] (!%p391_p9)  ;;  %vm3964_vm2 = vcmask (!%p391_p9), 1044480   ;;  %vm4287_vm3 = vcmask (!%p391_p9), 1041409   ;;  %vm4289_vm4 = vcmask (!%p391_p9), 1042434  }
  0x14   : > { %v7123_v49 = vpack.c.bf16 (!%p391_p9), %v4356_v46, %v4354_v44  ;;  %v4358_v51 = vld [vmem:[%s9734_s3 + $0x20] sm:$0xff] (!%p391_p9)  ;;  %v4360_v52 = vld [vmem:[%s9734_s3 + $0x30] sm:$0xff] (!%p391_p9)  ;;  %v7125_v53 = vpack.c.bf16 (!%p391_p9), %v4361_v50, %v4359_v48  ;;  %v4363_v54 = vld [vmem:[%s9734_s3 + $0x48] sm:$0xff] (!%p391_p9)  ;;  %vm4291_vm5 = vcmask (!%p391_p9), 1043459   ;;  %vm4293_vm6 = vcmask (!%p391_p9), 1044484   ;;  %s431_s27 = sand.u32 (!%p391_p9), 1, %s7518_s26  }
  0x15   : > { %7122 = vmatprep.subr.bf16.mxu0 (!%p391_p9), %v7121_v45  ;;  %v4365_v55 = vld [vmem:[%s9734_s3 + $0x58] sm:$0xff] (!%p391_p9)  ;;  %v7127_v56 = vpack.c.bf16 (!%p391_p9), %v4360_v52, %v4358_v51  ;;  %v4362_v57 = vld [vmem:[%s9734_s3 + $0x40] sm:$0xff] (!%p391_p9)  ;;  %v4364_v58 = vld [vmem:[%s9734_s3 + $0x50] sm:$0xff] (!%p391_p9)  ;;  %vm4295_vm7 = vcmask (!%p391_p9), 1045509   ;;  %vm4297_vm8 = vcmask (!%p391_p9), 1046534   ;;  %vm4299_vm9 = vcmask (!%p391_p9), 1047559  }
  0x16   : > { %7124 = vmatpush1.bf16.msra.mxu0 (!%p391_p9), %v7123_v49  ;;  %v7129_v61 = vpack.c.bf16 (!%p391_p9), %v4365_v55, %v4363_v54  ;;  %v4367_v62 = vld [vmem:[%s9734_s3 + $0x68] sm:$0xff] (!%p391_p9)  ;;  %v4369_v63 = vld [vmem:[%s9734_s3 + $0x78] sm:$0xff] (!%p391_p9)  ;;  %v7131_v0 = vpack.c.bf16 (!%p391_p9), %v4364_v58, %v4362_v57  ;;  %v4382_v43 = vld [vmem:[%s9734_s3 + $0xe0] sm:$0xff] (!%p391_p9)  ;;  %vm4952_vm11 = vcmask (!%p391_p9), 1041408   ;;  %vm5482_vm12 = vcmask (!%p391_p9), 1040384   ;;  %s6833_s23 = sshll.u32 (!%p391_p9), %s7626_s29, 4 }
  0x17   : > { %7126 = vmatprep.subr.bf16.mxu0 (!%p391_p9), %v7125_v53  ;;  %v4384_v44 = vld [vmem:[%s9734_s3 + $0xf0] sm:$0xff] (!%p391_p9)  ;;  %v4389_v48 = vld [vmem:[%s9734_s3 + $0x118] sm:$0xff] (!%p391_p9)  ;;  %v4386_v51 = vld [vmem:[%s9734_s3 + $0x100] sm:$0xff] (!%p391_p9)  ;;  %vm5349_vm13 = vcmask (!%p391_p9), 1046528   ;;  %vm5364_vm14 = vcmask (!%p391_p9), 1045504   ;;  %vm7533_vm15 = vmmov (!%p391_p9), 0  }
  0x18   : > { %s434_s20 = scalar_select %p433_p10, %s7626_s29, 1  ;;  %v7151_v45 = vpack.c.bf16 %v4384_v44, %v4382_v43  ;;  %v4388_v52 = vld [vmem:[%s9734_s3 + $0x110] sm:$0xff]  ;;  %v4391_v54 = vld [vmem:[%s9734_s3 + $0x128] sm:$0xff]  ;;  %v4393_v55 = vld [vmem:[%s9734_s3 + $0x138] sm:$0xff]  ;;  %vm5790_vm0 = vcmask 130048  }
  0x19   : > { %v7155_v53 = vpack.c.bf16 %v4388_v52, %v4386_v51  ;;  %v7157_v58 = vpack.c.bf16 %v4393_v55, %v4391_v54  ;;  %v4415_v43 = vld [vmem:[%s9734_s3 + $0x1e8] sm:$0xff]  ;;  %v4417_v44 = vld [vmem:[%s9734_s3 + $0x1f8] sm:$0xff]  ;;  %v4414_v52 = vld [vmem:[%s9734_s3 + $0x1e0] sm:$0xff]  ;;  %s432_s30 = scalar_lea.vmem [#allocation5], %s431_s27  ;;  %s6725_s22 = scalar_lea.sflag [#allocation6], %s431_s27 }
  0x1a   : > { %s7409_s21 = smul.u32 200, %s434_s20  ;;  %7128 = vmatpush1.bf16.msra.mxu0 %v7127_v56  ;;  %s6737_s15 = sshll.u32 %s432_s30, 4  ;;  %s9691_s15 = int_to_ptr.vmem [resolvable:$true] %s6737_s15 }
  0x1b   : > { %7130 = vmatprep.subr.bf16.mxu0 %v7129_v61  ;;  %s7534_s29 = smov [#allocation5]  }
  0x1c   : > { %s7662_s24 = scalar_lea.vmem %s9751_s0, %s7409_s21  ;;  %s9689_s21 = scalar_lea.hbm %s9744_s13, %s6833_s23 }
  0x1d   : > { %v438_v2 = vld [vmem:[%s7662_s24] sm:$0xff]  ;;  %v439_v3 = vld [vmem:[%s7662_s24 + $0x8] sm:$0xff]  ;;  %v440_v4 = vld [vmem:[%s7662_s24 + $0x10] sm:$0xff]  ;;  %s7464_s0 = scalar_lea.vmem %s9691_s15, 16  ;;  %s7468_s17 = sshll.u32 %s7534_s29, 4  ;;  %s7469_s17 = int_to_ptr.vmem [resolvable:$false] %s7468_s17 }
  0x1e   : > { %467 = vst.msk [vmem:[#allocation2 + $0x8] sm:$0xff] %vm466_vm1, %v438_v2  ;;  %468 = vst.msk [vmem:[#allocation2 + $0x10] sm:$0xff] %vm466_vm1, %v439_v3  ;;  %v441_v5 = vld [vmem:[%s7662_s24 + $0x18] sm:$0xff]  ;;  %v442_v6 = vld [vmem:[%s7662_s24 + $0x20] sm:$0xff]  ;;  %7132 = vmatpush1.bf16.msra.mxu0 %v7131_v0  ;;  %p7465_p11 = scmp.ne.s32.totalorder %s9691_s15, %s7464_s0  ;;  %p7471_p0 = scmp.lt.s32.totalorder %s9691_s15, %s7469_s17 }
  0x1f   : > { %469 = vst.msk [vmem:[#allocation2 + $0x18] sm:$0xff] %vm466_vm1, %v440_v4  ;;  %v443_v7 = vld [vmem:[%s7662_s24 + $0x28] sm:$0xff]  ;;  %470 = vst.msk [vmem:[#allocation2 + $0x20] sm:$0xff] %vm466_vm1, %v441_v5  ;;  %v444_v8 = vld [vmem:[%s7662_s24 + $0x30] sm:$0xff] }
  0x20   : > { %471 = vst.msk [vmem:[#allocation2 + $0x28] sm:$0xff] %vm466_vm1, %v442_v6  ;;  %472 = vst.msk [vmem:[#allocation2 + $0x30] sm:$0xff] %vm466_vm1, %v443_v7  ;;  %v448_v9 = vld [vmem:[%s7662_s24 + $0x50] sm:$0xff]  ;;  %v447_v10 = vld [vmem:[%s7662_s24 + $0x48] sm:$0xff]  ;;  %v7133_v6 = vpack.c.bf16 %v4369_v63, %v4367_v62  ;;  %p7466_p12 = pnand %p7465_p11, %p7643_p5 }
  0x21   : > { %473 = vst.msk [vmem:[#allocation2 + $0x38] sm:$0xff] %vm466_vm1, %v444_v8  ;;  %477 = vst.msk [vmem:[#allocation2 + $0x58] sm:$0xff] %vm466_vm1, %v448_v9  ;;  %v445_v11 = vld [vmem:[%s7662_s24 + $0x38] sm:$0xff]  ;;  %v446_v12 = vld [vmem:[%s7662_s24 + $0x40] sm:$0xff] }
  0x22   : > { %476 = vst.msk [vmem:[#allocation2 + $0x50] sm:$0xff] %vm466_vm1, %v447_v10  ;;  %v449_v13 = vld [vmem:[%s7662_s24 + $0x58] sm:$0xff]  ;;  %474 = vst.msk [vmem:[#allocation2 + $0x40] sm:$0xff] %vm466_vm1, %v445_v11  ;;  %v452_v14 = vld [vmem:[%s7662_s24 + $0x70] sm:$0xff]  ;;  %7134 = vmatprep.subr.bf16.mxu0 %v7133_v6  ;;  %p7467_p13 = pneg %p7466_p12 }
  0x23   : > { %475 = vst.msk [vmem:[#allocation2 + $0x48] sm:$0xff] %vm466_vm1, %v446_v12  ;;  %478 = vst.msk [vmem:[#allocation2 + $0x60] sm:$0xff] %vm466_vm1, %v449_v13  ;;  %v453_v15 = vld [vmem:[%s7662_s24 + $0x78] sm:$0xff]  ;;  %v450_v16 = vld [vmem:[%s7662_s24 + $0x60] sm:$0xff] }
  0x24   : > { %481 = vst.msk [vmem:[#allocation2 + $0x78] sm:$0xff] %vm466_vm1, %v452_v14  ;;  %482 = vst.msk [vmem:[#allocation2 + $0x80] sm:$0xff] %vm466_vm1, %v453_v15  ;;  %v451_v17 = vld [vmem:[%s7662_s24 + $0x68] sm:$0xff]  ;;  %v454_v18 = vld [vmem:[%s7662_s24 + $0x80] sm:$0xff] }
  0x25   : > { %479 = vst.msk [vmem:[#allocation2 + $0x68] sm:$0xff] %vm466_vm1, %v450_v16  ;;  %v457_v19 = vld [vmem:[%s7662_s24 + $0x98] sm:$0xff]  ;;  %480 = vst.msk [vmem:[#allocation2 + $0x70] sm:$0xff] %vm466_vm1, %v451_v17  ;;  %v458_v20 = vld [vmem:[%s7662_s24 + $0xa0] sm:$0xff] }
  0x26   : > { %483 = vst.msk [vmem:[#allocation2 + $0x88] sm:$0xff] %vm466_vm1, %v454_v18  ;;  %486 = vst.msk [vmem:[#allocation2 + $0xa0] sm:$0xff] %vm466_vm1, %v457_v19  ;;  %v455_v21 = vld [vmem:[%s7662_s24 + $0x88] sm:$0xff]  ;;  %v456_v23 = vld [vmem:[%s7662_s24 + $0x90] sm:$0xff] }
  0x27   : > { %v459_v22 = vld [vmem:[%s7662_s24 + $0xa8] sm:$0xff]  ;;  %487 = vst.msk [vmem:[#allocation2 + $0xa8] sm:$0xff] %vm466_vm1, %v458_v20  ;;  %484 = vst.msk [vmem:[#allocation2 + $0x90] sm:$0xff] %vm466_vm1, %v455_v21  ;;  %v460_v24 = vld [vmem:[%s7662_s24 + $0xb0] sm:$0xff] }
  0x28   : > { %488 = vst.msk [vmem:[#allocation2 + $0xb0] sm:$0xff] %vm466_vm1, %v459_v22  ;;  %v493_v25 = vld [vmem:[#allocation2 + $0xf] sm:$0xff]  ;;  %v492_v26 = vld [vmem:[#allocation2 + $0x7] sm:$0xff]  ;;  %485 = vst.msk [vmem:[#allocation2 + $0x98] sm:$0xff] %vm466_vm1, %v456_v23 }
  0x29   : > { %489 = vst.msk [vmem:[#allocation2 + $0xb8] sm:$0xff] %vm466_vm1, %v460_v24  ;;  %575 = vperm.xlu1 %7456, %v493_v25   ;;  %570 = vperm.xlu0 %7455, %v492_v26   ;;  %v518_v27 = vld [vmem:[#allocation2 + $0x10] sm:$0xff]  ;;  %v517_v28 = vld [vmem:[#allocation2 + $0x8] sm:$0xff]  ;;  %v519_v31 = vld [vmem:[#allocation2 + $0x18] sm:$0xff] }
  0x2a   : > { %v543_v29 = vld [vmem:[#allocation2 + $0x11] sm:$0xff]  ;;  %v542_v30 = vld [vmem:[#allocation2 + $0x9] sm:$0xff]  ;;  %v520_v33 = vld [vmem:[#allocation2 + $0x20] sm:$0xff] }
  0x2b   : > { %v494_v32 = vld [vmem:[#allocation2 + $0x17] sm:$0xff]  ;;  %v495_v34 = vld [vmem:[#allocation2 + $0x1f] sm:$0xff]  ;;  %v496_v35 = vld [vmem:[#allocation2 + $0x27] sm:$0xff] }
  0x2c   : > { %v544_v36 = vld [vmem:[#allocation2 + $0x19] sm:$0xff]  ;;  %v545_v37 = vld [vmem:[#allocation2 + $0x21] sm:$0xff]  ;;  %v497_v40 = vld [vmem:[#allocation2 + $0x2f] sm:$0xff] }
  0x2d   : > { %730 = vperm.xlu1 %7456, %v518_v27   ;;  %725 = vperm.xlu0 %7455, %v517_v28   ;;  %v521_v38 = vld [vmem:[#allocation2 + $0x28] sm:$0xff]  ;;  %v462_v47 = vld [vmem:[%s7662_s24 + $0xc0] sm:$0xff]  ;;  %v4368_v3 = vld [vmem:[%s9734_s3 + $0x70] sm:$0xff] }
  0x2e   : > { %v461_v39 = vld [vmem:[%s7662_s24 + $0xb8] sm:$0xff]  ;;  %491 = vst.msk [vmem:[#allocation2 + $0xc8] sm:$0xff] %vm466_vm1, %v462_v47  ;;  %v498_v59 = vld [vmem:[#allocation2 + $0x37] sm:$0xff]  ;;  %v499_v13 = vld [vmem:[#allocation2 + $0x3f] sm:$0xff]  ;;  %s7470_s24 = scalar_lea.vmem %s7469_s17, 32 }
  0x2f   : > { %490 = vst.msk [vmem:[#allocation2 + $0xc0] sm:$0xff] %vm466_vm1, %v461_v39  ;;  %v546_v41 = vld [vmem:[#allocation2 + $0x29] sm:$0xff]  ;;  %v547_v4 = vld [vmem:[#allocation2 + $0x31] sm:$0xff]  ;;  %v548_v14 = vld [vmem:[#allocation2 + $0x39] sm:$0xff]  ;;  %vm6722_vm1 = vcmask 8192   ;;  %p7472_p1 = scmp.lt.s32.totalorder %s7470_s24, %s7464_s0 }
  0x30   : > { %v522_v60 = vld [vmem:[#allocation2 + $0x30] sm:$0xff]  ;;  %v523_v5 = vld [vmem:[#allocation2 + $0x38] sm:$0xff]  ;;  %v4373_v8 = vld [vmem:[%s9734_s3 + $0x98] sm:$0xff] }
  0x31   : > { %910 = vperm.xlu1 %7456, %v543_v29   ;;  %905 = vperm.xlu0 %7455, %v542_v30   ;;  %v4366_v2 = vld [vmem:[%s9734_s3 + $0x60] sm:$0xff]  ;;  %v4371_v7 = vld [vmem:[%s9734_s3 + $0x88] sm:$0xff]  ;;  %v4372_v16 = vld [vmem:[%s9734_s3 + $0x90] sm:$0xff]  ;;  %p7473_p2 = por %p7472_p1, %p7471_p0 }
  0x32   : > { %v7135_v9 = vpack.c.bf16 %v4368_v3, %v4366_v2  ;;  %v527_v10 = vld [vmem:[#allocation2 + $0x58] sm:$0xff]  ;;  %v7137_v12 = vpack.c.bf16 %v4373_v8, %v4371_v7  ;;  %v4370_v15 = vld [vmem:[%s9734_s3 + $0x80] sm:$0xff]  ;;  %v4377_v19 = vld [vmem:[%s9734_s3 + $0xb8] sm:$0xff] }
  0x33   : > { %v502_v11 = vld [vmem:[#allocation2 + $0x57] sm:$0xff]  ;;  %v7139_v17 = vpack.c.bf16 %v4372_v16, %v4370_v15  ;;  %v500_v20 = vld [vmem:[#allocation2 + $0x47] sm:$0xff]  ;;  %v503_v27 = vld [vmem:[#allocation2 + $0x5f] sm:$0xff]  ;;  %p7474_p3 = pnand %p7473_p2, %p7467_p13 }
  0x34   : > { %7136 = vmatpush1.bf16.msra.mxu0 %v7135_v9  ;;  %v4375_v18 = vld [vmem:[%s9734_s3 + $0xa8] sm:$0xff]  ;;  %v524_v21 = vld [vmem:[#allocation2 + $0x40] sm:$0xff]  ;;  %v4374_v23 = vld [vmem:[%s9734_s3 + $0xa0] sm:$0xff] }
  0x35   : > { %735 = vperm.xlu1 %7456, %v519_v31   ;;  %580 = vperm.xlu0 %7455, %v494_v32   ;;  %v7141_v22 = vpack.c.bf16 %v4377_v19, %v4375_v18  ;;  %v4376_v24 = vld [vmem:[%s9734_s3 + $0xb0] sm:$0xff]  ;;  %v525_v26 = vld [vmem:[#allocation2 + $0x48] sm:$0xff]  ;;  %v4379_v28 = vld [vmem:[%s9734_s3 + $0xc8] sm:$0xff] }
  0x36   : > { %7138 = vmatprep.subr.bf16.mxu0 %v7137_v12  ;;  %v7143_v25 = vpack.c.bf16 %v4376_v24, %v4374_v23  ;;  %v4381_v29 = vld [vmem:[%s9734_s3 + $0xd8] sm:$0xff]  ;;  %v552_v31 = vld [vmem:[#allocation2 + $0x59] sm:$0xff]  ;;  %v4394_v6 = vld [vmem:[%s9734_s3 + $0x140] sm:$0xff] }
  0x37   : > { %v7145_v30 = vpack.c.bf16 %v4381_v29, %v4379_v28  ;;  %v528_v32 = vld [vmem:[#allocation2 + $0x60] sm:$0xff]  ;;  %v4383_v39 = vld [vmem:[%s9734_s3 + $0xe8] sm:$0xff]  ;;  %v550_v46 = vld [vmem:[#allocation2 + $0x49] sm:$0xff] }
  0x38   : > { %7140 = vmatpush1.bf16.msra.mxu0 %v7139_v17  ;;  %v4387_v47 = vld [vmem:[%s9734_s3 + $0x108] sm:$0xff]  ;;  %v532_v49 = vld [vmem:[#allocation2 + $0x80] sm:$0xff]  ;;  %v505_v61 = vld [vmem:[#allocation2 + $0x6f] sm:$0xff] }
  0x39   : > { %740 = vperm.xlu1 %7456, %v520_v33   ;;  %585 = vperm.xlu0 %7455, %v495_v34   ;;  %v501_v33 = vld [vmem:[#allocation2 + $0x4f] sm:$0xff]  ;;  %v549_v34 = vld [vmem:[#allocation2 + $0x41] sm:$0xff]  ;;  %v7153_v50 = vpack.c.bf16 %v4389_v48, %v4387_v47  ;;  %v4395_v0 = vld [vmem:[%s9734_s3 + $0x148] sm:$0xff] }
  0x3a   : > { %7142 = vmatprep.subr.bf16.mxu0 %v7141_v22  ;;  %v504_v56 = vld [vmem:[#allocation2 + $0x67] sm:$0xff]  ;;  %v551_v9 = vld [vmem:[#allocation2 + $0x51] sm:$0xff] }
  0x3b   : > { %v553_v57 = vld [vmem:[#allocation2 + $0x61] sm:$0xff]  ;;  %v554_v17 = vld [vmem:[#allocation2 + $0x69] sm:$0xff]  ;;  %v4403_v19 = vld [vmem:[%s9734_s3 + $0x188] sm:$0xff] }
  0x3c   : > { %7144 = vmatpush1.bf16.msra.mxu0 %v7143_v25  ;;  %v529_v62 = vld [vmem:[#allocation2 + $0x68] sm:$0xff]  ;;  %v4396_v7 = vld [vmem:[%s9734_s3 + $0x150] sm:$0xff]  ;;  %v4402_v22 = vld [vmem:[%s9734_s3 + $0x180] sm:$0xff] }
  0x3d   : > { %590 = vperm.xlu1 %7456, %v496_v35   ;;  %915 = vperm.xlu0 %7455, %v544_v36   ;;  %v4378_v35 = vld [vmem:[%s9734_s3 + $0xc0] sm:$0xff]  ;;  %v4380_v36 = vld [vmem:[%s9734_s3 + $0xd0] sm:$0xff]  ;;  %v4397_v2 = vld [vmem:[%s9734_s3 + $0x158] sm:$0xff]  ;;  %v7163_v8 = vpack.c.bf16 %v4396_v7, %v4394_v6  ;;  %v1143_v7 = vlaneseq }
  0x3e   : > { %7146 = vmatprep.subr.bf16.mxu0 %v7145_v30  ;;  %v7161_v3 = vpack.c.bf16 %v4397_v2, %v4395_v0  ;;  %v4401_v12 = vld [vmem:[%s9734_s3 + $0x178] sm:$0xff]  ;;  %v4400_v15 = vld [vmem:[%s9734_s3 + $0x170] sm:$0xff]  ;;  %v4406_v30 = vld [vmem:[%s9734_s3 + $0x1a0] sm:$0xff] }
  0x3f   : > { %v557_v18 = vld [vmem:[#allocation2 + $0x81] sm:$0xff]  ;;  %v509_v47 = vld [vmem:[#allocation2 + $0x8f] sm:$0xff]  ;;  %v535_v51 = vld [vmem:[#allocation2 + $0x98] sm:$0xff]  ;;  %vm5235_vm10 = vcmp.lt.s32.totalorder %v1143_v7, 256 }
  0x40   : > { %v4404_v23 = vld [vmem:[%s9734_s3 + $0x190] sm:$0xff]  ;;  %v4409_v28 = vld [vmem:[%s9734_s3 + $0x1b8] sm:$0xff]  ;;  %v7909_v2 = vld [vmem:[%s9732_s1 + $0x1] ss:$0 sm:$0xff] }
  0x41   : > { %920 = vperm.xlu1 %7456, %v545_v37   ;;  %745 = vperm.xlu0 %7455, %v521_v38   ;;  %v7147_v37 = vpack.c.bf16 %v4380_v36, %v4378_v35  ;;  %v526_v38 = vld [vmem:[#allocation2 + $0x50] sm:$0xff]  ;;  %v7171_v24 = vpack.c.bf16 %v4404_v23, %v4402_v22  ;;  %v512_v25 = vld [vmem:[#allocation2 + $0xa7] sm:$0xff]  ;;  %v4411_v35 = vld [vmem:[%s9734_s3 + $0x1c8] sm:$0xff]  ;;  %5238 = vst.msk [vmem:[#allocation4 + $0x7] ss:$8 sm:$0x3] %vm5235_vm10, %v7529_v1 }
  0x42   : > { %v4413_v36 = vld [vmem:[%s9734_s3 + $0x1d8] sm:$0xff]  ;;  %5241 = vst.msk [vmem:[#allocation4 + $0x34] ss:$8 sm:$0x3] %vm5235_vm10, %v7529_v1 }
  0x43   : > { %7148 = vmatpush1.bf16.msra.mxu0 %v7147_v37  ;;  %v7177_v37 = vpack.c.bf16 %v4413_v36, %v4411_v35  ;;  %v513_v48 = vld [vmem:[#allocation2 + $0xaf] sm:$0xff]  ;;  %v565_v36 = vld [vmem:[#allocation2 + $0xc1] sm:$0xff] }
  0x44   : > { %v562_v55 = vld [vmem:[#allocation2 + $0xa9] sm:$0xff] }
  0x45   : > { %595 = vperm.xlu1 %7456, %v497_v40   ;;  %925 = vperm.xlu0 %7455, %v546_v41   ;;  %v4385_v40 = vld [vmem:[%s9734_s3 + $0xf8] sm:$0xff]  ;;  %v507_v41 = vld [vmem:[#allocation2 + $0x7f] sm:$0xff] }
  0x46   : > { %v7149_v42 = vpack.c.bf16 %v4385_v40, %v4383_v39  ;;  %v4412_v39 = vld [vmem:[%s9734_s3 + $0x1d0] sm:$0xff] }
  0x48   : > { %7150 = vmatprep.subr.bf16.mxu0 %v7149_v42  ;;  %v555_v42 = vld [vmem:[#allocation2 + $0x71] sm:$0xff] }
  0x49   : > { %600 = vperm.xlu1 %7456, %v498_v59   ;;  %750 = vperm.xlu0 %7455, %v522_v60   ;;  %v4390_v59 = vld [vmem:[%s9734_s3 + $0x120] sm:$0xff]  ;;  %v4392_v60 = vld [vmem:[%s9734_s3 + $0x130] sm:$0xff] }
  0x4a   : > { %7152 = vmatpush1.bf16.msra.mxu0 %v7151_v45  ;;  %v7159_v63 = vpack.c.bf16 %v4392_v60, %v4390_v59  ;;  %v7181_v45 = vpack.c.bf16 %v4417_v44, %v4415_v43  ;;  %v560_v59 = vld [vmem:[#allocation2 + $0x99] sm:$0xff] }
  0x4b   : > { %7154 = vmatprep.subr.bf16.mxu0 %v7153_v50  ;;  %v538_v50 = vld [vmem:[#allocation2 + $0xb0] sm:$0xff]  ;;  %v536_v60 = vld [vmem:[#allocation2 + $0xa0] sm:$0xff] }
  0x4d   : > { %930 = vperm.xlu1 %7456, %v547_v4   ;;  %755 = vperm.xlu0 %7455, %v523_v5   ;;  %v530_v4 = vld [vmem:[#allocation2 + $0x70] sm:$0xff]  ;;  %v508_v5 = vld [vmem:[#allocation2 + $0x87] sm:$0xff] }
  0x4e   : > { %7156 = vmatpush1.bf16.msra.mxu0 %v7155_v53  ;;  %v4416_v53 = vld [vmem:[%s9734_s3 + $0x1f0] sm:$0xff] }
  0x4f   : > { %7158 = vmatprep.subr.bf16.mxu0 %v7157_v58  ;;  %v7183_v54 = vpack.c.bf16 %v4416_v53, %v4414_v52  ;;  %v559_v58 = vld [vmem:[#allocation2 + $0x91] sm:$0xff] }
  0x51   : > { %775 = vperm.xlu1 %7456, %v527_v10   ;;  %620 = vperm.xlu0 %7455, %v502_v11   ;;  %v533_v10 = vld [vmem:[#allocation2 + $0x88] sm:$0xff]  ;;  %v4399_v11 = vld [vmem:[%s9734_s3 + $0x168] sm:$0xff] }
  0x52   : > { %7160 = vmatpush1.bf16.msra.mxu0 %v7159_v63 }
  0x53   : > { %7162 = vmatprep.subr.bf16.mxu0 %v7161_v3  ;;  %v515_v3 = vld [vmem:[#allocation2 + $0xbf] sm:$0xff] }
  0x55   : > { %605 = vperm.xlu1 %7456, %v499_v13   ;;  %935 = vperm.xlu0 %7455, %v548_v14   ;;  %v7165_v13 = vpack.c.bf16 %v4401_v12, %v4399_v11  ;;  %v4398_v14 = vld [vmem:[%s9734_s3 + $0x160] sm:$0xff] }
  0x56   : > { %7164 = vmatpush1.bf16.msra.mxu0 %v7163_v8  ;;  %v7167_v16 = vpack.c.bf16 %v4400_v15, %v4398_v14  ;;  %v7914_v8 = vld [vmem:[%s9732_s1] ss:$0 sm:$0xff]  ;;  %v7922_v14 = vld [vmem:[%s9732_s1 + $0x2] ss:$0 sm:$0xff]  ;;  %v561_v15 = vld [vmem:[#allocation2 + $0xa1] sm:$0xff] }
  0x57   : > { %7166 = vmatprep.subr.bf16.mxu0 %v7165_v13 }
  0x59   : > { %610 = vperm.xlu1 %7456, %v500_v20   ;;  %760 = vperm.xlu0 %7455, %v524_v21   ;;  %v4405_v20 = vld [vmem:[%s9734_s3 + $0x198] sm:$0xff] }
  0x5a   : > { %7168 = vmatpush1.bf16.msra.mxu0 %v7167_v16  ;;  %v7169_v21 = vpack.c.bf16 %v4405_v20, %v4403_v19  ;;  %v540_v16 = vld [vmem:[#allocation2 + $0xc0] sm:$0xff]  ;;  %v7926_v19 = vshrl.u32 %v1143_v7, 7  ;;  %v5387_v7 = vld [vmem:[%s9736_s5 + $0x60] sm:$0xff] }
  0x5c   : > { %7170 = vmatprep.subr.bf16.mxu0 %v7169_v21 }
  0x5d   : > { %765 = vperm.xlu1 %7456, %v525_v26   ;;  %625 = vperm.xlu0 %7455, %v503_v27   ;;  %v506_v26 = vld [vmem:[#allocation2 + $0x77] sm:$0xff] }
  0x5e   : > { %7172 = vmatpush1.bf16.msra.mxu0 %v7171_v24  ;;  %v4407_v27 = vld [vmem:[%s9734_s3 + $0x1a8] sm:$0xff] }
  0x5f   : > { %v7173_v29 = vpack.c.bf16 %v4409_v28, %v4407_v27  ;;  %v516_v27 = vld [vmem:[#allocation2 + $0xc7] sm:$0xff] }
  0x61   : > { %955 = vperm.xlu1 %7456, %v552_v31   ;;  %780 = vperm.xlu0 %7455, %v528_v32   ;;  %v4408_v31 = vld [vmem:[%s9734_s3 + $0x1b0] sm:$0xff] }
  0x62   : > { %v7175_v32 = vpack.c.bf16 %v4408_v31, %v4406_v30  ;;  %7174 = vmatprep.subr.bf16.mxu0 %v7173_v29  ;;  %v564_v31 = vld [vmem:[#allocation2 + $0xb9] sm:$0xff] }
  0x64   : > { %7176 = vmatpush1.bf16.msra.mxu0 %v7175_v32 }
  0x65   : > { %615 = vperm.xlu1 %7456, %v501_v33   ;;  %940 = vperm.xlu0 %7455, %v549_v34   ;;  %v537_v33 = vld [vmem:[#allocation2 + $0xa8] sm:$0xff]  ;;  %v531_v34 = vld [vmem:[#allocation2 + $0x78] sm:$0xff] }
  0x66   : > { %7178 = vmatprep.subr.bf16.mxu0 %v7177_v37 }
  0x69   : > { %770 = vperm.xlu1 %7456, %v526_v38   ;;  %645 = vperm.xlu0 %7455, %v507_v41   ;;  %v4410_v38 = vld [vmem:[%s9734_s3 + $0x1c0] sm:$0xff] }
  0x6a   : > { %v7179_v40 = vpack.c.bf16 %v4412_v39, %v4410_v38  ;;  %v558_v41 = vld [vmem:[#allocation2 + $0x89] sm:$0xff] }
  0x6c   : > { %7180 = vmatpush1.bf16.msra.mxu0 %v7179_v40 }
  0x6d   : > { %945 = vperm.xlu1 %7456, %v550_v46   ;;  %800 = vperm.xlu0 %7455, %v532_v49   ;;  %v534_v46 = vld [vmem:[#allocation2 + $0x90] sm:$0xff] }
  0x6e   : > { %7182 = vmatprep.subr.bf16.mxu0 %v7181_v45  ;;  %v510_v49 = vld [vmem:[#allocation2 + $0x97] sm:$0xff] }
  0x70   : > { %7184 = vmatpush1.bf16.msra.mxu0 %v7183_v54 }
  0x71   : > { %630 = vperm.xlu1 %7456, %v504_v56   ;;  %960 = vperm.xlu0 %7455, %v553_v57   ;;  %v556_v56 = vld [vmem:[#allocation2 + $0x79] sm:$0xff] }
  0x72   : > { %v511_v57 = vld [vmem:[#allocation2 + $0x9f] sm:$0xff] }
  0x75   : > { %635 = vperm.xlu1 %7456, %v505_v61   ;;  %785 = vperm.xlu0 %7455, %v529_v62   ;;  %v514_v61 = vld [vmem:[#allocation2 + $0xb7] sm:$0xff] }
  0x76   : > { %v563_v62 = vld [vmem:[#allocation2 + $0xb1] sm:$0xff] }
  0x79   : > { %790 = vperm.xlu1 %7456, %v530_v4   ;;  %650 = vperm.xlu0 %7455, %v508_v5   ;;  %v539_v4 = vld [vmem:[#allocation2 + $0xb8] sm:$0xff]  ;;  %v7530_v5 = vmov 1966171168  }
  0x7a   : > { %v1141_v6 = vunpack.c.l.s4 %v7530_v5 }
  0x7d   : > { %950 = vperm.xlu1 %7456, %v551_v9   ;;  %805 = vperm.xlu0 %7455, %v533_v10  }
  0x81   : > { %965 = vperm.xlu1 %7456, %v554_v17   ;;  %980 = vperm.xlu0 %7455, %v557_v18   ;;  %v1142_v18 = vunpack.c.0.s8 %v1141_v6 }
  0x83   : > { %v7936_v28 = vsub.s32 %v1142_v18, %v7926_v19 }
  0x85   : > { %670 = vperm.xlu1 %7456, %v512_v25   ;;  %640 = vperm.xlu0 %7455, %v506_v26   ;;  %v7933_v26 = vld [vmem:[%s9733_s2] ss:$0 sm:$0xff] }
  0x89   : > { %825 = vperm.xlu1 %7456, %v537_v33   ;;  %795 = vperm.xlu0 %7455, %v531_v34  }
  0x8d   : > { %985 = vperm.xlu1 %7456, %v558_v41   ;;  %970 = vperm.xlu0 %7455, %v555_v42   ;;  %v541_v41 = vld [vmem:[#allocation2 + $0xc8] sm:$0xff] }
  0x91   : > { %810 = vperm.xlu1 %7456, %v534_v46   ;;  %655 = vperm.xlu0 %7455, %v509_v47  }
  0x95   : > { %675 = vperm.xlu1 %7456, %v513_v48   ;;  %660 = vperm.xlu0 %7455, %v510_v49  }
  0x99   : > { %830 = vperm.xlu1 %7456, %v538_v50   ;;  %815 = vperm.xlu0 %7455, %v535_v51  }
  0x9d   : > { %1005 = vperm.xlu1 %7456, %v562_v55   ;;  %975 = vperm.xlu0 %7455, %v556_v56   ;;  %v566_v55 = vld [vmem:[#allocation2 + $0xc9] sm:$0xff] }
  0xa1   : > { %665 = vperm.xlu1 %7456, %v511_v57   ;;  %990 = vperm.xlu0 %7455, %v559_v58  }
  0xa5   : > { %995 = vperm.xlu1 %7456, %v560_v59   ;;  %820 = vperm.xlu0 %7455, %v536_v60  }
  0xa8   : > { %v576_v63 = vpop.permute.xlu1 %575  ;;  %v571_v0 = vpop.permute.xlu0 %570 }
  0xa9   : > { %680 = vperm.xlu1 %7456, %v514_v61   ;;  %1010 = vperm.xlu0 %7455, %v563_v62   ;;  %v698_v13 = vmul.f32 %v7914_v8, %v576_v63  ;;  %v697_v17 = vmul.f32 %v7914_v8, %v571_v0 }
  0xac   : > { %v731_v9 = vpop.permute.xlu1 %730  ;;  %v726_v10 = vpop.permute.xlu0 %725 }
  0xad   : > { %v853_v11 = vmul.f32 %v7909_v2, %v731_v9  ;;  %v852_v12 = vmul.f32 %v7909_v2, %v726_v10  ;;  %685 = vperm.xlu1 %7456, %v515_v3   ;;  %835 = vperm.xlu0 %7455, %v539_v4  }
  0xaf   : > { %v878_v20 = vadd.f32 %v853_v11, %v698_v13  ;;  %v877_v23 = vadd.f32 %v852_v12, %v697_v17 }
  0xb0   : > { %v911_v21 = vpop.permute.xlu1 %910  ;;  %v906_v22 = vpop.permute.xlu0 %905 }
  0xb1   : > { %v1033_v24 = vmul.f32 %v7922_v14, %v911_v21  ;;  %v1032_v25 = vmul.f32 %v7922_v14, %v906_v22  ;;  %1000 = vperm.xlu1 %7456, %v561_v15   ;;  %840 = vperm.xlu0 %7455, %v540_v16  }
  0xb3   : > { %v1058_v29 = vadd.f32 %v1033_v24, %v878_v20  ;;  %v1057_v30 = vadd.f32 %v1032_v25, %v877_v23 }
  0xb4   : > { %v736_v32 = vpop.permute.xlu1 %735  ;;  %v581_v33 = vpop.permute.xlu0 %580 }
  0xb5   : > { %v1090_v34 = vadd.f32 %v7933_v26, %v1058_v29  ;;  %v1089_v35 = vadd.f32 %v7933_v26, %v1057_v30  ;;  %690 = vperm.xlu1 %7456, %v516_v27   ;;  %1015 = vperm.xlu0 %7455, %v564_v31   ;;  %v854_v49 = vmul.f32 %v7909_v2, %v736_v32 }
  0xb6   : > { %v699_v50 = vmul.f32 %v7914_v8, %v581_v33 }
  0xb7   : > { %v1188_v37 = vcombine.high %v1090_v34, %v1090_v34  ;;  %v1195_v38 = vrot.slane %v1090_v34, %v7936_v28  ;;  %v1139_v39 = vcombine.high %v1089_v35, %v1089_v35  ;;  %v1146_v40 = vrot.slane %v1089_v35, %v7936_v28 }
  0xb8   : > { %v741_v42 = vpop.permute.xlu1 %740  ;;  %v586_v43 = vpop.permute.xlu0 %585  ;;  %v879_v11 = vadd.f32 %v854_v49, %v699_v50 }
  0xb9   : > { %v1202_v44 = vrot.slane %v1188_v37, %v7936_v28  ;;  %v1203_v45 = vcombine.high %v1195_v38, %v1195_v38  ;;  %v1153_v46 = vrot.slane %v1139_v39, %v7936_v28  ;;  %1020 = vperm.xlu1 %7456, %v565_v36   ;;  %v1211_v47 = vrot.slane %v1195_v38, %v7936_v28 }
  0xba   : > { %v1154_v48 = vcombine.high %v1146_v40, %v1146_v40  ;;  %845 = vperm.xlu0 %7455, %v541_v41   ;;  %v1162_v56 = vrot.slane %v1146_v40, %v7936_v28  ;;  %v855_v59 = vmul.f32 %v7909_v2, %v741_v42  ;;  %v700_v3 = vmul.f32 %v7914_v8, %v586_v43 }
  0xbb   : > { %v1204_v51 = vcombine.high %v1202_v44, %v1202_v44  ;;  %v1218_v52 = vrot.slane %v1202_v44, %v7936_v28  ;;  %v1225_v53 = vrot.slane %v1203_v45, %v7936_v28  ;;  %v1155_v54 = vcombine.high %v1153_v46, %v1153_v46 }
  0xbc   : > { %v1169_v57 = vrot.slane %v1153_v46, %v7936_v28  ;;  %v1176_v58 = vrot.slane %v1154_v48, %v7936_v28  ;;  %v591_v60 = vpop.permute.xlu1 %590  ;;  %v916_v61 = vpop.permute.xlu0 %915  ;;  %v880_v29 = vadd.f32 %v855_v59, %v700_v3 }
  0xbd   : > { %v7954_v62 = vrot.slane %v1204_v51, %v7936_v28  ;;  %v1234_v63 = vcombine.high %v1218_v52, %v1218_v52  ;;  %v6802_v0 = vcombine.high %v1211_v47, %v1225_v53  ;;  %v1183_v4 = vrot.slane %v1155_v54, %v7936_v28 }
  0xbe   : > { %v1185_v5 = vcombine.high %v1169_v57, %v1169_v57  ;;  %v2364_v6 = vcombine.low %v1162_v56, %v1176_v58  ;;  %v6801_v9 = vcombine.high %v1162_v56, %v1176_v58  ;;  %1025 = vperm.xlu0 %7455, %v566_v55   ;;  %v2386_v16 = vrot.slane %v1169_v57, %v7936_v28 }
  0xbf   : > { %v2443_v10 = vcombine.low %v1218_v52, %v7954_v62  ;;  %v1187_v12 = vcombine.high %v1183_v4, %v1183_v4  ;;  %v2450_v20 = vrot.slane %v6802_v0, %v7936_v28  ;;  %v2464_v22 = vrot.slane %v1234_v63, %v7936_v28 }
  0xc0   : > { %v2372_v13 = vrot.slane %v2364_v6, %v7936_v28  ;;  %v2379_v15 = vrot.slane %v6801_v9, %v7936_v28  ;;  %v921_v17 = vpop.permute.xlu1 %920  ;;  %v746_v18 = vpop.permute.xlu0 %745  ;;  %v2403_v23 = vcombine.low %v1183_v4, %v1185_v5  ;;  %v2425_v24 = vrot.slane %v1225_v53, %v7936_v28 }
  0xc1   : > { %v2457_v21 = vrot.slane %v2443_v10, %v7936_v28  ;;  %v2404_v27 = vcombine.low %v1187_v12, %v1211_v47  ;;  %v2401_v31 = vrot.slane %v2386_v16, %v7936_v28  ;;  %v1034_v32 = vmul.f32 %v7922_v14, %v916_v61 }
  0xc2   : > { %v2387_v25 = vcombine.low %v2372_v13, %v2379_v15  ;;  %v1035_v33 = vmul.f32 %v7922_v14, %v921_v17  ;;  %v2411_v35 = vrot.slane %v2403_v23, %v7936_v28  ;;  %v856_v37 = vmul.f32 %v7909_v2, %v746_v18 }
  0xc3   : > { %v2465_v30 = vcombine.low %v2450_v20, %v2457_v21  ;;  %v2418_v36 = vrot.slane %v2404_v27, %v7936_v28  ;;  %v2479_v41 = vrot.slane %v2464_v22, %v7936_v28  ;;  %v1059_v42 = vadd.f32 %v1034_v32, %v879_v11 }
  0xc4   : > { %v2394_v34 = vrot.slane %v2387_v25, %v7936_v28  ;;  %v7973_v38 = vpop.permute.xlu1 %595  ;;  %v926_v39 = vpop.permute.xlu0 %925  ;;  %v1060_v43 = vadd.f32 %v1035_v33, %v880_v29  ;;  %v2440_v44 = vrot.slane %v2425_v24, %v7936_v28  ;;  %v701_v47 = vmul.f32 %v7914_v8, %v591_v60 }
  0xc5   : > { %v2472_v40 = vrot.slane %v2465_v30, %v7936_v28  ;;  %v2426_v46 = vcombine.low %v2411_v35, %v2418_v36  ;;  %v1236_v49 = vcombine.high %v7954_v62, %v7954_v62  ;;  %v1091_v50 = vadd.f32 %v7933_v26, %v1059_v42 }
  0xc6   : > { %v2402_v45 = vcombine.low %v2394_v34, %v2401_v31  ;;  %v1092_v51 = vadd.f32 %v7933_v26, %v1060_v43  ;;  %v881_v54 = vadd.f32 %v856_v37, %v701_v47  ;;  %v1036_v55 = vmul.f32 %v7922_v14, %v926_v39 }
  0xc7   : > { %v2480_v48 = vcombine.low %v2472_v40, %v2479_v41  ;;  %v2433_v52 = vrot.slane %v2426_v46, %v7936_v28  ;;  %v1237_v58 = vcombine.high %v1091_v50, %v1091_v50  ;;  %v1244_v59 = vrot.slane %v1091_v50, %v7936_v28 }
  0xc8   : > { %v3965_v53 = vsel %vm3964_vm2, %v2402_v45, -inf  ;;  %v7988_v60 = vpop.permute.xlu1 %600  ;;  %v7990_v61 = vpop.permute.xlu0 %750  ;;  %v1286_v0 = vcombine.high %v1092_v51, %v1092_v51  ;;  %v1293_v3 = vrot.slane %v1092_v51, %v7936_v28  ;;  %v1061_v13 = vadd.f32 %v1036_v55, %v881_v54 }
  0xc9   : > { %v3979_v56 = vsel %vm3964_vm2, %v2480_v48, -inf  ;;  %v3966_v57 = vrot.slane %v3965_v53, 4  ;;  %v2441_v63 = vcombine.low %v2433_v52, %v2440_v44  ;;  %v1251_v5 = vrot.slane %v1237_v58, %v7936_v28 }
  0xca   : > { %v3980_v62 = vrot.slane %v3979_v56, 4  ;;  %v1252_v6 = vcombine.high %v1244_v59, %v1244_v59  ;;  %v1260_v9 = vrot.slane %v1244_v59, %v7936_v28  ;;  %v1300_v12 = vrot.slane %v1286_v0, %v7936_v28 }
  0xcb   : > { %v3967_v4 = vmax.f32 %v3965_v53, %v3966_v57  ;;  %v3972_v11 = vsel %vm3964_vm2, %v2441_v63, -inf  ;;  %v1253_v17 = vcombine.high %v1251_v5, %v1251_v5  ;;  %v1301_v18 = vcombine.high %v1293_v3, %v1293_v3 }
  0xcc   : > { %v3981_v10 = vmax.f32 %v3979_v56, %v3980_v62  ;;  %v3973_v16 = vrot.slane %v3972_v11, 4  ;;  %v1274_v21 = vrot.slane %v1252_v6, %v7936_v28  ;;  %v1282_v22 = vcombine.high %v1260_v9, %v1260_v9  ;;  %v8000_v30 = vpop.permute.xlu1 %930  ;;  %v8002_v31 = vpop.permute.xlu0 %755 }
  0xcd   : > { %v3968_v15 = vrot.slane %v3967_v4, 2  ;;  %v2481_v23 = vcombine.low %v1236_v49, %v1260_v9  ;;  %v1267_v27 = vrot.slane %v1251_v5, %v7936_v28  ;;  %v1281_v29 = vrot.slane %v1253_v17, %v7936_v28 }
  0xce   : > { %v3982_v20 = vrot.slane %v3981_v10, 2  ;;  %v3974_v25 = vmax.f32 %v3972_v11, %v3973_v16  ;;  %v1284_v33 = vcombine.high %v1274_v21, %v1274_v21  ;;  %v2482_v34 = vcombine.low %v1274_v21, %v1282_v22 }
  0xcf   : > { %v3969_v24 = vmax.f32 %v3967_v4, %v3968_v15  ;;  %v1302_v35 = vcombine.high %v1300_v12, %v1300_v12  ;;  %v2520_v39 = vcombine.low %v1267_v27, %v1281_v29  ;;  %v6803_v40 = vcombine.high %v1267_v27, %v1281_v29 }
  0xd0   : > { %v3983_v32 = vmax.f32 %v3981_v10, %v3982_v20  ;;  %v3975_v37 = vrot.slane %v3974_v25, 2  ;;  %v2489_v41 = vrot.slane %v2481_v23, %v7936_v28  ;;  %v2496_v42 = vrot.slane %v2482_v34, %v7936_v28  ;;  %v8013_v56 = vpop.permute.xlu1 %775  ;;  %v8015_v57 = vpop.permute.xlu0 %620 }
  0xd1   : > { %v3970_v36 = vrot.slane %v3969_v24, 1  ;;  %v2503_v43 = vrot.slane %v1284_v33, %v7936_v28  ;;  %v1309_v44 = vrot.slane %v1293_v3, %v7936_v28  ;;  %v2528_v46 = vrot.slane %v2520_v39, %v7936_v28 }
  0xd2   : > { %v3976_v45 = vmax.f32 %v3974_v25, %v3975_v37  ;;  %v2535_v47 = vrot.slane %v6803_v40, %v7936_v28  ;;  %v3984_v48 = vrot.slane %v3983_v32, 1  ;;  %v2504_v50 = vcombine.low %v2489_v41, %v2496_v42 }
  0xd3   : > { %v3971_v49 = vmax.f32 %v3969_v24, %v3970_v36  ;;  %v2518_v51 = vrot.slane %v2503_v43, %v7936_v28  ;;  %v1323_v54 = vrot.slane %v1301_v18, %v7936_v28  ;;  %v1330_v55 = vrot.slane %v1302_v35, %v7936_v28 }
  0xd4   : > { %v3977_v52 = vrot.slane %v3976_v45, 1  ;;  %v2543_v53 = vcombine.low %v2528_v46, %v2535_v47  ;;  %v2511_v58 = vrot.slane %v2504_v50, %v7936_v28  ;;  %v1331_v59 = vcombine.high %v1309_v44, %v1309_v44  ;;  %v8031_v27 = vpop.permute.xlu1 %605  ;;  %v8033_v29 = vpop.permute.xlu0 %935 }
  0xd5   : > { %v2542_v62 = vrot.slane %v1309_v44, %v7936_v28  ;;  %v1093_v63 = vadd.f32 %v7933_v26, %v1061_v13  ;;  %v1316_v3 = vrot.slane %v1300_v12, %v7936_v28  ;;  %v1333_v4 = vcombine.high %v1323_v54, %v1323_v54 }
  0xd6   : > { %v3978_v0 = vmax.f32 %v3976_v45, %v3977_v52  ;;  %v2550_v5 = vrot.slane %v2543_v53, %v7936_v28  ;;  %v2519_v6 = vcombine.low %v2511_v58, %v2518_v51  ;;  %v2559_v10 = vcombine.low %v1323_v54, %v1331_v59 }
  0xd7   : > { %v2557_v9 = vrot.slane %v2542_v62, %v7936_v28  ;;  %v2581_v11 = vrot.slane %v1330_v55, %v7936_v28  ;;  %v3985_v15 = vmax.f32 %v3983_v32, %v3984_v48  ;;  %v2560_v16 = vcombine.low %v1333_v4, %v1316_v3 }
  0xd8   : > { %v702_v17 = vmul.f32 %v7914_v8, %v7973_v38  ;;  %v1335_v18 = vcombine.high %v1093_v63, %v1093_v63  ;;  %v4288_v13 = vsel %vm4287_vm3, %v3978_v0, %v3971_v49  ;;  %v3986_v12 = vsel %vm3964_vm2, %v2519_v6, -inf  ;;  %v8048_v58 = vpop.permute.xlu0 %760 }
  0xd9   : > { %v2558_v20 = vcombine.low %v2550_v5, %v2557_v9  ;;  %v6804_v21 = vcombine.high %v1316_v3, %v1330_v55  ;;  %v3987_v22 = vrot.slane %v3986_v12, 4  ;;  %v2567_v23 = vrot.slane %v2559_v10, %v7936_v28  ;;  %v8046_v55 = vpop.permute.xlu1 %610 }
  0xda   : > { %v2574_v24 = vrot.slane %v2560_v16, %v7936_v28  ;;  %v1342_v25 = vrot.slane %v1093_v63, %v7936_v28  ;;  %v2596_v38 = vrot.slane %v2581_v11, %v7936_v28  ;;  %v1349_v33 = vrot.slane %v1335_v18, %v7936_v28 }
  0xdb   : > { %v3993_v32 = vsel %vm3964_vm2, %v2558_v20, -inf  ;;  %v857_v34 = vmul.f32 %v7909_v2, %v7990_v61  ;;  %v3988_v35 = vmax.f32 %v3986_v12, %v3987_v22  ;;  %v2606_v40 = vrot.slane %v6804_v21, %v7936_v28 }
  0xdc   : > { %v2582_v36 = vcombine.low %v2567_v23, %v2574_v24  ;;  %v3994_v37 = vrot.slane %v3993_v32, 4  ;;  %v1350_v39 = vcombine.high %v1342_v25, %v1342_v25  ;;  %v1351_v41 = vcombine.high %v1349_v33, %v1349_v33 }
  0xdd   : > { %v1358_v42 = vrot.slane %v1342_v25, %v7936_v28  ;;  %v1365_v43 = vrot.slane %v1349_v33, %v7936_v28  ;;  %v3989_v44 = vrot.slane %v3988_v35, 2  ;;  %v882_v50 = vadd.f32 %v857_v34, %v702_v17 }
  0xde   : > { %v2589_v45 = vrot.slane %v2582_v36, %v7936_v28  ;;  %v3995_v46 = vmax.f32 %v3993_v32, %v3994_v37  ;;  %v1372_v47 = vrot.slane %v1350_v39, %v7936_v28  ;;  %v1379_v48 = vrot.slane %v1351_v41, %v7936_v28 }
  0xdf   : > { %v1380_v61 = vcombine.high %v1358_v42, %v1358_v42  ;;  %v1381_v49 = vcombine.high %v1365_v43, %v1365_v43  ;;  %v3990_v51 = vmax.f32 %v3988_v35, %v3989_v44  ;;  %v1037_v0 = vmul.f32 %v7922_v14, %v8000_v30 }
  0xe0   : > { %v2597_v52 = vcombine.low %v2589_v45, %v2596_v38  ;;  %v3996_v53 = vrot.slane %v3995_v46, 2  ;;  %v1382_v54 = vcombine.high %v1372_v47, %v1372_v47  ;;  %v1383_v59 = vcombine.high %v1379_v48, %v1379_v48 }
  0xe1   : > { %v2599_v62 = vcombine.low %v1358_v42, %v1372_v47  ;;  %v2638_v63 = vcombine.low %v1379_v48, %v1381_v49  ;;  %v3991_v3 = vrot.slane %v3990_v51, 1  ;;  %v2620_v5 = vrot.slane %v1380_v61, %v7936_v28 }
  0xe2   : > { %v4000_v4 = vsel %vm3964_vm2, %v2597_v52, -inf  ;;  %v2637_v6 = vcombine.low %v1382_v54, %v1365_v43  ;;  %v3997_v9 = vmax.f32 %v3995_v46, %v3996_v53  ;;  %v4290_v17 = vsel %vm4289_vm4, %v3985_v15, %v4288_v13  ;;  %v8064_v15 = vpop.permute.xlu1 %765  ;;  %v8066_v13 = vpop.permute.xlu0 %625 }
  0xe3   : > { %v4001_v10 = vrot.slane %v4000_v4, 4  ;;  %v2613_v11 = vrot.slane %v2599_v62, %v7936_v28  ;;  %v2652_v16 = vrot.slane %v2638_v63, %v7936_v28  ;;  %v2659_v12 = vrot.slane %v1383_v59, %v7936_v28 }
  0xe4   : > { %v2645_v18 = vrot.slane %v2637_v6, %v7936_v28  ;;  %v703_v21 = vmul.f32 %v7914_v8, %v7988_v60  ;;  %v1062_v22 = vadd.f32 %v1037_v0, %v882_v50  ;;  %v3992_v23 = vmax.f32 %v3990_v51, %v3991_v3 }
  0xe5   : > { %v4002_v30 = vmax.f32 %v4000_v4, %v4001_v10  ;;  %v2621_v20 = vcombine.low %v2606_v40, %v2613_v11  ;;  %v2635_v24 = vrot.slane %v2620_v5, %v7936_v28  ;;  %v858_v38 = vmul.f32 %v7909_v2, %v8002_v31 }
  0xe6   : > { %v2660_v25 = vcombine.low %v2645_v18, %v2652_v16  ;;  %v3998_v32 = vrot.slane %v3997_v9, 1  ;;  %v1094_v35 = vadd.f32 %v7933_v26, %v1062_v22  ;;  %v2674_v36 = vrot.slane %v2659_v12, %v7936_v28  ;;  %v8084_v52 = vpop.permute.xlu1 %955  ;;  %v8086_v53 = vpop.permute.xlu0 %780 }
  0xe7   : > { %v4003_v33 = vrot.slane %v4002_v30, 2  ;;  %v2628_v34 = vrot.slane %v2621_v20, %v7936_v28  ;;  %v862_v37 = vmul.f32 %v7909_v2, %v8013_v56  ;;  %v707_v31 = vmul.f32 %v7914_v8, %v8015_v57 }
  0xe8   : > { %v2667_v60 = vrot.slane %v2660_v25, %v7936_v28  ;;  %v1384_v41 = vcombine.high %v1094_v35, %v1094_v35  ;;  %v1391_v42 = vrot.slane %v1094_v35, %v7936_v28  ;;  %v883_v44 = vadd.f32 %v858_v38, %v703_v21 }
  0xe9   : > { %v4004_v39 = vmax.f32 %v4002_v30, %v4003_v33  ;;  %v2636_v40 = vcombine.low %v2628_v34, %v2635_v24  ;;  %v8077_v45 = vadd.f32 %v862_v37, %v707_v31  ;;  %v1038_v46 = vmul.f32 %v7922_v14, %v8033_v29 }
  0xea   : > { %v2675_v43 = vcombine.low %v2667_v60, %v2674_v36  ;;  %v1398_v56 = vrot.slane %v1384_v41, %v7936_v28  ;;  %v1399_v61 = vcombine.high %v1391_v42, %v1391_v42  ;;  %v3999_v49 = vmax.f32 %v3997_v9, %v3998_v32  ;;  %v8098_v24 = vpop.permute.xlu1 %615  ;;  %v941_v25 = vpop.permute.xlu0 %940 }
  0xeb   : > { %v4005_v47 = vrot.slane %v4004_v39, 1  ;;  %v4007_v48 = vsel %vm3964_vm2, %v2636_v40, -inf  ;;  %v1063_v51 = vadd.f32 %v1038_v46, %v883_v44  ;;  %v4292_v54 = vsel %vm4291_vm5, %v3992_v23, %v4290_v17 }
  0xec   : > { %v4008_v57 = vrot.slane %v4007_v48, 4  ;;  %v4014_v50 = vsel %vm3964_vm2, %v2675_v43, -inf  ;;  %v1400_v62 = vcombine.high %v1398_v56, %v1398_v56  ;;  %v1414_v29 = vrot.slane %v1398_v56, %v7936_v28 }
  0xed   : > { %v4015_v59 = vrot.slane %v4014_v50, 4  ;;  %v1407_v0 = vrot.slane %v1391_v42, %v7936_v28  ;;  %v1421_v3 = vrot.slane %v1399_v61, %v7936_v28  ;;  %v1095_v4 = vadd.f32 %v7933_v26, %v1063_v51 }
  0xee   : > { %v4009_v63 = vmax.f32 %v4007_v48, %v4008_v57  ;;  %v4006_v5 = vmax.f32 %v4004_v39, %v4005_v47  ;;  %v1428_v9 = vrot.slane %v1400_v62, %v7936_v28  ;;  %v1430_v11 = vcombine.high %v1414_v29, %v1414_v29 }
  0xef   : > { %v4016_v6 = vmax.f32 %v4014_v50, %v4015_v59  ;;  %v2676_v16 = vcombine.low %v1407_v0, %v1421_v3  ;;  %v6805_v17 = vcombine.high %v1407_v0, %v1421_v3  ;;  %v4294_v18 = vsel %vm4293_vm6, %v3999_v49, %v4292_v54  ;;  %v8113_v54 = vpop.permute.xlu1 %770  ;;  %v646_v59 = vpop.permute.xlu0 %645 }
  0xf0   : > { %v4010_v10 = vrot.slane %v4009_v63, 2  ;;  %v1433_v30 = vcombine.high %v1095_v4, %v1095_v4  ;;  %v2698_v23 = vrot.slane %v1414_v29, %v7936_v28  ;;  %v4296_v38 = vsel %vm4295_vm7, %v4006_v5, %v4294_v18 }
  0xf1   : > { %v4017_v12 = vrot.slane %v4016_v6, 2  ;;  %v2684_v21 = vrot.slane %v2676_v16, %v7936_v28  ;;  %v2691_v22 = vrot.slane %v6805_v17, %v7936_v28  ;;  %v1440_v33 = vrot.slane %v1095_v4, %v7936_v28 }
  0xf2   : > { %v4011_v20 = vmax.f32 %v4009_v63, %v4010_v10  ;;  %v1447_v34 = vrot.slane %v1433_v30, %v7936_v28  ;;  %v2715_v36 = vcombine.low %v1428_v9, %v1430_v11  ;;  %v1432_v37 = vcombine.high %v1428_v9, %v1428_v9 }
  0xf3   : > { %v4018_v32 = vmax.f32 %v4016_v6, %v4017_v12  ;;  %v2699_v60 = vcombine.low %v2684_v21, %v2691_v22  ;;  %v1448_v39 = vcombine.high %v1440_v33, %v1440_v33  ;;  %v1456_v41 = vrot.slane %v1440_v33, %v7936_v28 }
  0xf4   : > { %v4012_v35 = vrot.slane %v4011_v20, 1  ;;  %v1449_v40 = vcombine.high %v1447_v34, %v1447_v34  ;;  %v2713_v44 = vrot.slane %v2698_v23, %v7936_v28  ;;  %v1463_v46 = vrot.slane %v1447_v34, %v7936_v28 }
  0xf5   : > { %v4019_v31 = vrot.slane %v4018_v32, 1  ;;  %v2706_v43 = vrot.slane %v2699_v60, %v7936_v28  ;;  %v1470_v48 = vrot.slane %v1448_v39, %v7936_v28  ;;  %v2716_v61 = vcombine.low %v1432_v37, %v1456_v41 }
  0xf6   : > { %v4013_v42 = vmax.f32 %v4011_v20, %v4012_v35  ;;  %v8109_v56 = vrot.slane %v1449_v40, %v7936_v28  ;;  %v2723_v50 = vrot.slane %v2715_v36, %v7936_v28  ;;  %v1479_v51 = vcombine.high %v1463_v46, %v1463_v46 }
  0xf7   : > { %v4020_v47 = vmax.f32 %v4018_v32, %v4019_v31  ;;  %v2714_v57 = vcombine.low %v2706_v43, %v2713_v44  ;;  %v2730_v29 = vrot.slane %v2716_v61, %v7936_v28  ;;  %v2737_v63 = vrot.slane %v1470_v48, %v7936_v28 }
  0xf8   : > { %v4298_v49 = vsel %vm4297_vm8, %v4013_v42, %v4296_v38  ;;  %v6806_v0 = vcombine.high %v1456_v41, %v1470_v48  ;;  %v2755_v4 = vcombine.low %v1463_v46, %v8109_v56  ;;  %v859_v5 = vmul.f32 %v7909_v2, %v8048_v58  ;;  %v946_v38 = vpop.permute.xlu1 %945 }
  0xf9   : > { %v4300_v62 = vsel %vm4299_vm9, %v4020_v47, %v4298_v49  ;;  %v4021_v3 = vsel %vm3964_vm2, %v2714_v57, -inf  ;;  %v2738_v9 = vcombine.low %v2723_v50, %v2730_v29  ;;  %v2776_v10 = vrot.slane %v1479_v51, %v7936_v28 }
  0xfa   : > { %4334 = vst [vmem:[#allocation3 + $0x8] sm:$0xff] %v4300_v62  ;;  %4526 = vmatprep.mubr.f32.mxu0 %v4300_v62  ;;  %v4022_v6 = vrot.slane %v4021_v3, 4  ;;  %v704_v11 = vmul.f32 %v7914_v8, %v8031_v27  ;;  %v2762_v16 = vrot.slane %v6806_v0, %v7936_v28  ;;  %v2769_v17 = vrot.slane %v2755_v4, %v7936_v28  ;;  %v801_v27 = vpop.permute.xlu0 %800 }
  0xfb   : > { %v1042_v18 = vmul.f32 %v7922_v14, %v8084_v52  ;;  %v2745_v30 = vrot.slane %v2738_v9, %v7936_v28  ;;  %v2752_v58 = vrot.slane %v2737_v63, %v7936_v28  ;;  %v1039_v23 = vmul.f32 %v7922_v14, %v941_v25 }
  0xfc   : > { %v4023_v12 = vmax.f32 %v4021_v3, %v4022_v6  ;;  %v2777_v20 = vcombine.low %v2762_v16, %v2769_v17  ;;  %v884_v21 = vadd.f32 %v859_v5, %v704_v11  ;;  %v2791_v33 = vrot.slane %v2776_v10, %v7936_v28 }
  0xfd   : > { %v1067_v22 = vadd.f32 %v1042_v18, %v8077_v45  ;;  %v2753_v32 = vcombine.low %v2745_v30, %v2752_v58  ;;  %v705_v34 = vmul.f32 %v7914_v8, %v8046_v55  ;;  %v860_v52 = vmul.f32 %v7909_v2, %v8064_v15 }
  0xfe   : > { %v4024_v35 = vrot.slane %v4023_v12, 2  ;;  %v2784_v60 = vrot.slane %v2777_v20, %v7936_v28  ;;  %v1064_v37 = vadd.f32 %v1039_v23, %v884_v21  ;;  %v712_v25 = vmul.f32 %v7914_v8, %v646_v59 }
  0xff   : > { %v1099_v36 = vadd.f32 %v7933_v26, %v1067_v22  ;;  %v4028_v45 = vsel %vm3964_vm2, %v2753_v32, -inf  ;;  %v1040_v31 = vmul.f32 %v7922_v14, %v946_v38  ;;  %v867_v39 = vmul.f32 %v7909_v2, %v801_v27  ;;  %v8184_v38 = vpop.permute.xlu1 %630  ;;  %v961_v27 = vpop.permute.xlu0 %960 }
 0x100   : > { %v2792_v41 = vcombine.low %v2784_v60, %v2791_v33  ;;  %v4029_v55 = vrot.slane %v4028_v45, 4  ;;  %v885_v43 = vadd.f32 %v860_v52, %v705_v34  ;;  %v8147_v44 = vmul.f32 %v7914_v8, %v8066_v13 }
 0x101   : > { %v4339_v40 = vld [vmem:[#allocation3 + $0x7] sm:$0xff]  ;;  %v1629_v42 = vcombine.high %v1099_v36, %v1099_v36  ;;  %v1636_v15 = vrot.slane %v1099_v36, %v7936_v28  ;;  %v1096_v46 = vadd.f32 %v7933_v26, %v1064_v37  ;;  %v8150_v47 = vadd.f32 %v867_v39, %v712_v25 }
 0x102   : > { %4527 = vmatmul.mubr.f32.vlgmr.msra.gmra.mrb[0].mxu0 %v4339_v40  ;;  %v4030_v48 = vmax.f32 %v4028_v45, %v4029_v55  ;;  %v4035_v61 = vsel %vm3964_vm2, %v2792_v41, -inf  ;;  %v8154_v50 = vmax.f32 %v4023_v12, %v4024_v35  ;;  %v8158_v59 = vmul.f32 %v7909_v2, %v8086_v53 }
 0x103   : > { %v1643_v49 = vrot.slane %v1629_v42, %v7936_v28  ;;  %v1644_v57 = vcombine.high %v1636_v15, %v1636_v15  ;;  %v4036_v51 = vrot.slane %v4035_v61, 4  ;;  %v1482_v62 = vcombine.high %v1096_v46, %v1096_v46 }
 0x104   : > { %v4031_v13 = vrot.slane %v4030_v48, 2  ;;  %v1652_v29 = vrot.slane %v1636_v15, %v7936_v28  ;;  %v1065_v0 = vadd.f32 %v1040_v31, %v885_v43  ;;  %v1489_v5 = vrot.slane %v1096_v46, %v7936_v28 }
 0x105   : > { %v1666_v63 = vrot.slane %v1644_v57, %v7936_v28  ;;  %v4037_v3 = vmax.f32 %v4035_v61, %v4036_v51  ;;  %v8163_v4 = vrot.slane %v1643_v49, %v7936_v28  ;;  %v1496_v6 = vrot.slane %v1482_v62, %v7936_v28  ;;  %v8202_v51 = vpop.permute.xlu1 %635  ;;  %v8204_v62 = vpop.permute.xlu0 %785 }
 0x106   : > { %v1645_v9 = vcombine.high %v1643_v49, %v1643_v49  ;;  %v8169_v53 = vmul.f32 %v7914_v8, %v8098_v24  ;;  %v1481_v11 = vcombine.high %v8109_v56, %v8109_v56  ;;  %v4032_v16 = vmax.f32 %v4030_v48, %v4031_v13 }
 0x107   : > { %v2988_v10 = vcombine.low %v1652_v29, %v1666_v63  ;;  %v6809_v17 = vcombine.high %v1652_v29, %v1666_v63  ;;  %v1497_v18 = vcombine.high %v1489_v5, %v1489_v5  ;;  %v8175_v12 = vmul.f32 %v7909_v2, %v8113_v54 }
 0x108   : > { %v4026_v30 = vrot.slane %v8154_v50, 1  ;;  %v4038_v58 = vrot.slane %v4037_v3, 2  ;;  %v1498_v21 = vcombine.high %v1496_v6, %v1496_v6  ;;  %v3010_v24 = vrot.slane %v8163_v4, %v7936_v28 }
 0x109   : > { %v2996_v20 = vrot.slane %v2988_v10, %v7936_v28  ;;  %v3003_v22 = vrot.slane %v6809_v17, %v7936_v28  ;;  %v1505_v56 = vrot.slane %v1489_v5, %v7936_v28  ;;  %v1097_v23 = vadd.f32 %v7933_v26, %v1065_v0 }
 0x10a   : > { %v8187_v54 = vrot.slane %v1645_v9, %v7936_v28  ;;  %v1512_v32 = vrot.slane %v1496_v6, %v7936_v28  ;;  %v1519_v33 = vrot.slane %v1497_v18, %v7936_v28  ;;  %v1526_v34 = vrot.slane %v1498_v21, %v7936_v28 }
 0x10b   : > { %v4033_v52 = vrot.slane %v4032_v16, 1  ;;  %v3011_v35 = vcombine.low %v2996_v20, %v3003_v22  ;;  %v1527_v60 = vcombine.high %v1505_v56, %v1505_v56  ;;  %v2793_v36 = vcombine.low %v1481_v11, %v1505_v56 }
 0x10c   : > { %v4039_v37 = vmax.f32 %v4037_v3, %v4038_v58  ;;  %v1529_v45 = vcombine.high %v1519_v33, %v1519_v33  ;;  %v2832_v25 = vcombine.low %v1512_v32, %v1526_v34  ;;  %v6807_v31 = vcombine.high %v1512_v32, %v1526_v34 }
 0x10d   : > { %v1675_v39 = vcombine.high %v8163_v4, %v8163_v4  ;;  %v3018_v40 = vrot.slane %v3011_v35, %v7936_v28  ;;  %v3025_v41 = vrot.slane %v3010_v24, %v7936_v28  ;;  %v2794_v55 = vcombine.low %v1519_v33, %v1527_v60  ;;  %v651_v35 = vpop.permute.xlu0 %650 }
 0x10e   : > { %v2815_v42 = vrot.slane %v1529_v45, %v7936_v28  ;;  %v2840_v15 = vrot.slane %v2832_v25, %v7936_v28  ;;  %v2847_v43 = vrot.slane %v6807_v31, %v7936_v28  ;;  %v1531_v46 = vcombine.high %v1097_v23, %v1097_v23 }
 0x10f   : > { %v3026_v48 = vcombine.low %v3018_v40, %v3025_v41  ;;  %v2801_v61 = vrot.slane %v2793_v36, %v7936_v28  ;;  %v2808_v49 = vrot.slane %v2794_v55, %v7936_v28  ;;  %v1538_v57 = vrot.slane %v1097_v23, %v7936_v28 }
 0x110   : > { %v4034_v13 = vmax.f32 %v4032_v16, %v4033_v52  ;;  %v4040_v29 = vrot.slane %v4039_v37, 1  ;;  %v2855_v63 = vcombine.low %v2840_v15, %v2847_v43  ;;  %v1545_v0 = vrot.slane %v1531_v46, %v7936_v28  ;;  %v8222_v52 = vpop.permute.xlu1 %790 }
 0x111   : > { %v4077_v3 = vsel %vm3964_vm2, %v3026_v48, -inf  ;;  %v2816_v4 = vcombine.low %v2801_v61, %v2808_v49  ;;  %v1546_v5 = vcombine.high %v1538_v57, %v1538_v57  ;;  %v1554_v6 = vrot.slane %v1538_v57, %v7936_v28 }
 0x112   : > { %v4078_v9 = vrot.slane %v4077_v3, 4  ;;  %v2830_v10 = vrot.slane %v2815_v42, %v7936_v28  ;;  %v1547_v11 = vcombine.high %v1545_v0, %v1545_v0  ;;  %v2862_v17 = vrot.slane %v2855_v63, %v7936_v28 }
 0x113   : > { %v2823_v18 = vrot.slane %v2816_v4, %v7936_v28  ;;  %v1568_v16 = vrot.slane %v1546_v5, %v7936_v28  ;;  %v1576_v58 = vcombine.high %v1554_v6, %v1554_v6  ;;  %v2854_v20 = vrot.slane %v1554_v6, %v7936_v28 }
 0x114   : > { %v4027_v21 = vmax.f32 %v8154_v50, %v4026_v30  ;;  %v4041_v22 = vmax.f32 %v4039_v37, %v4040_v29  ;;  %v8216_v24 = vrot.slane %v1545_v0, %v7936_v28  ;;  %v8219_v56 = vrot.slane %v1547_v11, %v7936_v28  ;;  %v951_v57 = vpop.permute.xlu1 %950 }
 0x115   : > { %v2831_v23 = vcombine.low %v2823_v18, %v2830_v10  ;;  %v1578_v32 = vcombine.high %v1568_v16, %v1568_v16  ;;  %v2869_v33 = vrot.slane %v2854_v20, %v7936_v28  ;;  %v2871_v34 = vcombine.low %v1568_v16, %v1576_v58 }
 0x116   : > { %v4301_v60 = vsel %vm4287_vm3, %v4034_v13, %v4027_v21  ;;  %v8226_v36 = vcombine.low %v8187_v54, %v1675_v39  ;;  %v888_v50 = vadd.f32 %v8158_v59, %v8147_v44  ;;  %v1043_v30 = vmul.f32 %v7922_v14, %v961_v27  ;;  %v806_v13 = vpop.permute.xlu0 %805  ;;  %v8263_v21 = vld [vmem:[%s9732_s1 + $0x1] ss:$0 sm:$0xff] }
 0x117   : > { %v4079_v37 = vmax.f32 %v4077_v3, %v4078_v9  ;;  %v4042_v45 = vsel %vm3964_vm2, %v2831_v23, -inf  ;;  %v2870_v25 = vcombine.low %v2862_v17, %v2869_v33  ;;  %v2872_v31 = vcombine.low %v1578_v32, %v8216_v24 }
 0x118   : > { %v8234_v40 = vsel %vm4289_vm4, %v4041_v22, %v4301_v60  ;;  %v4043_v41 = vrot.slane %v4042_v45, 4  ;;  %v886_v55 = vadd.f32 %v8175_v12, %v8169_v53  ;;  %v2893_v39 = vrot.slane %v8219_v56, %v7936_v28 }
 0x119   : > { %v2879_v44 = vrot.slane %v2871_v34, %v7936_v28  ;;  %v2886_v59 = vrot.slane %v2872_v31, %v7936_v28  ;;  %v4049_v27 = vsel %vm3964_vm2, %v2870_v25, -inf  ;;  %v1068_v42 = vadd.f32 %v1043_v30, %v888_v50  ;;  %v966_v31 = vpop.permute.xlu1 %965 }
 0x11a   : > { %v4044_v15 = vmax.f32 %v4042_v45, %v4043_v41  ;;  %v4050_v43 = vrot.slane %v4049_v27, 4  ;;  %v709_v46 = vmul.f32 %v7914_v8, %v8184_v38  ;;  %v1677_v48 = vcombine.high %v8187_v54, %v8187_v54  ;;  %v8283_v45 = vld [vmem:[%s9732_s1] ss:$0 sm:$0xff] }
 0x11b   : > { %v4080_v61 = vrot.slane %v4079_v37, 2  ;;  %v2894_v53 = vcombine.low %v2879_v44, %v2886_v59  ;;  %v3035_v12 = vrot.slane %v8226_v36, %v7936_v28  ;;  %v1100_v49 = vadd.f32 %v7933_v26, %v1068_v42 }
 0x11c   : > { %v4045_v29 = vrot.slane %v4044_v15, 2  ;;  %v2908_v63 = vrot.slane %v2893_v39, %v7936_v28  ;;  %v6808_v0 = vcombine.high %v8216_v24, %v8219_v56  ;;  %v4051_v3 = vmax.f32 %v4049_v27, %v4050_v43 }
 0x11d   : > { %v2901_v38 = vrot.slane %v2894_v53, %v7936_v28  ;;  %v1678_v4 = vcombine.high %v1100_v49, %v1100_v49  ;;  %v1685_v54 = vrot.slane %v1100_v49, %v7936_v28  ;;  %v713_v5 = vmul.f32 %v7914_v8, %v651_v35 }
 0x11e   : > { %v4046_v6 = vmax.f32 %v4044_v15, %v4045_v29  ;;  %v4052_v9 = vrot.slane %v4051_v3, 2  ;;  %v1041_v26 = vmul.f32 %v7922_v14, %v951_v57  ;;  %v868_v10 = vmul.f32 %v7909_v2, %v806_v13  ;;  %v8297_v15 = vld [vmem:[%s9733_s2] ss:$0 sm:$0xff] }
 0x11f   : > { %v2909_v11 = vcombine.low %v2901_v38, %v2908_v63  ;;  %v1692_v17 = vrot.slane %v1678_v4, %v7936_v28  ;;  %v1693_v18 = vcombine.high %v1685_v54, %v1685_v54  ;;  %v1701_v16 = vrot.slane %v1685_v54, %v7936_v28 }
 0x120   : > { %v4081_v58 = vmax.f32 %v4079_v37, %v4080_v61  ;;  %v4053_v20 = vmax.f32 %v4051_v3, %v4052_v9  ;;  %v864_v8 = vmul.f32 %v8263_v21, %v8204_v62  ;;  %v8267_v22 = vadd.f32 %v868_v10, %v713_v5 }
 0x121   : > { %v4056_v2 = vsel %vm3964_vm2, %v2909_v11, -inf  ;;  %v1694_v14 = vcombine.high %v1692_v17, %v1692_v17  ;;  %v1708_v24 = vrot.slane %v1692_v17, %v7936_v28  ;;  %v1715_v56 = vrot.slane %v1693_v18, %v7936_v28 }
 0x122   : > { %v4047_v23 = vrot.slane %v4046_v6, 1  ;;  %v4057_v32 = vrot.slane %v4056_v2, 4  ;;  %v3028_v33 = vcombine.low %v1677_v48, %v1701_v16  ;;  %v1066_v34 = vadd.f32 %v1041_v26, %v886_v55 }
 0x123   : > { %v8273_v35 = vrot.slane %v6808_v0, %v7936_v28  ;;  %v8276_v60 = vrot.slane %v1694_v14, %v7936_v28  ;;  %v1724_v62 = vcombine.high %v1708_v24, %v1708_v24  ;;  %v6810_v36 = vcombine.high %v1701_v16, %v1715_v56 }
 0x124   : > { %v4082_v50 = vrot.slane %v4081_v58, 1  ;;  %v3042_v30 = vrot.slane %v3028_v33, %v7936_v28  ;;  %v3049_v37 = vrot.slane %v1715_v56, %v7936_v28  ;;  %v8287_v25 = vmul.f32 %v8283_v45, %v8202_v51 }
 0x125   : > { %v4054_v41 = vrot.slane %v4053_v20, 1  ;;  %v3067_v55 = vcombine.low %v1708_v24, %v8276_v60  ;;  %v889_v39 = vadd.f32 %v864_v8, %v709_v46  ;;  %v8292_v44 = vmul.f32 %v8263_v21, %v8222_v52  ;;  %v8306_v52 = vld [vmem:[%s9732_s1 + $0x2] ss:$0 sm:$0xff] }
 0x126   : > { %v4048_v59 = vmax.f32 %v4046_v6, %v4047_v23  ;;  %v4058_v27 = vmax.f32 %v4056_v2, %v4057_v32  ;;  %v3050_v42 = vcombine.low %v3035_v12, %v3042_v30  ;;  %v1098_v51 = vadd.f32 %v8297_v15, %v1066_v34  ;;  %v981_v34 = vpop.permute.xlu0 %980 }
 0x127   : > { %v3074_v43 = vrot.slane %v6810_v36, %v7936_v28  ;;  %v3081_v48 = vrot.slane %v3067_v55, %v7936_v28  ;;  %v3088_v46 = vrot.slane %v1724_v62, %v7936_v28  ;;  %v1044_v61 = vmul.f32 %v8306_v52, %v966_v31 }
 0x128   : > { %v3057_v53 = vrot.slane %v3050_v42, %v7936_v28  ;;  %v3064_v12 = vrot.slane %v3049_v37, %v7936_v28  ;;  %v1580_v49 = vcombine.high %v1098_v51, %v1098_v51  ;;  %v1587_v57 = vrot.slane %v1098_v51, %v7936_v28 }
 0x129   : > { %v8312_v13 = vmax.f32 %v4081_v58, %v4082_v50  ;;  %v8314_v29 = vmax.f32 %v4053_v20, %v4054_v41  ;;  %v3089_v63 = vcombine.low %v3074_v43, %v3081_v48  ;;  %v1069_v0 = vadd.f32 %v1044_v61, %v889_v39 }
 0x12a   : > { %v4059_v3 = vrot.slane %v4058_v27, 2  ;;  %v3065_v38 = vcombine.low %v3057_v53, %v3064_v12  ;;  %v1594_v4 = vrot.slane %v1580_v49, %v7936_v28  ;;  %v1595_v54 = vcombine.high %v1587_v57, %v1587_v57 }
 0x12b   : > { %v8319_v5 = vsel %vm4291_vm5, %v4048_v59, %v8234_v40  ;;  %v3096_v6 = vrot.slane %v3089_v63, %v7936_v28  ;;  %v3103_v9 = vrot.slane %v3088_v46, %v7936_v28  ;;  %v1603_v26 = vrot.slane %v1587_v57, %v7936_v28  ;;  %v671_v46 = vpop.permute.xlu1 %670 }
 0x12c   : > { %v4084_v10 = vsel %vm3964_vm2, %v3065_v38, -inf  ;;  %v1596_v11 = vcombine.high %v1594_v4, %v1594_v4  ;;  %v1610_v17 = vrot.slane %v1594_v4, %v7936_v28  ;;  %v1101_v18 = vadd.f32 %v8297_v15, %v1069_v0  ;;  %v8343_v38 = vpop.permute.xlu0 %640 }
 0x12d   : > { %v3104_v16 = vcombine.low %v3096_v6, %v3103_v9  ;;  %v4085_v58 = vrot.slane %v4084_v10, 4  ;;  %v1617_v20 = vrot.slane %v1595_v54, %v7936_v28  ;;  %v1625_v8 = vcombine.high %v1603_v26, %v1603_v26 }
 0x12e   : > { %v4060_v40 = vmax.f32 %v4058_v27, %v4059_v3  ;;  %v1624_v2 = vrot.slane %v1596_v11, %v7936_v28  ;;  %v1626_v14 = vcombine.high %v1610_v17, %v1610_v17  ;;  %v1726_v24 = vcombine.high %v8276_v60, %v8276_v60 }
 0x12f   : > { %v4086_v56 = vmax.f32 %v4084_v10, %v4085_v58  ;;  %v4091_v23 = vsel %vm3964_vm2, %v3104_v16, -inf  ;;  %v1627_v32 = vcombine.high %v1617_v20, %v1617_v20  ;;  %v2911_v33 = vcombine.low %v1603_v26, %v1617_v20 }
 0x130   : > { %v4092_v62 = vrot.slane %v4091_v23, 4  ;;  %v1628_v36 = vcombine.high %v1624_v2, %v1624_v2  ;;  %v2932_v50 = vrot.slane %v1625_v8, %v7936_v28  ;;  %v2950_v30 = vcombine.low %v1624_v2, %v1626_v14 }
 0x131   : > { %v4087_v37 = vrot.slane %v4086_v56, 2  ;;  %v2925_v31 = vrot.slane %v2911_v33, %v7936_v28  ;;  %v2949_v41 = vcombine.low %v1627_v32, %v1610_v17  ;;  %v1734_v55 = vrot.slane %v1101_v18, %v7936_v28 }
 0x132   : > { %v4093_v39 = vmax.f32 %v4091_v23, %v4092_v62  ;;  %v2964_v60 = vrot.slane %v2950_v30, %v7936_v28  ;;  %v1727_v59 = vcombine.high %v1101_v18, %v1101_v18  ;;  %v1047_v27 = vmul.f32 %v8306_v52, %v981_v34  ;;  %v8357_v30 = vpop.permute.xlu0 %795 }
 0x133   : > { %v4088_v42 = vmax.f32 %v4086_v56, %v4087_v37  ;;  %v2933_v51 = vcombine.low %v8273_v35, %v2925_v31  ;;  %v2957_v43 = vrot.slane %v2949_v41, %v7936_v28  ;;  %v2971_v48 = vrot.slane %v1628_v36, %v7936_v28  ;;  %v826_v56 = vpop.permute.xlu1 %825 }
 0x134   : > { %v4061_v61 = vrot.slane %v4060_v40, 1  ;;  %v4094_v53 = vrot.slane %v4093_v39, 2  ;;  %v1742_v12 = vcombine.high %v1734_v55, %v1734_v55  ;;  %v1750_v49 = vrot.slane %v1734_v55, %v7936_v28 }
 0x135   : > { %v4089_v57 = vrot.slane %v4088_v42, 1  ;;  %v2940_v63 = vrot.slane %v2933_v51, %v7936_v28  ;;  %v2947_v0 = vrot.slane %v2932_v50, %v7936_v28  ;;  %v2972_v3 = vcombine.low %v2957_v43, %v2964_v60 }
 0x136   : > { %v4095_v4 = vmax.f32 %v4093_v39, %v4094_v53  ;;  %v1741_v35 = vrot.slane %v1727_v59, %v7936_v28  ;;  %v1764_v54 = vrot.slane %v1742_v12, %v7936_v28  ;;  %v1772_v6 = vcombine.high %v1750_v49, %v1750_v49 }
 0x137   : > { %v4090_v9 = vmax.f32 %v4088_v42, %v4089_v57  ;;  %v2948_v26 = vcombine.low %v2940_v63, %v2947_v0  ;;  %v2979_v10 = vrot.slane %v2972_v3, %v7936_v28  ;;  %v2986_v11 = vrot.slane %v2971_v48, %v7936_v28  ;;  %v971_v3 = vpop.permute.xlu0 %970 }
 0x138   : > { %v4096_v17 = vrot.slane %v4095_v4, 1  ;;  %v1774_v18 = vcombine.high %v1764_v54, %v1764_v54  ;;  %v3105_v16 = vcombine.low %v1726_v24, %v1750_v49  ;;  %v3106_v58 = vcombine.low %v1764_v54, %v1772_v6 }
 0x139   : > { %v4308_v20 = vsel %vm4287_vm3, %v4090_v9, %v8312_v13  ;;  %v2987_v8 = vcombine.low %v2979_v10, %v2986_v11  ;;  %v4063_v2 = vsel %vm3964_vm2, %v2948_v26, -inf  ;;  %v1072_v14 = vadd.f32 %v1047_v27, %v8150_v47 }
 0x13a   : > { %v4097_v23 = vmax.f32 %v4095_v4, %v4096_v17  ;;  %v4064_v32 = vrot.slane %v4063_v2, 4  ;;  %v3113_v33 = vrot.slane %v3105_v16, %v7936_v28  ;;  %v3120_v34 = vrot.slane %v3106_v58, %v7936_v28 }
 0x13b   : > { %v4062_v62 = vmax.f32 %v4060_v40, %v4061_v61  ;;  %v4070_v36 = vsel %vm3964_vm2, %v2987_v8, -inf  ;;  %v1743_v24 = vcombine.high %v1741_v35, %v1741_v35  ;;  %v3127_v50 = vrot.slane %v1774_v18, %v7936_v28 }
 0x13c   : > { %v8360_v13 = vsel %vm4289_vm4, %v4097_v23, %v4308_v20  ;;  %v4065_v37 = vmax.f32 %v4063_v2, %v4064_v32  ;;  %v4071_v47 = vrot.slane %v4070_v36, 4  ;;  %v3128_v31 = vcombine.low %v3113_v33, %v3120_v34 }
 0x13d   : > { %v4304_v41 = vsel %vm4293_vm6, %v8314_v29, %v8319_v5  ;;  %v3142_v55 = vrot.slane %v3127_v50, %v7936_v28  ;;  %v1104_v40 = vadd.f32 %v8297_v15, %v1072_v14  ;;  %v717_v39 = vmul.f32 %v8283_v45, %v671_v46  ;;  %v986_v29 = vpop.permute.xlu1 %985  ;;  %v8389_v50 = vpop.permute.xlu0 %655 }
 0x13e   : > { %v4066_v60 = vrot.slane %v4065_v37, 2  ;;  %v4072_v59 = vmax.f32 %v4070_v36, %v4071_v47  ;;  %v3135_v27 = vrot.slane %v3128_v31, %v7936_v28  ;;  %v872_v42 = vmul.f32 %v8263_v21, %v826_v56 }
 0x13f   : > { %v4305_v51 = vsel %vm4295_vm7, %v4062_v62, %v4304_v41  ;;  %v1771_v43 = vrot.slane %v1743_v24, %v7936_v28  ;;  %v1874_v48 = vcombine.high %v1104_v40, %v1104_v40  ;;  %v1881_v61 = vrot.slane %v1104_v40, %v7936_v28 }
 0x140   : > { %v4067_v5 = vmax.f32 %v4065_v37, %v4066_v60  ;;  %v4073_v53 = vrot.slane %v4072_v59, 2  ;;  %v3143_v12 = vcombine.low %v3135_v27, %v3142_v55  ;;  %v8373_v49 = vadd.f32 %v872_v42, %v717_v39 }
 0x141   : > { %v1757_v46 = vrot.slane %v1741_v35, %v7936_v28  ;;  %v1888_v57 = vrot.slane %v1874_v48, %v7936_v28  ;;  %v1889_v63 = vcombine.high %v1881_v61, %v1881_v61  ;;  %v1897_v0 = vrot.slane %v1881_v61, %v7936_v28  ;;  %v811_v41 = vpop.permute.xlu1 %810 }
 0x142   : > { %v4068_v4 = vrot.slane %v4067_v5, 1  ;;  %v4074_v54 = vmax.f32 %v4072_v59, %v4073_v53  ;;  %v4098_v6 = vsel %vm3964_vm2, %v3143_v12, -inf  ;;  %v1048_v9 = vmul.f32 %v8306_v52, %v986_v29 }
 0x143   : > { %v4099_v26 = vrot.slane %v4098_v6, 4  ;;  %v1890_v10 = vcombine.high %v1888_v57, %v1888_v57  ;;  %v1904_v11 = vrot.slane %v1888_v57, %v7936_v28  ;;  %v1911_v17 = vrot.slane %v1889_v63, %v7936_v28  ;;  %v8410_v63 = vpop.permute.xlu0 %660 }
 0x144   : > { %v4069_v18 = vmax.f32 %v4067_v5, %v4068_v4  ;;  %v4075_v35 = vrot.slane %v4074_v54, 1  ;;  %v3144_v16 = vcombine.low %v1757_v46, %v1771_v43  ;;  %v1073_v58 = vadd.f32 %v1048_v9, %v8267_v22 }
 0x145   : > { %v6811_v20 = vcombine.high %v1757_v46, %v1771_v43  ;;  %v4100_v8 = vmax.f32 %v4098_v6, %v4099_v26  ;;  %v1918_v2 = vrot.slane %v1890_v10, %v7936_v28  ;;  %v3300_v14 = vcombine.low %v1897_v0, %v1911_v17  ;;  %v676_v6 = vpop.permute.xlu1 %675 }
 0x146   : > { %v4076_v56 = vmax.f32 %v4074_v54, %v4075_v35  ;;  %v4306_v23 = vsel %vm4297_vm8, %v4069_v18, %v4305_v51  ;;  %v1920_v32 = vcombine.high %v1904_v11, %v1904_v11  ;;  %v6813_v33 = vcombine.high %v1897_v0, %v1911_v17 }
 0x147   : > { %v890_v34 = vadd.f32 %v8292_v44, %v8287_v25  ;;  %v4101_v62 = vrot.slane %v4100_v8, 2  ;;  %v3308_v36 = vrot.slane %v3300_v14, %v7936_v28  ;;  %v1105_v24 = vadd.f32 %v8297_v15, %v1073_v58 }
 0x148   : > { %v4307_v22 = vsel %vm4299_vm9, %v4076_v56, %v4306_v23  ;;  %v8393_v37 = vrot.slane %v3144_v16, %v7936_v28  ;;  %v3315_v47 = vrot.slane %v6813_v33, %v7936_v28  ;;  %v3322_v31 = vrot.slane %v1904_v11, %v7936_v28 }
 0x149   : > { %4335 = vst [vmem:[#allocation3 + $0x10] sm:$0xff] %v4307_v22  ;;  %v8398_v25 = vrot.slane %v6811_v20, %v7936_v28  ;;  %v4102_v44 = vmax.f32 %v4100_v8, %v4101_v62  ;;  %v1923_v55 = vcombine.high %v1105_v24, %v1105_v24  ;;  %v1930_v40 = vrot.slane %v1105_v24, %v7936_v28  ;;  %v816_v24 = vpop.permute.xlu0 %815 }
 0x14a   : > { %4532 = vmatprep.mubr.f32.mxu0 %v4307_v22  ;;  %v3323_v39 = vcombine.low %v3308_v36, %v3315_v47  ;;  %v3339_v60 = vcombine.low %v1918_v2, %v1920_v32  ;;  %v866_v59 = vmul.f32 %v8263_v21, %v8357_v30  ;;  %v1045_v27 = vmul.f32 %v8306_v52, %v971_v3 }
 0x14b   : > { %v4103_v42 = vrot.slane %v4102_v44, 1  ;;  %v1937_v51 = vrot.slane %v1923_v55, %v7936_v28  ;;  %v1938_v43 = vcombine.high %v1930_v40, %v1930_v40  ;;  %v1946_v48 = vrot.slane %v1930_v40, %v7936_v28 }
 0x14c   : > { %v3330_v61 = vrot.slane %v3323_v39, %v7936_v28  ;;  %v3337_v29 = vrot.slane %v3322_v31, %v7936_v28  ;;  %v1922_v5 = vcombine.high %v1918_v2, %v1918_v2  ;;  %v1070_v53 = vadd.f32 %v1045_v27, %v890_v34  ;;  %v8436_v31 = vpop.permute.xlu1 %830 }
 0x14d   : > { %v4104_v12 = vmax.f32 %v4102_v44, %v4103_v42  ;;  %v1939_v46 = vcombine.high %v1937_v51, %v1937_v51  ;;  %v1953_v57 = vrot.slane %v1937_v51, %v7936_v28  ;;  %v1960_v30 = vrot.slane %v1938_v43, %v7936_v28 }
 0x14e   : > { %v3338_v0 = vcombine.low %v3330_v61, %v3337_v29  ;;  %v3340_v3 = vcombine.low %v1922_v5, %v1946_v48  ;;  %v3347_v4 = vrot.slane %v3339_v60, %v7936_v28  ;;  %v1102_v54 = vadd.f32 %v8297_v15, %v1070_v53 }
 0x14f   : > { %v8415_v9 = vrot.slane %v1939_v46, %v7936_v28  ;;  %v1969_v26 = vcombine.high %v1953_v57, %v1953_v57  ;;  %v3361_v10 = vrot.slane %v1960_v30, %v7936_v28  ;;  %v6814_v11 = vcombine.high %v1946_v48, %v1960_v30 }
 0x150   : > { %v4133_v17 = vsel %vm3964_vm2, %v3338_v0, -inf  ;;  %v3354_v18 = vrot.slane %v3340_v3, %v7936_v28  ;;  %v8422_v35 = vsel %vm4291_vm5, %v4104_v12, %v8360_v13  ;;  %v1776_v16 = vcombine.high %v1102_v54, %v1102_v54  ;;  %v4340_v58 = vld [vmem:[#allocation3 + $0xf] sm:$0xff] }
 0x151   : > { %v3167_v20 = vcombine.low %v8393_v37, %v8398_v25  ;;  %v4134_v8 = vrot.slane %v4133_v17, 4  ;;  %v711_v2 = vmul.f32 %v8283_v45, %v8343_v38  ;;  %v3379_v14 = vcombine.low %v1953_v57, %v8415_v9  ;;  %4533 = vmatmul.mubr.f32.gmra.mrb[2].mxu0 %v4340_v58  ;;  %v976_v57 = vpop.permute.xlu0 %975 }
 0x152   : > { %v3362_v56 = vcombine.low %v3347_v4, %v3354_v18  ;;  %v3400_v23 = vrot.slane %v1969_v26, %v7936_v28  ;;  %v1783_v32 = vrot.slane %v1102_v54, %v7936_v28  ;;  %v1790_v13 = vrot.slane %v1776_v16, %v7936_v28  ;;  %v1006_v54 = vpop.permute.xlu1 %1005 }
 0x153   : > { %v4135_v33 = vmax.f32 %v4133_v17, %v4134_v8  ;;  %v891_v34 = vadd.f32 %v866_v59, %v711_v2  ;;  %v3386_v62 = vrot.slane %v6814_v11, %v7936_v28  ;;  %v3393_v36 = vrot.slane %v3379_v14, %v7936_v28 }
 0x154   : > { %v3369_v22 = vrot.slane %v3362_v56, %v7936_v28  ;;  %v3376_v38 = vrot.slane %v3361_v10, %v7936_v28  ;;  %v1791_v37 = vcombine.high %v1783_v32, %v1783_v32  ;;  %v1792_v47 = vcombine.high %v1790_v13, %v1790_v13 }
 0x155   : > { %v4136_v25 = vrot.slane %v4135_v33, 2  ;;  %v3401_v44 = vcombine.low %v3386_v62, %v3393_v36  ;;  %v1799_v55 = vrot.slane %v1783_v32, %v7936_v28  ;;  %v869_v40 = vmul.f32 %v8263_v21, %v811_v41 }
 0x156   : > { %v3377_v39 = vcombine.low %v3369_v22, %v3376_v38  ;;  %v3415_v60 = vrot.slane %v3400_v23, %v7936_v28  ;;  %v1813_v59 = vrot.slane %v1791_v37, %v7936_v28  ;;  %v714_v27 = vmul.f32 %v8283_v45, %v8389_v50  ;;  %v991_v38 = vpop.permute.xlu0 %990 }
 0x157   : > { %v3408_v42 = vrot.slane %v3401_v44, %v7936_v28  ;;  %v8446_v51 = vrot.slane %v1792_v47, %v7936_v28  ;;  %v1821_v43 = vcombine.high %v1799_v55, %v1799_v55  ;;  %v3166_v48 = vrot.slane %v1799_v55, %v7936_v28 }
 0x158   : > { %v4137_v61 = vmax.f32 %v4135_v33, %v4136_v25  ;;  %v4140_v29 = vsel %vm3964_vm2, %v3377_v39, -inf  ;;  %v8451_v41 = vrot.slane %v1790_v13, %v7936_v28  ;;  %v1823_v5 = vcombine.high %v1813_v59, %v1813_v59 }
 0x159   : > { %v3416_v53 = vcombine.low %v3408_v42, %v3415_v60  ;;  %v4141_v12 = vrot.slane %v4140_v29, 4  ;;  %v3174_v46 = vrot.slane %v3167_v20, %v7936_v28  ;;  %v3181_v50 = vrot.slane %v3166_v48, %v7936_v28 }
 0x15a   : > { %v3183_v30 = vcombine.low %v1813_v59, %v1821_v43  ;;  %v3184_v0 = vcombine.low %v1823_v5, %v8451_v41  ;;  %v8456_v3 = vadd.f32 %v869_v40, %v714_v27  ;;  %v8459_v4 = vmul.f32 %v8283_v45, %v676_v6 }
 0x15b   : > { %v4142_v26 = vmax.f32 %v4140_v29, %v4141_v12  ;;  %v4147_v10 = vsel %vm3964_vm2, %v3416_v53, -inf  ;;  %v3182_v11 = vcombine.low %v3174_v46, %v3181_v50  ;;  %v3205_v17 = vrot.slane %v8446_v51, %v7936_v28 }
 0x15c   : > { %v4138_v18 = vrot.slane %v4137_v61, 1  ;;  %v4148_v16 = vrot.slane %v4147_v10, 4  ;;  %v3191_v58 = vrot.slane %v3183_v30, %v7936_v28  ;;  %v3198_v20 = vrot.slane %v3184_v0, %v7936_v28 }
 0x15d   : > { %v4143_v8 = vrot.slane %v4142_v26, 2  ;;  %v4105_v2 = vsel %vm3964_vm2, %v3182_v11, -inf  ;;  %v1052_v6 = vmul.f32 %v8306_v52, %v1006_v54  ;;  %v1046_v14 = vmul.f32 %v8306_v52, %v976_v57 }
 0x15e   : > { %v4149_v56 = vmax.f32 %v4147_v10, %v4148_v16  ;;  %v3206_v23 = vcombine.low %v3191_v58, %v3198_v20  ;;  %v4106_v32 = vrot.slane %v4105_v2, 4  ;;  %v715_v13 = vmul.f32 %v8283_v45, %v8410_v63 }
 0x15f   : > { %v4144_v33 = vmax.f32 %v4142_v26, %v4143_v8  ;;  %v870_v62 = vmul.f32 %v8263_v21, %v816_v24  ;;  %v1077_v36 = vadd.f32 %v1052_v6, %v8373_v49  ;;  %v1071_v22 = vadd.f32 %v1046_v14, %v891_v34  ;;  %v8488_v26 = vpop.permute.xlu1 %665 }
 0x160   : > { %v4150_v37 = vrot.slane %v4149_v56, 2  ;;  %v3213_v47 = vrot.slane %v3206_v23, %v7936_v28  ;;  %v3220_v25 = vrot.slane %v3205_v17, %v7936_v28  ;;  %v4107_v44 = vmax.f32 %v4105_v2, %v4106_v32 }
 0x161   : > { %v4139_v55 = vmax.f32 %v4137_v61, %v4138_v18  ;;  %v4145_v40 = vrot.slane %v4144_v33, 1  ;;  %v1109_v39 = vadd.f32 %v8297_v15, %v1077_v36  ;;  %v1103_v60 = vadd.f32 %v8297_v15, %v1071_v22 }
 0x162   : > { %v4151_v63 = vmax.f32 %v4149_v56, %v4150_v37  ;;  %v3221_v59 = vcombine.low %v3213_v47, %v3220_v25  ;;  %v4108_v27 = vrot.slane %v4107_v44, 2  ;;  %v1049_v24 = vmul.f32 %v8306_v52, %v991_v38 }
 0x163   : > { %v4146_v49 = vmax.f32 %v4144_v33, %v4145_v40  ;;  %v2119_v34 = vcombine.high %v1109_v39, %v1109_v39  ;;  %v2126_v42 = vrot.slane %v1109_v39, %v7936_v28  ;;  %v1825_v43 = vcombine.high %v1103_v60, %v1103_v60  ;;  %v996_v25 = vpop.permute.xlu1 %995 }
 0x164   : > { %v4152_v48 = vrot.slane %v4151_v63, 1  ;;  %v4109_v29 = vmax.f32 %v4107_v44, %v4108_v27  ;;  %v4112_v5 = vsel %vm3964_vm2, %v3221_v59, -inf  ;;  %v1832_v61 = vrot.slane %v1103_v60, %v7936_v28 }
 0x165   : > { %v4315_v53 = vsel %vm4287_vm3, %v4146_v49, %v4139_v55  ;;  %v4113_v12 = vrot.slane %v4112_v5, 4  ;;  %v8483_v46 = vrot.slane %v2119_v34, %v7936_v28  ;;  %v2134_v50 = vcombine.high %v2126_v42, %v2126_v42 }
 0x166   : > { %v4153_v57 = vmax.f32 %v4151_v63, %v4152_v48  ;;  %v6812_v30 = vcombine.high %v8451_v41, %v8446_v51  ;;  %v4110_v0 = vrot.slane %v4109_v29, 1  ;;  %v1839_v54 = vrot.slane %v1825_v43, %v7936_v28 }
 0x167   : > { %v4114_v10 = vmax.f32 %v4112_v5, %v4113_v12  ;;  %v2142_v11 = vrot.slane %v2126_v42, %v7936_v28  ;;  %v8493_v17 = vrot.slane %v8483_v46, %v7936_v28  ;;  %v2156_v18 = vrot.slane %v2134_v50, %v7936_v28 }
 0x168   : > { %v8497_v16 = vsel %vm4289_vm4, %v4153_v57, %v4315_v53  ;;  %v4111_v58 = vmax.f32 %v4109_v29, %v4110_v0  ;;  %v1840_v20 = vcombine.high %v1832_v61, %v1832_v61  ;;  %v1841_v51 = vcombine.high %v1839_v54, %v1839_v54 }
 0x169   : > { %v4115_v41 = vrot.slane %v4114_v10, 2  ;;  %v8501_v8 = vmul.f32 %v8263_v21, %v8436_v31  ;;  %v3612_v2 = vcombine.low %v2142_v11, %v2156_v18  ;;  %v1074_v6 = vadd.f32 %v1049_v24, %v8456_v3 }
 0x16a   : > { %v3230_v14 = vrot.slane %v6812_v30, %v7936_v28  ;;  %v4311_v56 = vsel %vm4293_vm6, %v4111_v58, %v8422_v35  ;;  %v6817_v23 = vcombine.high %v2142_v11, %v2156_v18  ;;  %v1848_v32 = vrot.slane %v1832_v61, %v7936_v28 }
 0x16b   : > { %v4116_v33 = vmax.f32 %v4114_v10, %v4115_v41  ;;  %v895_v36 = vadd.f32 %v870_v62, %v715_v13  ;;  %v3620_v22 = vrot.slane %v3612_v2, %v7936_v28  ;;  %v1855_v38 = vrot.slane %v1839_v54, %v7936_v28 }
 0x16c   : > { %v3627_v31 = vrot.slane %v6817_v23, %v7936_v28  ;;  %v3634_v37 = vrot.slane %v8493_v17, %v7936_v28  ;;  %v1862_v3 = vrot.slane %v1840_v20, %v7936_v28  ;;  %v1869_v47 = vrot.slane %v1841_v51, %v7936_v28 }
 0x16d   : > { %v4117_v35 = vrot.slane %v4116_v33, 1  ;;  %v1870_v44 = vcombine.high %v1848_v32, %v1848_v32  ;;  %v1871_v55 = vcombine.high %v1855_v38, %v1855_v38  ;;  %v1106_v40 = vadd.f32 %v8297_v15, %v1074_v6 }
 0x16e   : > { %v3635_v13 = vcombine.low %v3620_v22, %v3627_v31  ;;  %v1872_v62 = vcombine.high %v1862_v3, %v1862_v3  ;;  %v1873_v39 = vcombine.high %v1869_v47, %v1869_v47  ;;  %v3223_v60 = vcombine.low %v1848_v32, %v1862_v3 }
 0x16f   : > { %v4118_v63 = vmax.f32 %v4116_v33, %v4117_v35  ;;  %v3262_v59 = vcombine.low %v1869_v47, %v1871_v55  ;;  %v1972_v27 = vcombine.high %v1106_v40, %v1106_v40  ;;  %v1050_v24 = vmul.f32 %v8306_v52, %v996_v25 }
 0x170   : > { %v3642_v49 = vrot.slane %v3635_v13, %v7936_v28  ;;  %v3237_v34 = vrot.slane %v3223_v60, %v7936_v28  ;;  %v3244_v42 = vrot.slane %v1870_v44, %v7936_v28  ;;  %v3261_v43 = vcombine.low %v1872_v62, %v1855_v38  ;;  %v8542_v38 = vpop.permute.xlu0 %820 }
 0x171   : > { %v8521_v48 = vsel %vm4295_vm7, %v4118_v63, %v4311_v56  ;;  %v3276_v29 = vrot.slane %v3262_v59, %v7936_v28  ;;  %v3283_v5 = vrot.slane %v1873_v39, %v7936_v28  ;;  %v1979_v61 = vrot.slane %v1106_v40, %v7936_v28 }
 0x172   : > { %v3649_v53 = vrot.slane %v3634_v37, %v7936_v28  ;;  %v3245_v12 = vcombine.low %v3230_v14, %v3237_v34  ;;  %v3269_v50 = vrot.slane %v3261_v43, %v7936_v28  ;;  %v1971_v57 = vcombine.high %v8415_v9, %v8415_v9 }
 0x173   : > { %v1986_v30 = vrot.slane %v1972_v27, %v7936_v28  ;;  %v1987_v0 = vcombine.high %v1979_v61, %v1979_v61  ;;  %v1995_v54 = vrot.slane %v1979_v61, %v7936_v28  ;;  %v1075_v10 = vadd.f32 %v1050_v24, %v895_v36  ;;  %v8553_v27 = vpop.permute.xlu1 %680 }
 0x174   : > { %v3650_v11 = vcombine.low %v3642_v49, %v3649_v53  ;;  %v3252_v18 = vrot.slane %v3245_v12, %v7936_v28  ;;  %v3259_v58 = vrot.slane %v3244_v42, %v7936_v28  ;;  %v3284_v20 = vcombine.low %v3269_v50, %v3276_v29  ;;  %v1011_v53 = vpop.permute.xlu0 %1010 }
 0x175   : > { %v2135_v51 = vcombine.high %v8483_v46, %v8483_v46  ;;  %v3298_v41 = vrot.slane %v3283_v5, %v7936_v28  ;;  %v1988_v2 = vcombine.high %v1986_v30, %v1986_v30  ;;  %v2009_v9 = vrot.slane %v1987_v0, %v7936_v28 }
 0x176   : > { %v3260_v6 = vcombine.low %v3252_v18, %v3259_v58  ;;  %v3291_v14 = vrot.slane %v3284_v20, %v7936_v28  ;;  %v2017_v56 = vcombine.high %v1995_v54, %v1995_v54  ;;  %v3417_v23 = vcombine.low %v1971_v57, %v1995_v54 }
 0x177   : > { %v2002_v32 = vrot.slane %v1986_v30, %v7936_v28  ;;  %v2016_v33 = vrot.slane %v1988_v2, %v7936_v28  ;;  %v2019_v36 = vcombine.high %v2009_v9, %v2009_v9  ;;  %v1107_v22 = vadd.f32 %v8297_v15, %v1075_v10 }
 0x178   : > { %v4189_v46 = vsel %vm3964_vm2, %v3650_v11, -inf  ;;  %v3299_v31 = vcombine.low %v3291_v14, %v3298_v41  ;;  %v4119_v37 = vsel %vm3964_vm2, %v3260_v6, -inf  ;;  %v3418_v3 = vcombine.low %v2009_v9, %v2017_v56  ;;  %v686_v14 = vpop.permute.xlu1 %685 }
 0x179   : > { %v4120_v47 = vrot.slane %v4119_v37, 4  ;;  %v3425_v25 = vrot.slane %v3417_v23, %v7936_v28  ;;  %v3439_v35 = vrot.slane %v2019_v36, %v7936_v28  ;;  %v3456_v44 = vcombine.low %v2002_v32, %v2016_v33 }
 0x17a   : > { %v4126_v55 = vsel %vm3964_vm2, %v3299_v31, -inf  ;;  %v3432_v40 = vrot.slane %v3418_v3, %v7936_v28  ;;  %v6815_v13 = vcombine.high %v2002_v32, %v2016_v33  ;;  %v2021_v62 = vcombine.high %v1107_v22, %v1107_v22 }
 0x17b   : > { %v8551_v39 = vrot.slane %v2135_v51, %v7936_v28  ;;  %v4190_v60 = vrot.slane %v4189_v46, 4  ;;  %v4121_v63 = vmax.f32 %v4119_v37, %v4120_v47  ;;  %v4127_v59 = vrot.slane %v4126_v55, 4  ;;  %v836_v37 = vpop.permute.xlu0 %835 }
 0x17c   : > { %v3440_v24 = vcombine.low %v3425_v25, %v3432_v40  ;;  %v3464_v49 = vrot.slane %v3456_v44, %v7936_v28  ;;  %v3471_v34 = vrot.slane %v6815_v13, %v7936_v28  ;;  %v2028_v42 = vrot.slane %v1107_v22, %v7936_v28 }
 0x17d   : > { %v4122_v43 = vrot.slane %v4121_v63, 2  ;;  %v4128_v29 = vmax.f32 %v4126_v55, %v4127_v59  ;;  %v3454_v5 = vrot.slane %v3439_v35, %v7936_v28  ;;  %v2035_v61 = vrot.slane %v2021_v62, %v7936_v28 }
 0x17e   : > { %v3447_v12 = vrot.slane %v3440_v24, %v7936_v28  ;;  %v3479_v50 = vcombine.low %v3464_v49, %v3471_v34  ;;  %v2036_v57 = vcombine.high %v2028_v42, %v2028_v42  ;;  %v2044_v30 = vrot.slane %v2028_v42, %v7936_v28  ;;  %v1001_v34 = vpop.permute.xlu1 %1000 }
 0x17f   : > { %v4191_v0 = vmax.f32 %v4189_v46, %v4190_v60  ;;  %v4123_v54 = vmax.f32 %v4121_v63, %v4122_v43  ;;  %v4129_v10 = vrot.slane %v4128_v29, 2  ;;  %v2037_v11 = vcombine.high %v2035_v61, %v2035_v61 }
 0x180   : > { %v3455_v18 = vcombine.low %v3447_v12, %v3454_v5  ;;  %v2051_v58 = vrot.slane %v2035_v61, %v7936_v28  ;;  %v2058_v20 = vrot.slane %v2036_v57, %v7936_v28  ;;  %v2066_v51 = vcombine.high %v2044_v30, %v2044_v30 }
 0x181   : > { %v4124_v41 = vrot.slane %v4123_v54, 1  ;;  %v4130_v2 = vmax.f32 %v4128_v29, %v4129_v10  ;;  %v2065_v9 = vrot.slane %v2037_v11, %v7936_v28  ;;  %v3478_v6 = vrot.slane %v2044_v30, %v7936_v28 }
 0x182   : > { %v4154_v56 = vsel %vm3964_vm2, %v3455_v18, -inf  ;;  %v2068_v23 = vcombine.high %v2058_v20, %v2058_v20  ;;  %v3486_v32 = vrot.slane %v3479_v50, %v7936_v28  ;;  %v3495_v33 = vcombine.low %v2058_v20, %v2066_v51 }
 0x183   : > { %v4125_v36 = vmax.f32 %v4123_v54, %v4124_v41  ;;  %v4131_v22 = vrot.slane %v4130_v2, 1  ;;  %v4155_v46 = vrot.slane %v4154_v56, 4  ;;  %v3493_v31 = vrot.slane %v3478_v6, %v7936_v28 }
 0x184   : > { %v2165_v3 = vcombine.high %v8493_v17, %v8493_v17  ;;  %v4192_v47 = vrot.slane %v4191_v0, 2  ;;  %v3496_v25 = vcombine.low %v2068_v23, %v2051_v58  ;;  %v3517_v35 = vrot.slane %v2065_v9, %v7936_v28 }
 0x185   : > { %v4132_v44 = vmax.f32 %v4130_v2, %v4131_v22  ;;  %v4313_v55 = vsel %vm4297_vm8, %v4125_v36, %v8521_v48  ;;  %v4156_v40 = vmax.f32 %v4154_v56, %v4155_v46  ;;  %v3494_v13 = vcombine.low %v3486_v32, %v3493_v31 }
 0x186   : > { %v898_v62 = vadd.f32 %v8501_v8, %v8459_v4  ;;  %v3503_v60 = vrot.slane %v3495_v33, %v7936_v28  ;;  %v3510_v63 = vrot.slane %v3496_v25, %v7936_v28  ;;  %v871_v17 = vmul.f32 %v8263_v21, %v8542_v38 }
 0x187   : > { %v4314_v59 = vsel %vm4299_vm9, %v4132_v44, %v4313_v55  ;;  %v716_v24 = vmul.f32 %v8283_v45, %v8488_v26  ;;  %v4157_v49 = vrot.slane %v4156_v40, 2  ;;  %v4161_v48 = vsel %vm3964_vm2, %v3494_v13, -inf  ;;  %v841_v26 = vpop.permute.xlu0 %840 }
 0x188   : > { %v8584_v42 = vmax.f32 %v4191_v0, %v4192_v47  ;;  %4336 = vst [vmem:[#allocation3 + $0x18] sm:$0xff] %v4314_v59  ;;  %v3518_v4 = vcombine.low %v3503_v60, %v3510_v63  ;;  %v6816_v8 = vcombine.high %v2051_v58, %v2065_v9  ;;  %v4162_v43 = vrot.slane %v4161_v48, 4  ;;  %4538 = vmatprep.mubr.f32.mxu0 %v4314_v59  ;;  %v691_v60 = vpop.permute.xlu1 %690 }
 0x189   : > { %v8587_v29 = vcombine.low %v8551_v39, %v2165_v3  ;;  %v4158_v38 = vmax.f32 %v4156_v40, %v4157_v49  ;;  %v3532_v5 = vrot.slane %v3517_v35, %v7936_v28  ;;  %v1053_v61 = vmul.f32 %v8306_v52, %v1011_v53 }
 0x18a   : > { %v3525_v12 = vrot.slane %v3518_v4, %v7936_v28  ;;  %v4163_v50 = vmax.f32 %v4161_v48, %v4162_v43  ;;  %v896_v57 = vadd.f32 %v871_v17, %v716_v24  ;;  %v1051_v30 = vmul.f32 %v8306_v52, %v1001_v34 }
 0x18b   : > { %v4159_v0 = vrot.slane %v4158_v38, 1  ;;  %v1078_v54 = vadd.f32 %v1053_v61, %v898_v62  ;;  %v4194_v10 = vrot.slane %v8584_v42, 1  ;;  %v8595_v18 = vrot.slane %v6816_v8, %v7936_v28  ;;  %v1016_v36 = vpop.permute.xlu0 %1015 }
 0x18c   : > { %v3533_v11 = vcombine.low %v3525_v12, %v3532_v5  ;;  %v1076_v58 = vadd.f32 %v1051_v30, %v896_v57  ;;  %v719_v53 = vmul.f32 %v8283_v45, %v8553_v27  ;;  %v2167_v51 = vcombine.high %v8551_v39, %v8551_v39 }
 0x18d   : > { %v4160_v20 = vmax.f32 %v4158_v38, %v4159_v0  ;;  %v1110_v41 = vadd.f32 %v8297_v15, %v1078_v54  ;;  %v4164_v2 = vrot.slane %v4163_v50, 2  ;;  %v3659_v6 = vrot.slane %v8587_v29, %v7936_v28 }
 0x18e   : > { %v4168_v9 = vsel %vm3964_vm2, %v3533_v11, -inf  ;;  %v1108_v56 = vadd.f32 %v8297_v15, %v1076_v58  ;;  %v720_v22 = vmul.f32 %v8283_v45, %v686_v14  ;;  %v874_v46 = vmul.f32 %v8263_v21, %v836_v37 }
 0x18f   : > { %v4169_v23 = vrot.slane %v4168_v9, 4  ;;  %v8608_v32 = vsel %vm4291_vm5, %v4160_v20, %v8497_v16  ;;  %v2168_v33 = vcombine.high %v1110_v41, %v1110_v41  ;;  %v2175_v27 = vrot.slane %v1110_v41, %v7936_v28  ;;  %v4341_v39 = vld [vmem:[#allocation3 + $0x17] sm:$0xff]  ;;  %v1021_v20 = vpop.permute.xlu1 %1020 }
 0x190   : > { %v2070_v31 = vcombine.high %v1108_v56, %v1108_v56  ;;  %v2077_v3 = vrot.slane %v1108_v56, %v7936_v28  ;;  %4539 = vmatmul.mubr.f32.gmra.mrb[4].mxu0 %v4341_v39  ;;  %v875_v55 = vmul.f32 %v8263_v21, %v841_v26  ;;  %v1054_v40 = vmul.f32 %v8306_v52, %v1016_v36 }
 0x191   : > { %v4170_v47 = vmax.f32 %v4168_v9, %v4169_v23  ;;  %v2182_v15 = vrot.slane %v2168_v33, %v7936_v28  ;;  %v2183_v25 = vcombine.high %v2175_v27, %v2175_v27  ;;  %v2191_v16 = vrot.slane %v2175_v27, %v7936_v28  ;;  %v846_v23 = vpop.permute.xlu0 %845 }
 0x192   : > { %v2084_v35 = vrot.slane %v2070_v31, %v7936_v28  ;;  %v2085_v44 = vcombine.high %v2077_v3, %v2077_v3  ;;  %v4165_v14 = vmax.f32 %v4163_v50, %v4164_v2  ;;  %v2093_v62 = vrot.slane %v2077_v3, %v7936_v28 }
 0x193   : > { %v2184_v13 = vcombine.high %v2182_v15, %v2182_v15  ;;  %v2205_v37 = vrot.slane %v2183_v25, %v7936_v28  ;;  %v4171_v63 = vrot.slane %v4170_v47, 2  ;;  %v3652_v17 = vcombine.low %v2167_v51, %v2191_v16 }
 0x194   : > { %v2086_v59 = vcombine.high %v2084_v35, %v2084_v35  ;;  %v2100_v24 = vrot.slane %v2084_v35, %v7936_v28  ;;  %v2198_v49 = vrot.slane %v2182_v15, %v7936_v28  ;;  %v899_v34 = vadd.f32 %v874_v46, %v719_v53 }
 0x195   : > { %v8624_v48 = vrot.slane %v2184_v13, %v7936_v28  ;;  %v3673_v21 = vrot.slane %v2205_v37, %v7936_v28  ;;  %v3666_v4 = vrot.slane %v3652_v17, %v7936_v28  ;;  %v6818_v8 = vcombine.high %v2191_v16, %v2205_v37  ;;  %v8649_v16 = vld [vmem:[%s9733_s2] ss:$0 sm:$0xff] }
 0x196   : > { %v2107_v43 = vrot.slane %v2085_v44, %v7936_v28  ;;  %v2114_v29 = vrot.slane %v2086_v59, %v7936_v28  ;;  %v4166_v38 = vrot.slane %v4165_v14, 1  ;;  %v8632_v61 = vmul.f32 %v8283_v45, %v691_v60 }
 0x197   : > { %v3691_v5 = vcombine.low %v2198_v49, %v8624_v48  ;;  %v1079_v26 = vadd.f32 %v1054_v40, %v899_v34  ;;  %v4172_v12 = vmax.f32 %v4170_v47, %v4171_v63  ;;  %v3674_v50 = vcombine.low %v3659_v6, %v3666_v4 }
 0x198   : > { %v2115_v57 = vcombine.high %v2093_v62, %v2093_v62  ;;  %v2116_v30 = vcombine.high %v2100_v24, %v2100_v24  ;;  %v2214_v0 = vcombine.high %v2198_v49, %v2198_v49  ;;  %v3698_v54 = vrot.slane %v6818_v8, %v7936_v28 }
 0x199   : > { %v3705_v11 = vrot.slane %v3691_v5, %v7936_v28  ;;  %v2117_v58 = vcombine.high %v2107_v43, %v2107_v43  ;;  %v3681_v53 = vrot.slane %v3674_v50, %v7936_v28  ;;  %v3688_v51 = vrot.slane %v3673_v21, %v7936_v28 }
 0x19a   : > { %v2118_v41 = vcombine.high %v2114_v29, %v2114_v29  ;;  %v3535_v2 = vcombine.low %v2093_v62, %v2107_v43  ;;  %v3556_v9 = vrot.slane %v2115_v57, %v7936_v28  ;;  %v3574_v6 = vcombine.low %v2114_v29, %v2116_v30 }
 0x19b   : > { %v3713_v45 = vcombine.low %v3698_v54, %v3705_v11  ;;  %v3573_v56 = vcombine.low %v2117_v58, %v2100_v24  ;;  %v3689_v33 = vcombine.low %v3681_v53, %v3688_v51  ;;  %v900_v36 = vadd.f32 %v875_v55, %v720_v22 }
 0x19c   : > { %v3549_v27 = vrot.slane %v3535_v2, %v7936_v28  ;;  %v1055_v39 = vmul.f32 %v8306_v52, %v1021_v20  ;;  %v4167_v46 = vmax.f32 %v4165_v14, %v4166_v38  ;;  %v3588_v3 = vrot.slane %v3574_v6, %v7936_v28  ;;  %v7462_v52 = vld [vmem:[%s9732_s1 + $0x1] ss:$0 sm:$0xff] }
 0x19d   : > { %v3581_v31 = vrot.slane %v3573_v56, %v7936_v28  ;;  %v3595_v47 = vrot.slane %v2118_v41, %v7936_v28  ;;  %v3712_v15 = vrot.slane %v2214_v0, %v7936_v28  ;;  %v1111_v22 = vadd.f32 %v8649_v16, %v1079_v26 }
 0x19e   : > { %v3557_v25 = vcombine.low %v8595_v18, %v3549_v27  ;;  %v876_v35 = vmul.f32 %v7462_v52, %v846_v23  ;;  %v4173_v44 = vrot.slane %v4172_v12, 1  ;;  %v3720_v55 = vrot.slane %v3713_v45, %v7936_v28 }
 0x19f   : > { %v3571_v40 = vrot.slane %v3556_v9, %v7936_v28  ;;  %v3596_v14 = vcombine.low %v3581_v31, %v3588_v3  ;;  %v4196_v18 = vsel %vm3964_vm2, %v3689_v33, -inf  ;;  %v2217_v37 = vcombine.high %v1111_v22, %v1111_v22 }
 0x1a0   : > { %v3564_v13 = vrot.slane %v3557_v25, %v7936_v28  ;;  %v2224_v62 = vrot.slane %v1111_v22, %v7936_v28  ;;  %v4318_v60 = vsel %vm4293_vm6, %v4167_v46, %v8608_v32  ;;  %v3610_v17 = vrot.slane %v3595_v47, %v7936_v28  ;;  %v1026_v25 = vpop.permute.xlu0 %1025 }
 0x1a1   : > { %v3603_v63 = vrot.slane %v3596_v14, %v7936_v28  ;;  %v1080_v59 = vadd.f32 %v1055_v39, %v900_v36  ;;  %v3727_v24 = vrot.slane %v3712_v15, %v7936_v28  ;;  %v2231_v21 = vrot.slane %v2217_v37, %v7936_v28 }
 0x1a2   : > { %v3572_v49 = vcombine.low %v3564_v13, %v3571_v40  ;;  %v2232_v34 = vcombine.high %v2224_v62, %v2224_v62  ;;  %v4174_v4 = vmax.f32 %v4172_v12, %v4173_v44  ;;  %v4197_v8 = vrot.slane %v4196_v18, 4 }
 0x1a3   : > { %v3611_v43 = vcombine.low %v3603_v63, %v3610_v17  ;;  %v2240_v29 = vrot.slane %v2224_v62, %v7936_v28  ;;  %v3728_v38 = vcombine.low %v3720_v55, %v3727_v24  ;;  %v2216_v32 = vcombine.high %v8624_v48, %v8624_v48 }
 0x1a4   : > { %v4175_v5 = vsel %vm3964_vm2, %v3572_v49, -inf  ;;  %v2233_v26 = vcombine.high %v2231_v21, %v2231_v21  ;;  %v2254_v30 = vrot.slane %v2232_v34, %v7936_v28  ;;  %v1112_v0 = vadd.f32 %v8649_v16, %v1080_v59 }
 0x1a5   : > { %v4176_v50 = vrot.slane %v4175_v5, 4  ;;  %v4182_v57 = vsel %vm3964_vm2, %v3611_v43, -inf  ;;  %v2247_v12 = vrot.slane %v2231_v21, %v7936_v28  ;;  %v2262_v58 = vcombine.high %v2240_v29, %v2240_v29 }
 0x1a6   : > { %v4183_v54 = vrot.slane %v4182_v57, 4  ;;  %v2261_v11 = vrot.slane %v2233_v26, %v7936_v28  ;;  %v4198_v20 = vmax.f32 %v4196_v18, %v4197_v8  ;;  %v2264_v51 = vcombine.high %v2254_v30, %v2254_v30 }
 0x1a7   : > { %v4177_v53 = vmax.f32 %v4175_v5, %v4176_v50  ;;  %v3729_v41 = vcombine.low %v2216_v32, %v2240_v29  ;;  %v4203_v48 = vsel %vm3964_vm2, %v3728_v38, -inf  ;;  %v3730_v45 = vcombine.low %v2254_v30, %v2262_v58  ;;  %v4419_v5 = vld [vmem:[%s9734_s3 + $0x208] sm:$0xff]  ;;  %v4421_v32 = vld [vmem:[%s9734_s3 + $0x218] sm:$0xff]  ;;  %v4418_v58 = vld [vmem:[%s9734_s3 + $0x200] sm:$0xff] }
 0x1a8   : > { %v4184_v2 = vmax.f32 %v4182_v57, %v4183_v54  ;;  %v3768_v9 = vcombine.low %v2247_v12, %v2261_v11  ;;  %v4319_v56 = vsel %vm4295_vm7, %v4174_v4, %v4318_v60  ;;  %v3751_v23 = vrot.slane %v2264_v51, %v7936_v28 }
 0x1a9   : > { %v4178_v6 = vrot.slane %v4177_v53, 2  ;;  %v2266_v33 = vcombine.high %v1112_v0, %v1112_v0  ;;  %v3737_v36 = vrot.slane %v3729_v41, %v7936_v28  ;;  %v3744_v39 = vrot.slane %v3730_v45, %v7936_v28  ;;  %v4423_v45 = vld [vmem:[%s9734_s3 + $0x228] sm:$0xff] }
 0x1aa   : > { %v4185_v27 = vrot.slane %v4184_v2, 2  ;;  %v6819_v46 = vcombine.high %v2247_v12, %v2261_v11  ;;  %v4204_v31 = vrot.slane %v4203_v48, 4  ;;  %v3776_v47 = vrot.slane %v3768_v9, %v7936_v28  ;;  %v4425_v9 = vld [vmem:[%s9734_s3 + $0x238] sm:$0xff] }
 0x1ab   : > { %v4179_v3 = vmax.f32 %v4177_v53, %v4178_v6  ;;  %v901_v15 = vadd.f32 %v876_v35, %v8632_v61  ;;  %v4199_v22 = vrot.slane %v4198_v20, 2  ;;  %v3752_v44 = vcombine.low %v3737_v36, %v3744_v39  ;;  %v7463_v61 = vld [vmem:[%s9732_s1 + $0x2] ss:$0 sm:$0xff] }
 0x1ac   : > { %v4186_v52 = vmax.f32 %v4184_v2, %v4185_v27  ;;  %v3783_v55 = vrot.slane %v6819_v46, %v7936_v28  ;;  %v3766_v14 = vrot.slane %v3751_v23, %v7936_v28  ;;  %v2273_v18 = vrot.slane %v1112_v0, %v7936_v28  ;;  %v4420_v2 = vld [vmem:[%s9734_s3 + $0x210] sm:$0xff]  ;;  %v4422_v39 = vld [vmem:[%s9734_s3 + $0x220] sm:$0xff] }
 0x1ad   : > { %v4180_v40 = vrot.slane %v4179_v3, 1  ;;  %v2280_v13 = vrot.slane %v2266_v33, %v7936_v28  ;;  %v3759_v62 = vrot.slane %v3752_v44, %v7936_v28  ;;  %v1056_v35 = vmul.f32 %v7463_v61, %v1026_v25  ;;  %v4424_v46 = vld [vmem:[%s9734_s3 + $0x230] sm:$0xff] }
 0x1ae   : > { %v4187_v37 = vrot.slane %v4186_v52, 1  ;;  %v3791_v60 = vcombine.low %v3776_v47, %v3783_v55  ;;  %v2281_v17 = vcombine.high %v2273_v18, %v2273_v18  ;;  %v2289_v24 = vrot.slane %v2273_v18, %v7936_v28  ;;  %v4427_v55 = vld [vmem:[%s9734_s3 + $0x248] sm:$0xff] }
 0x1af   : > { %v4181_v63 = vmax.f32 %v4179_v3, %v4180_v40  ;;  %v2282_v59 = vcombine.high %v2280_v13, %v2280_v13  ;;  %v8691_v49 = vmax.f32 %v4203_v48, %v4204_v31  ;;  %v3767_v34 = vcombine.low %v3759_v62, %v3766_v14  ;;  %v4429_v40 = vld [vmem:[%s9734_s3 + $0x258] sm:$0xff] }
 0x1b0   : > { %v4188_v21 = vmax.f32 %v4186_v52, %v4187_v37  ;;  %v3798_v4 = vrot.slane %v3791_v60, %v7936_v28  ;;  %v2303_v43 = vrot.slane %v2281_v17, %v7936_v28  ;;  %v2311_v38 = vcombine.high %v2289_v24, %v2289_v24 }
 0x1b1   : > { %v4320_v8 = vsel %vm4297_vm8, %v4181_v63, %v4319_v56  ;;  %v8697_v29 = vrot.slane %v2282_v59, %v7936_v28  ;;  %v4210_v50 = vsel %vm3964_vm2, %v3767_v34, -inf  ;;  %v3790_v57 = vrot.slane %v2289_v24, %v7936_v28 }
 0x1b2   : > { %v4321_v26 = vsel %vm4299_vm9, %v4188_v21, %v4320_v8  ;;  %v1081_v30 = vadd.f32 %v1056_v35, %v901_v15  ;;  %v4211_v0 = vrot.slane %v4210_v50, 4  ;;  %v2296_v54 = vrot.slane %v2280_v13, %v7936_v28 }
 0x1b3   : > { %4337 = vst [vmem:[#allocation3 + $0x20] sm:$0xff] %v4321_v26  ;;  %v2313_v12 = vcombine.high %v2303_v43, %v2303_v43  ;;  %v3807_v11 = vcombine.low %v2303_v43, %v2311_v38  ;;  %4544 = vmatprep.mubr.f32.mxu0 %v4321_v26  ;;  %v8712_v53 = vmax.f32 %v4198_v20, %v4199_v22  ;;  %v4206_v20 = vrot.slane %v8691_v49, 2  ;;  %v4426_v26 = vld [vmem:[%s9734_s3 + $0x240] sm:$0xff] }
 0x1b4   : > { %v3805_v51 = vrot.slane %v3790_v57, %v7936_v28  ;;  %v1113_v41 = vadd.f32 %v8649_v16, %v1081_v30  ;;  %v7185_v48 = vpack.c.bf16 %v4421_v32, %v4419_v5  ;;  %v3829_v6 = vrot.slane %v8697_v29, %v7936_v28 }
 0x1b5   : > { %v3808_v56 = vcombine.low %v2313_v12, %v2296_v54  ;;  %v6820_v16 = vcombine.high %v2296_v54, %v8697_v29  ;;  %v4212_v23 = vmax.f32 %v4210_v50, %v4211_v0  ;;  %v3815_v31 = vrot.slane %v3807_v11, %v7936_v28  ;;  %v4431_v54 = vld [vmem:[%s9734_s3 + $0x268] sm:$0xff]  ;;  %v4433_v12 = vld [vmem:[%s9734_s3 + $0x278] sm:$0xff] }
 0x1b6   : > { %v3806_v33 = vcombine.low %v3798_v4, %v3805_v51  ;;  %v2315_v27 = vcombine.high %v1113_v41, %v1113_v41  ;;  %v2322_v36 = vrot.slane %v1113_v41, %v7936_v28  ;;  %7186 = vmatprep.subr.bf16.mxu0 %v7185_v48  ;;  %v7187_v47 = vpack.c.bf16 %v4420_v2, %v4418_v58 }
 0x1b7   : > { %v3822_v3 = vrot.slane %v3808_v56, %v7936_v28  ;;  %v7189_v15 = vpack.c.bf16 %v4425_v9, %v4423_v45  ;;  %v3844_v18 = vrot.slane %v3829_v6, %v7936_v28  ;;  %v7191_v37 = vpack.c.bf16 %v4424_v46, %v4422_v39  ;;  %v4432_v56 = vld [vmem:[%s9734_s3 + $0x270] sm:$0xff] }
 0x1b8   : > { %v4217_v25 = vsel %vm3964_vm2, %v3806_v33, -inf  ;;  %v2329_v22 = vrot.slane %v2315_v27, %v7936_v28  ;;  %v2330_v52 = vcombine.high %v2322_v36, %v2322_v36  ;;  %v2338_v44 = vrot.slane %v2322_v36, %v7936_v28  ;;  %7188 = vmatpush1.bf16.msra.mxu0 %v7187_v47  ;;  %v4435_v27 = vld [vmem:[%s9734_s3 + $0x288] sm:$0xff]  ;;  %v4437_v36 = vld [vmem:[%s9734_s3 + $0x298] sm:$0xff] }
 0x1b9   : > { %v3830_v14 = vcombine.low %v3815_v31, %v3822_v3  ;;  %v4218_v13 = vrot.slane %v4217_v25, 4  ;;  %7190 = vmatprep.subr.bf16.mxu0 %v7189_v15  ;;  %v4213_v17 = vrot.slane %v4212_v23, 2  ;;  %v7193_v21 = vpack.c.bf16 %v4429_v40, %v4427_v55 }
 0x1ba   : > { %v2331_v62 = vcombine.high %v2329_v22, %v2329_v22  ;;  %v2345_v60 = vrot.slane %v2329_v22, %v7936_v28  ;;  %v2352_v61 = vrot.slane %v2330_v52, %v7936_v28  ;;  %v2360_v35 = vcombine.high %v2338_v44, %v2338_v44  ;;  %v4342_v63 = vld [vmem:[#allocation3 + $0x1f] sm:$0xff] }
 0x1bb   : > { %v3837_v59 = vrot.slane %v3830_v14, %v7936_v28  ;;  %v4219_v24 = vmax.f32 %v4217_v25, %v4218_v13  ;;  %4545 = vmatmul.mubr.f32.gmra.mrb[6].mxu0 %v4342_v63  ;;  %v4207_v29 = vmax.f32 %v8691_v49, %v4206_v20  ;;  %v3854_v5 = vrot.slane %v6820_v16, %v7936_v28  ;;  %v4428_v49 = vld [vmem:[%s9734_s3 + $0x250] sm:$0xff]  ;;  %v4430_v20 = vld [vmem:[%s9734_s3 + $0x260] sm:$0xff] }
 0x1bc   : > { %v2359_v34 = vrot.slane %v2331_v62, %v7936_v28  ;;  %v2361_v4 = vcombine.high %v2345_v60, %v2345_v60  ;;  %v2362_v8 = vcombine.high %v2352_v61, %v2352_v61  ;;  %v3847_v43 = vcombine.low %v2338_v44, %v2352_v61  ;;  %7192 = vmatpush1.bf16.msra.mxu0 %v7191_v37  ;;  %v4434_v14 = vld [vmem:[%s9734_s3 + $0x280] sm:$0xff]  ;;  %v4439_v37 = vld [vmem:[%s9734_s3 + $0x2a8] sm:$0xff] }
 0x1bd   : > { %v3845_v38 = vcombine.low %v3837_v59, %v3844_v18  ;;  %v3868_v32 = vrot.slane %v2360_v35, %v7936_v28  ;;  %7194 = vmatprep.subr.bf16.mxu0 %v7193_v21  ;;  %v4201_v11 = vrot.slane %v8712_v53, 1  ;;  %v4214_v58 = vmax.f32 %v4212_v23, %v4213_v17  ;;  %v4436_v18 = vld [vmem:[%s9734_s3 + $0x290] sm:$0xff] }
 0x1be   : > { %v2363_v50 = vcombine.high %v2359_v34, %v2359_v34  ;;  %v3861_v57 = vrot.slane %v3847_v43, %v7936_v28  ;;  %v3885_v30 = vcombine.low %v2362_v8, %v2345_v60  ;;  %v3886_v0 = vcombine.low %v2359_v34, %v2361_v4  ;;  %v4438_v8 = vld [vmem:[%s9734_s3 + $0x2a0] sm:$0xff]  ;;  %v4440_v43 = vld [vmem:[%s9734_s3 + $0x2b0] sm:$0xff] }
 0x1bf   : > { %v4220_v51 = vrot.slane %v4219_v24, 2  ;;  %v4224_v41 = vsel %vm3964_vm2, %v3845_v38, -inf  ;;  %v4208_v6 = vrot.slane %v4207_v29, 1  ;;  %v7195_v23 = vpack.c.bf16 %v4428_v49, %v4426_v26  ;;  %v4443_v38 = vld [vmem:[%s9734_s3 + $0x2c8] sm:$0xff] }
 0x1c0   : > { %v4225_v48 = vrot.slane %v4224_v41, 4  ;;  %v3869_v2 = vcombine.low %v3854_v5, %v3861_v57  ;;  %v3893_v45 = vrot.slane %v3885_v30, %v7936_v28  ;;  %v3900_v9 = vrot.slane %v3886_v0, %v7936_v28  ;;  %v4445_v5 = vld [vmem:[%s9734_s3 + $0x2d8] sm:$0xff] }
 0x1c1   : > { %v3907_v16 = vrot.slane %v2363_v50, %v7936_v28  ;;  %v7197_v33 = vpack.c.bf16 %v4433_v12, %v4431_v54  ;;  %v3883_v31 = vrot.slane %v3868_v32, %v7936_v28  ;;  %v4215_v47 = vrot.slane %v4214_v58, 1  ;;  %7196 = vmatpush1.bf16.msra.mxu0 %v7195_v23  ;;  %v4442_v12 = vld [vmem:[%s9734_s3 + $0x2c0] sm:$0xff]  ;;  %v4448_v23 = vld [vmem:[%s9734_s3 + $0x2f0] sm:$0xff] }
 0x1c2   : > { %v4226_v39 = vmax.f32 %v4224_v41, %v4225_v48  ;;  %v3876_v46 = vrot.slane %v3869_v2, %v7936_v28  ;;  %v3908_v3 = vcombine.low %v3893_v45, %v3900_v9  ;;  %v4221_v15 = vmax.f32 %v4219_v24, %v4220_v51  ;;  %v4447_v41 = vld [vmem:[%s9734_s3 + $0x2e8] sm:$0xff]  ;;  %v4449_v48 = vld [vmem:[%s9734_s3 + $0x2f8] sm:$0xff] }
 0x1c3   : > { %v3922_v25 = vrot.slane %v3907_v16, %v7936_v28  ;;  %v7199_v22 = vpack.c.bf16 %v4432_v56, %v4430_v20  ;;  %7198 = vmatprep.subr.bf16.mxu0 %v7197_v33  ;;  %v7201_v40 = vpack.c.bf16 %v4437_v36, %v4435_v27  ;;  %v4202_v13 = vmax.f32 %v8712_v53, %v4201_v11  ;;  %v4444_v11 = vld [vmem:[%s9734_s3 + $0x2d0] sm:$0xff]  ;;  %v4446_v16 = vld [vmem:[%s9734_s3 + $0x2e0] sm:$0xff] }
 0x1c4   : > { %v4227_v52 = vrot.slane %v4226_v39, 2  ;;  %v3884_v44 = vcombine.low %v3876_v46, %v3883_v31  ;;  %v3915_v55 = vrot.slane %v3908_v3, %v7936_v28  ;;  %v4441_v28 = vld [vmem:[%s9734_s3 + $0x2b8] sm:$0xff]  ;;  %v4209_v62 = vmax.f32 %v4207_v29, %v4208_v6 }
 0x1c5   : > { %v4195_v63 = vmax.f32 %v8584_v42, %v4194_v10  ;;  %v4222_v17 = vrot.slane %v4221_v15, 1  ;;  %7200 = vmatpush1.bf16.msra.mxu0 %v7199_v22  ;;  %v7203_v53 = vpack.c.bf16 %v4436_v18, %v4434_v14  ;;  %v4216_v24 = vmax.f32 %v4214_v58, %v4215_v47  ;;  %v4349_v47 = vld [vmem:[#allocation3 + $0x9] sm:$0xff]  ;;  %v5375_v14 = vld [vmem:[%s9736_s5] sm:$0xff]  ;;  %v5376_v18 = vld [vmem:[%s9736_s5 + $0x8] sm:$0xff] }
 0x1c6   : > { %v4228_v60 = vmax.f32 %v4226_v39, %v4227_v52  ;;  %v3923_v61 = vcombine.low %v3915_v55, %v3922_v25  ;;  %v4231_v35 = vsel %vm3964_vm2, %v3884_v44, -inf  ;;  %7202 = vmatprep.subr.bf16.mxu0 %v7201_v40  ;;  %v7205_v4 = vpack.c.bf16 %v4441_v28, %v4439_v37  ;;  %v4351_v25 = vld [vmem:[#allocation3 + $0x19] sm:$0xff]  ;;  %v5393_v37 = vld [vmem:[%s9736_s5 + $0x90] sm:$0xff]  ;;  %v5394_v28 = vld [vmem:[%s9736_s5 + $0x98] sm:$0xff] }
 0x1c7   : > { %v4232_v59 = vrot.slane %v4231_v35, 4  ;;  %v4322_v42 = vsel %vm4287_vm3, %v4202_v13, %v4195_v63  ;;  %v4223_v26 = vmax.f32 %v4221_v15, %v4222_v17  ;;  %v7207_v30 = vpack.c.bf16 %v4440_v43, %v4438_v8  ;;  %v4350_v15 = vld [vmem:[#allocation3 + $0x11] sm:$0xff]  ;;  %v5392_v55 = vld [vmem:[%s9736_s5 + $0x88] sm:$0xff]  ;;  %v5381_v43 = vld [vmem:[%s9736_s5 + $0x30] sm:$0xff] }
 0x1c8   : > { %v4229_v21 = vrot.slane %v4228_v60, 1  ;;  %v4238_v34 = vsel %vm3964_vm2, %v3923_v61, -inf  ;;  %v4323_v32 = vsel %vm4289_vm4, %v4209_v62, %v4322_v42  ;;  %v7209_v54 = vpack.c.bf16 %v4445_v5, %v4443_v38  ;;  %v5391_v44 = vld [vmem:[%s9736_s5 + $0x80] sm:$0xff]  ;;  %v5378_v61 = vld [vmem:[%s9736_s5 + $0x18] sm:$0xff]  ;;  %v5396_v17 = vld [vmem:[%s9736_s5 + $0xa8] sm:$0xff] }
 0x1c9   : > { %v4233_v10 = vmax.f32 %v4231_v35, %v4232_v59  ;;  %v4239_v29 = vrot.slane %v4238_v34, 4  ;;  %7204 = vmatpush1.bf16.msra.mxu0 %v7203_v53  ;;  %v4324_v49 = vsel %vm4291_vm5, %v4216_v24, %v4323_v32  ;;  %v7211_v20 = vpack.c.bf16 %v4444_v11, %v4442_v12  ;;  %v5395_v63 = vld [vmem:[%s9736_s5 + $0xa0] sm:$0xff]  ;;  %v5380_v24 = vld [vmem:[%s9736_s5 + $0x28] sm:$0xff]  ;;  %v5382_v42 = vld [vmem:[%s9736_s5 + $0x38] sm:$0xff] }
 0x1ca   : > { %v4230_v0 = vmax.f32 %v4228_v60, %v4229_v21  ;;  %7206 = vmatprep.subr.bf16.mxu0 %v7205_v4  ;;  %v4325_v2 = vsel %vm4293_vm6, %v4223_v26, %v4324_v49  ;;  %v7213_v6 = vpack.c.bf16 %v4449_v48, %v4447_v41  ;;  %v7215_v46 = vpack.c.bf16 %v4448_v23, %v4446_v16  ;;  %v5377_v60 = vld [vmem:[%s9736_s5 + $0x10] sm:$0xff]  ;;  %v5379_v53 = vld [vmem:[%s9736_s5 + $0x20] sm:$0xff]  ;;  %v5398_v4 = vld [vmem:[%s9736_s5 + $0xb8] sm:$0xff] }
 0x1cb   : > { %v4234_v50 = vrot.slane %v4233_v10, 2  ;;  %v4240_v57 = vmax.f32 %v4238_v34, %v4239_v29  ;;  %v7217_v40 = vpack.c.bf16 %v5392_v55, %v5391_v44  ;;  %v7219_v13 = vpack.c.bf16 %v5376_v18, %v5375_v14  ;;  %v5397_v34 = vld [vmem:[%s9736_s5 + $0xb0] sm:$0xff]  ;;  %v5399_v29 = vld [vmem:[%s9736_s5 + $0xc0] sm:$0xff]  ;;  %v5400_v38 = vld [vmem:[%s9736_s5 + $0xc8] sm:$0xff] }
 0x1cc   : > { %v4326_v56 = vsel %vm4295_vm7, %v4230_v0, %v4325_v2  ;;  %v7221_v62 = vpack.c.bf16 %v5394_v28, %v5393_v37  ;;  %v7223_v35 = vpack.c.bf16 %v5378_v61, %v5377_v60  ;;  %v7225_v59 = vpack.c.bf16 %v5396_v17, %v5395_v63  ;;  %v5383_v32 = vld [vmem:[%s9736_s5 + $0x40] sm:$0xff]  ;;  %v5384_v26 = vld [vmem:[%s9736_s5 + $0x48] sm:$0xff]  ;;  %v5385_v49 = vld [vmem:[%s9736_s5 + $0x50] sm:$0xff] }
 0x1cd   : > { %v4235_v58 = vmax.f32 %v4233_v10, %v4234_v50  ;;  %v4241_v51 = vrot.slane %v4240_v57, 2  ;;  %7208 = vmatpush1.bf16.msra.mxu0 %v7207_v30  ;;  %7218 = vmatprep.subr.bf16.mxu1 %v7217_v40  ;;  %v7227_v21 = vpack.c.bf16 %v5380_v24, %v5379_v53  ;;  %v7229_v8 = vpack.c.bf16 %v5398_v4, %v5397_v34  ;;  %v5402_v30 = vld [vmem:[%s9736_s5 + $0xd8] sm:$0xff]  ;;  %v5403_v11 = vld [vmem:[%s9736_s5 + $0xe0] sm:$0xff]  ;;  %v5388_v41 = vld [vmem:[%s9736_s5 + $0x68] sm:$0xff] }
 0x1ce   : > { %7210 = vmatprep.subr.bf16.mxu0 %v7209_v54  ;;  %7220 = vmatpush3.bf16.msra.mxu1 %v7219_v13  ;;  %v7231_v10 = vpack.c.bf16 %v5382_v42, %v5381_v43  ;;  %v7233_v5 = vpack.c.bf16 %v5400_v38, %v5399_v29  ;;  %v7235_v50 = vpack.c.bf16 %v5384_v26, %v5383_v32  ;;  %v5386_v54 = vld [vmem:[%s9736_s5 + $0x58] sm:$0xff]  ;;  %v5405_v2 = vld [vmem:[%s9736_s5 + $0xf0] sm:$0xff]  ;;  %v5423_v16 = vld [vmem:[%s9736_s5 + $0x180] sm:$0xff] }
 0x1cf   : > { %v4236_v45 = vrot.slane %v4235_v58, 1  ;;  %v4242_v9 = vmax.f32 %v4240_v57, %v4241_v51  ;;  %7222 = vmatprep.subr.bf16.mxu1 %v7221_v62  ;;  %v5401_v57 = vld [vmem:[%s9736_s5 + $0xd0] sm:$0xff]  ;;  %v7239_v12 = vpack.c.bf16 %v5386_v54, %v5385_v49  ;;  %v7243_v48 = vpack.c.bf16 %v5388_v41, %v5387_v7  ;;  %v5424_v23 = vld [vmem:[%s9736_s5 + $0x188] sm:$0xff]  ;;  %v8970_v37 = vld [vmem:[#allocation4] sm:$0x80] }
 0x1d0   : > { %v7237_v0 = vpack.c.bf16 %v5402_v30, %v5401_v57  ;;  %v8968_v13 = vld [vmem:[#allocation4 + $0x8] sm:$0x80] }
 0x1d1   : > { %v4237_v33 = vmax.f32 %v4235_v58, %v4236_v45  ;;  %v4243_v27 = vrot.slane %v4242_v9, 1  ;;  %7212 = vmatpush1.bf16.msra.mxu0 %v7211_v20  ;;  %v5404_v58 = vld [vmem:[%s9736_s5 + $0xe8] sm:$0xff]  ;;  %v5406_v45 = vld [vmem:[%s9736_s5 + $0xf8] sm:$0xff]  ;;  %v5389_v20 = vld [vmem:[%s9736_s5 + $0x70] sm:$0xff]  ;;  %v5486_v17 = vrot.slane %v8968_v13, 7 }
 0x1d2   : > { %7214 = vmatprep.subr.bf16.mxu0 %v7213_v6  ;;  %7224 = vmatpush3.bf16.msra.mxu1 %v7223_v35  ;;  %v7241_v51 = vpack.c.bf16 %v5404_v58, %v5403_v11  ;;  %v8984_v63 = vld [vmem:[%s9736_s5 + $0x108] sm:$0xff] }
 0x1d3   : > { %v4244_v36 = vmax.f32 %v4242_v9, %v4243_v27  ;;  %v4327_v39 = vsel %vm4297_vm8, %v4237_v33, %v4326_v56  ;;  %7226 = vmatprep.subr.bf16.mxu1 %v7225_v59  ;;  %v7245_v9 = vpack.c.bf16 %v5406_v45, %v5405_v2  ;;  %v5390_v56 = vld [vmem:[%s9736_s5 + $0x78] sm:$0xff]  ;;  %v7249_v33 = vpack.c.bf16 %v5424_v23, %v5423_v16  ;;  %v5428_v13 = vld [vmem:[%s9736_s5 + $0x1a8] sm:$0xff] }
 0x1d4   : > { %v7247_v6 = vpack.c.bf16 %v5390_v56, %v5389_v20  ;;  %v4454_v27 = vsub.s32 0, %v7926_v19  ;;  %v5483_v59 = vrot.slane %v8970_v37, 7 }
 0x1d5   : > { %v4328_v31 = vsel %vm4299_vm9, %v4244_v36, %v4327_v39  ;;  %7216 = vmatpush1.bf16.msra.mxu0 %v7215_v46  ;;  %v4450_v36 = vld [vmem:[%s9735_s4] sm:$0x3]  ;;  %v4458_v39 = vsub.s32 1, %v7926_v19  ;;  %v7531_v46 = vmov 1983009808  }
 0x1d6   : > { %4338 = vst [vmem:[#allocation3 + $0x28] sm:$0xff] %v4328_v31  ;;  %4550 = vmatprep.mubr.f32.mxu0 %v4328_v31  ;;  %7228 = vmatpush3.bf16.msra.mxu1 %v7227_v21  ;;  %v4665_v31 = vunpack.c.l.s4 %v7531_v46 }
 0x1d7   : > { %7230 = vmatprep.subr.bf16.mxu1 %v7229_v8 }
 0x1da   : > { %7232 = vmatpush3.bf16.msra.mxu1 %v7231_v10 }
 0x1db   : > { %7234 = vmatprep.subr.bf16.mxu1 %v7233_v5 }
 0x1dd   : > { %v4343_v3 = vld [vmem:[#allocation3 + $0x27] sm:$0xff] }
 0x1de   : > { %4551 = vmatmul.mubr.f32.gmra.mrb[8].mxu0 %v4343_v3  ;;  %v4352_v22 = vld [vmem:[#allocation3 + $0x21] sm:$0xff]  ;;  %v4353_v52 = vld [vmem:[#allocation3 + $0x29] sm:$0xff]  ;;  %7236 = vmatpush3.bf16.msra.mxu1 %v7235_v50  ;;  %v8959_v3 = vrot.slane %v4450_v36, %v4454_v27 }
 0x1df   : > { %4621 = vmatprep.mubr.f32.mxu0 %v7529_v1  ;;  %7238 = vmatprep.subr.bf16.mxu1 %v7237_v0 }
 0x1e2   : > { %4622 = vmatmul.mubr.f32.vlgmr.msra.gmra.mrb[0].mxu0 %v4349_v47  ;;  %7240 = vmatpush3.bf16.msra.mxu1 %v7239_v12  ;;  %v8961_v47 = vrot.slane %v4450_v36, %v4458_v39 }
 0x1e3   : > { %4627 = vmatprep.mubr.f32.mxu0 %v7529_v1  ;;  %7242 = vmatprep.subr.bf16.mxu1 %v7241_v51 }
 0x1e6   : > { %4628 = vmatmul.mubr.f32.gmra.mrb[2].mxu0 %v4350_v15  ;;  %7244 = vmatpush3.bf16.msra.mxu1 %v7243_v48  ;;  %v4666_v15 = vunpack.c.0.s8 %v4665_v31 }
 0x1e7   : > { %4633 = vmatprep.mubr.f32.mxu0 %v7529_v1  ;;  %7246 = vmatprep.subr.bf16.mxu1 %v7245_v9 }
 0x1e8   : > { %v8966_v55 = vsub.s32 %v4666_v15, %v7926_v19  ;;  %v8979_v19 = vld [vmem:[%s9736_s5 + $0x100] sm:$0xff] }
 0x1e9   : > { %v7251_v29 = vpack.c.bf16 %v8984_v63, %v8979_v19  ;;  %v5411_v19 = vld [vmem:[%s9736_s5 + $0x120] sm:$0xff]  ;;  %v5412_v63 = vld [vmem:[%s9736_s5 + $0x128] sm:$0xff] }
 0x1ea   : > { %4634 = vmatmul.mubr.f32.gmra.mrb[4].mxu0 %v4351_v25  ;;  %7248 = vmatpush3.bf16.msra.mxu1 %v7247_v6 }
 0x1eb   : > { %4639 = vmatprep.mubr.f32.mxu0 %v7529_v1  ;;  %7250 = vmatprep.subr.bf16.mxu1 %v7249_v33 }
 0x1ee   : > { %4640 = vmatmul.mubr.f32.gmra.mrb[6].mxu0 %v4352_v22 }
 0x1ef   : > { %4645 = vmatprep.mubr.f32.mxu0 %v7529_v1 }
 0x1f2   : > { %4646 = vmatmul.mubr.f32.gmra.mrb[8].mxu0 %v4353_v52 }
 0x1f3   : > { %7111 = vmatprep.mubr.msk.f32.mxu0 %vm7533_vm15, %v7529_v1 }
 0x2b5   : > { %v4623_v25 = vpop.f32.mrb[0].mxu0 }
 0x2b6   : > { %v7370_v22 = vadd.f32 %v4623_v25, %v8959_v3  ;;  %v4625_v52 = vpop.f32.mrb[1].mxu0 }
 0x2b7   : > { %v7371_v44 = vadd.f32 %v4625_v52, %v8961_v47 }
 0x2b9   : > { %v4662_v40 = vcombine.low %v7370_v22, %v7371_v44  ;;  %v4663_v14 = vcombine.high %v7370_v22, %v7371_v44  ;;  %v4629_v18 = vpop.f32.mrb[2].mxu0 }
 0x2ba   : > { %v7372_v28 = vadd.f32 %v4629_v18, %v8959_v3  ;;  %v4631_v62 = vpop.f32.mrb[3].mxu0 }
 0x2bb   : > { %v4670_v60 = vrot.slane %v4662_v40, %v8966_v55  ;;  %v4677_v61 = vrot.slane %v4663_v14, %v8966_v55  ;;  %v7373_v35 = vadd.f32 %v4631_v62, %v8961_v47 }
 0x2bd   : > { %v4678_v53 = vcombine.high %v4670_v60, %v4670_v60  ;;  %v4679_v24 = vcombine.high %v4677_v61, %v4677_v61  ;;  %v4758_v21 = vrot.slane %v4670_v60, %v8966_v55  ;;  %v4774_v34 = vrot.slane %v4677_v61, %v8966_v55  ;;  %v4635_v4 = vpop.f32.mrb[4].mxu0 }
 0x2be   : > { %v4680_v8 = vcombine.low %v7372_v28, %v7373_v35  ;;  %v4681_v43 = vcombine.high %v7372_v28, %v7373_v35  ;;  %v8991_v42 = vadd.f32 %v4635_v4, %v8959_v3  ;;  %v8993_v10 = vpop.f32.mrb[5].mxu0 }
 0x2bf   : > { %v4759_v38 = vcombine.high %v4758_v21, %v4758_v21  ;;  %v4766_v5 = vrot.slane %v4678_v53, %v8966_v55  ;;  %v4775_v32 = vcombine.high %v4774_v34, %v4774_v34  ;;  %v4782_v26 = vrot.slane %v4679_v24, %v8966_v55 }
 0x2c0   : > { %v4953_v50 = vsel %vm4952_vm11, %v4758_v21, -inf  ;;  %v4981_v57 = vsel %vm4952_vm11, %v4774_v34, -inf  ;;  %v9002_v30 = vrot.slane %v4680_v8, %v8966_v55  ;;  %v9005_v0 = vrot.slane %v4681_v43, %v8966_v55 }
 0x2c1   : > { %v4767_v49 = vcombine.high %v4766_v5, %v4766_v5  ;;  %v4783_v54 = vcombine.high %v4782_v26, %v4782_v26  ;;  %v4954_v12 = vrot.slane %v4953_v50, 4  ;;  %v4960_v11 = vsel %vm4952_vm11, %v4759_v38, -inf  ;;  %v9008_v58 = vpop.f32.mrb[6].mxu0 }
 0x2c2   : > { %v4961_v51 = vrot.slane %v4960_v11, 4  ;;  %v4967_v7 = vsel %vm4952_vm11, %v4766_v5, -inf  ;;  %v4982_v41 = vrot.slane %v4981_v57, 4  ;;  %v4988_v48 = vsel %vm4952_vm11, %v4775_v32, -inf  ;;  %v9012_v2 = vpop.f32.mrb[7].mxu0 }
 0x2c3   : > { %v4955_v45 = vmax.f32 %v4953_v50, %v4954_v12  ;;  %v4968_v9 = vrot.slane %v4967_v7, 4  ;;  %v4974_v20 = vsel %vm4952_vm11, %v4767_v49, -inf  ;;  %v4989_v56 = vrot.slane %v4988_v48, 4 }
 0x2c4   : > { %v4962_v6 = vmax.f32 %v4960_v11, %v4961_v51  ;;  %v4975_v16 = vrot.slane %v4974_v20, 4  ;;  %v4983_v23 = vmax.f32 %v4981_v57, %v4982_v41  ;;  %v4995_v33 = vsel %vm4952_vm11, %v4782_v26, -inf }
 0x2c5   : > { %v4956_v27 = vrot.slane %v4955_v45, 2  ;;  %v4969_v36 = vmax.f32 %v4967_v7, %v4968_v9  ;;  %v4990_v39 = vmax.f32 %v4988_v48, %v4989_v56  ;;  %v4996_v46 = vrot.slane %v4995_v33, 4  ;;  %v9016_v31 = vpop.f32.mrb[8].mxu0 }
 0x2c6   : > { %v4963_v15 = vrot.slane %v4962_v6, 2  ;;  %v4976_v25 = vmax.f32 %v4974_v20, %v4975_v16  ;;  %v4984_v22 = vrot.slane %v4983_v23, 2  ;;  %v5002_v52 = vsel %vm4952_vm11, %v4783_v54, -inf  ;;  %v9019_v44 = vpop.f32.mrb[9].mxu0 }
 0x2c7   : > { %v4957_v40 = vmax.f32 %v4955_v45, %v4956_v27  ;;  %v4970_v14 = vrot.slane %v4969_v36, 2  ;;  %v4991_v18 = vrot.slane %v4990_v39, 2  ;;  %v4997_v28 = vmax.f32 %v4995_v33, %v4996_v46 }
 0x2c8   : > { %v4964_v62 = vmax.f32 %v4962_v6, %v4963_v15  ;;  %v4977_v60 = vrot.slane %v4976_v25, 2  ;;  %v4985_v61 = vmax.f32 %v4983_v23, %v4984_v22  ;;  %v5003_v35 = vrot.slane %v5002_v52, 4 }
 0x2c9   : > { %v4958_v53 = vrot.slane %v4957_v40, 1  ;;  %v4971_v24 = vmax.f32 %v4969_v36, %v4970_v14  ;;  %v4992_v21 = vmax.f32 %v4990_v39, %v4991_v18  ;;  %v4998_v34 = vrot.slane %v4997_v28, 2 }
 0x2ca   : > { %v4965_v4 = vrot.slane %v4964_v62, 1  ;;  %v4978_v8 = vmax.f32 %v4976_v25, %v4977_v60  ;;  %v4986_v43 = vrot.slane %v4985_v61, 1  ;;  %v5004_v38 = vmax.f32 %v5002_v52, %v5003_v35 }
 0x2cb   : > { %v4959_v5 = vmax.f32 %v4957_v40, %v4958_v53  ;;  %v4972_v32 = vrot.slane %v4971_v24, 1  ;;  %v4993_v26 = vrot.slane %v4992_v21, 1  ;;  %v4999_v50 = vmax.f32 %v4997_v28, %v4998_v34 }
 0x2cc   : > { %v4966_v57 = vmax.f32 %v4964_v62, %v4965_v4  ;;  %v4979_v49 = vrot.slane %v4978_v8, 1  ;;  %v4987_v54 = vmax.f32 %v4985_v61, %v4986_v43  ;;  %v5005_v12 = vrot.slane %v5004_v38, 2 }
 0x2cd   : > { %v4973_v11 = vmax.f32 %v4971_v24, %v4972_v32  ;;  %v4994_v51 = vmax.f32 %v4992_v21, %v4993_v26  ;;  %v5000_v7 = vrot.slane %v4999_v50, 1  ;;  %v4696_v41 = vcombine.high %v9002_v30, %v9002_v30 }
 0x2ce   : > { %v4980_v48 = vmax.f32 %v4978_v8, %v4979_v49  ;;  %v5006_v45 = vmax.f32 %v5004_v38, %v5005_v12  ;;  %v4697_v9 = vcombine.high %v9005_v0, %v9005_v0  ;;  %v4790_v20 = vrot.slane %v9002_v30, %v8966_v55 }
 0x2cf   : > { %v5001_v56 = vmax.f32 %v4999_v50, %v5000_v7  ;;  %v5283_v6 = vsel %vm4287_vm3, %v4973_v11, %v4959_v5  ;;  %v4798_v16 = vrot.slane %v4696_v41, %v8966_v55  ;;  %v4806_v23 = vrot.slane %v9005_v0, %v8966_v55 }
 0x2d0   : > { %v5007_v33 = vrot.slane %v5006_v45, 1  ;;  %v5284_v27 = vsel %vm4289_vm4, %v4987_v54, %v5283_v6  ;;  %v5290_v36 = vsel %vm4287_vm3, %v4980_v48, %v4966_v57  ;;  %v4791_v39 = vcombine.high %v4790_v20, %v4790_v20 }
 0x2d1   : > { %v5285_v46 = vsel %vm4291_vm5, %v5001_v56, %v5284_v27  ;;  %v5291_v15 = vsel %vm4289_vm4, %v4994_v51, %v5290_v36  ;;  %v4799_v25 = vcombine.high %v4798_v16, %v4798_v16  ;;  %v4807_v30 = vcombine.high %v4806_v23, %v4806_v23 }
 0x2d2   : > { %v5008_v22 = vmax.f32 %v5006_v45, %v5007_v33  ;;  %v4814_v52 = vrot.slane %v4697_v9, %v8966_v55  ;;  %v5009_v40 = vsel %vm4952_vm11, %v4790_v20, -inf  ;;  %v5016_v14 = vsel %vm4952_vm11, %v4791_v39, -inf }
 0x2d3   : > { %v5010_v0 = vrot.slane %v5009_v40, 4  ;;  %v5017_v18 = vrot.slane %v5016_v14, 4  ;;  %v5023_v28 = vsel %vm4952_vm11, %v4798_v16, -inf  ;;  %v5030_v62 = vsel %vm4952_vm11, %v4799_v25, -inf }
 0x2d4   : > { %v5292_v60 = vsel %vm4291_vm5, %v5008_v22, %v5291_v15  ;;  %v4815_v61 = vcombine.high %v4814_v52, %v4814_v52  ;;  %v5024_v35 = vrot.slane %v5023_v28, 4  ;;  %v5031_v53 = vrot.slane %v5030_v62, 4 }
 0x2d5   : > { %v5011_v24 = vmax.f32 %v5009_v40, %v5010_v0  ;;  %v5018_v21 = vmax.f32 %v5016_v14, %v5017_v18  ;;  %v5037_v34 = vsel %vm4952_vm11, %v4806_v23, -inf  ;;  %v5044_v4 = vsel %vm4952_vm11, %v4807_v30, -inf }
 0x2d6   : > { %v5025_v8 = vmax.f32 %v5023_v28, %v5024_v35  ;;  %v5032_v43 = vmax.f32 %v5030_v62, %v5031_v53  ;;  %v5038_v38 = vrot.slane %v5037_v34, 4  ;;  %v5045_v5 = vrot.slane %v5044_v4, 4 }
 0x2d7   : > { %v5012_v32 = vrot.slane %v5011_v24, 2  ;;  %v5019_v26 = vrot.slane %v5018_v21, 2  ;;  %v5051_v50 = vsel %vm4952_vm11, %v4814_v52, -inf  ;;  %v5058_v57 = vsel %vm4952_vm11, %v4815_v61, -inf }
 0x2d8   : > { %v5026_v49 = vrot.slane %v5025_v8, 2  ;;  %v5033_v54 = vrot.slane %v5032_v43, 2  ;;  %v5039_v12 = vmax.f32 %v5037_v34, %v5038_v38  ;;  %v5046_v11 = vmax.f32 %v5044_v4, %v5045_v5 }
 0x2d9   : > { %v5013_v51 = vmax.f32 %v5011_v24, %v5012_v32  ;;  %v5020_v7 = vmax.f32 %v5018_v21, %v5019_v26  ;;  %v5052_v41 = vrot.slane %v5051_v50, 4  ;;  %v5059_v48 = vrot.slane %v5058_v57, 4 }
 0x2da   : > { %v5027_v45 = vmax.f32 %v5025_v8, %v5026_v49  ;;  %v5034_v9 = vmax.f32 %v5032_v43, %v5033_v54  ;;  %v5040_v20 = vrot.slane %v5039_v12, 2  ;;  %v5047_v56 = vrot.slane %v5046_v11, 2 }
 0x2db   : > { %v5014_v6 = vrot.slane %v5013_v51, 1  ;;  %v5021_v16 = vrot.slane %v5020_v7, 1  ;;  %v5053_v23 = vmax.f32 %v5051_v50, %v5052_v41  ;;  %v5060_v33 = vmax.f32 %v5058_v57, %v5059_v48 }
 0x2dc   : > { %v5028_v27 = vrot.slane %v5027_v45, 1  ;;  %v5035_v36 = vrot.slane %v5034_v9, 1  ;;  %v5041_v39 = vmax.f32 %v5039_v12, %v5040_v20  ;;  %v5048_v15 = vmax.f32 %v5046_v11, %v5047_v56 }
 0x2dd   : > { %v5015_v25 = vmax.f32 %v5013_v51, %v5014_v6  ;;  %v5022_v30 = vmax.f32 %v5020_v7, %v5021_v16  ;;  %v5054_v22 = vrot.slane %v5053_v23, 2  ;;  %v5061_v52 = vrot.slane %v5060_v33, 2 }
 0x2de   : > { %v5029_v40 = vmax.f32 %v5027_v45, %v5028_v27  ;;  %v5036_v14 = vmax.f32 %v5034_v9, %v5035_v36  ;;  %v5042_v0 = vrot.slane %v5041_v39, 1  ;;  %v5049_v18 = vrot.slane %v5048_v15, 1 }
 0x2df   : > { %v5055_v28 = vmax.f32 %v5053_v23, %v5054_v22  ;;  %v5062_v62 = vmax.f32 %v5060_v33, %v5061_v52  ;;  %v5286_v61 = vsel %vm4293_vm6, %v5015_v25, %v5285_v46  ;;  %v5293_v35 = vsel %vm4293_vm6, %v5022_v30, %v5292_v60  ;;  %v9056_v46 = vld [vmem:[%s9736_s5 + $0x190] sm:$0xff]  ;;  %v9061_v60 = vld [vmem:[%s9736_s5 + $0x198] sm:$0xff] }
 0x2e0   : > { %v5043_v53 = vmax.f32 %v5041_v39, %v5042_v0  ;;  %v5050_v24 = vmax.f32 %v5048_v15, %v5049_v18  ;;  %v5287_v21 = vsel %vm4295_vm7, %v5029_v40, %v5286_v61  ;;  %v5294_v34 = vsel %vm4295_vm7, %v5036_v14, %v5293_v35 }
 0x2e1   : > { %v5056_v4 = vrot.slane %v5055_v28, 1  ;;  %v5063_v8 = vrot.slane %v5062_v62, 1  ;;  %v7375_v43 = vadd.f32 %v8993_v10, %v8961_v47  ;;  %v7376_v38 = vadd.f32 %v9008_v58, %v8959_v3 }
 0x2e2   : > { %v5288_v5 = vsel %vm4297_vm8, %v5043_v53, %v5287_v21  ;;  %v5295_v32 = vsel %vm4297_vm8, %v5050_v24, %v5294_v34  ;;  %v7377_v10 = vadd.f32 %v9012_v2, %v8961_v47  ;;  %v9069_v58 = vadd.f32 %v9016_v31, %v8959_v3 }
 0x2e3   : > { %v5057_v26 = vmax.f32 %v5055_v28, %v5056_v4  ;;  %v5064_v50 = vmax.f32 %v5062_v62, %v5063_v8  ;;  %v4698_v57 = vcombine.low %v8991_v42, %v7375_v43  ;;  %v4699_v49 = vcombine.high %v8991_v42, %v7375_v43 }
 0x2e4   : > { %v4716_v54 = vcombine.low %v7376_v38, %v7377_v10  ;;  %v4717_v12 = vcombine.high %v7376_v38, %v7377_v10  ;;  %v9075_v11 = vadd.f32 %v9019_v44, %v8961_v47  ;;  %v7253_v51 = vpack.c.bf16 %v9061_v60, %v9056_v46 }
 0x2e5   : > { %v9080_v2 = vsel %vm4299_vm9, %v5057_v26, %v5288_v5  ;;  %v9083_v3 = vsel %vm4299_vm9, %v5064_v50, %v5295_v32  ;;  %v4706_v31 = vrot.slane %v4698_v57, %v8966_v55  ;;  %v4713_v7 = vrot.slane %v4699_v49, %v8966_v55 }
 0x2e6   : > { %5323 = vst [vmem:[#allocation4 + $0x10] sm:$0xff] %v9080_v2  ;;  %5324 = vst [vmem:[#allocation4 + $0x18] sm:$0xff] %v9083_v3  ;;  %v4724_v47 = vrot.slane %v4716_v54, %v8966_v55  ;;  %v9091_v42 = vrot.slane %v4717_v12, %v8966_v55  ;;  %v4734_v44 = vcombine.low %v9069_v58, %v9075_v11 }
 0x2e7   : > { %v4735_v41 = vcombine.high %v9069_v58, %v9075_v11  ;;  %v4714_v48 = vcombine.high %v4706_v31, %v4706_v31  ;;  %v4715_v45 = vcombine.high %v4713_v7, %v4713_v7  ;;  %v4822_v9 = vrot.slane %v4706_v31, %v8966_v55 }
 0x2e8   : > { %v4838_v20 = vrot.slane %v4713_v7, %v8966_v55  ;;  %v4732_v56 = vcombine.high %v4724_v47, %v4724_v47  ;;  %v4733_v6 = vcombine.high %v9091_v42, %v9091_v42  ;;  %v9102_v16 = vrot.slane %v4724_v47, %v8966_v55 }
 0x2e9   : > { %v9106_v23 = vrot.slane %v9091_v42, %v8966_v55  ;;  %v4823_v33 = vcombine.high %v4822_v9, %v4822_v9  ;;  %v4830_v27 = vrot.slane %v4714_v48, %v8966_v55  ;;  %v4846_v39 = vrot.slane %v4715_v45, %v8966_v55 }
 0x2ea   : > { %v4839_v36 = vcombine.high %v4838_v20, %v4838_v20  ;;  %v5065_v15 = vsel %vm4952_vm11, %v4822_v9, -inf  ;;  %v5093_v25 = vsel %vm4952_vm11, %v4838_v20, -inf  ;;  %v4855_v30 = vcombine.high %v9102_v16, %v9102_v16 }
 0x2eb   : > { %v9115_v22 = vrot.slane %v4732_v56, %v8966_v55  ;;  %v4831_v52 = vcombine.high %v4830_v27, %v4830_v27  ;;  %v4847_v40 = vcombine.high %v4846_v39, %v4846_v39  ;;  %v5066_v14 = vrot.slane %v5065_v15, 4 }
 0x2ec   : > { %v5072_v0 = vsel %vm4952_vm11, %v4823_v33, -inf  ;;  %v5079_v28 = vsel %vm4952_vm11, %v4830_v27, -inf  ;;  %v5094_v62 = vrot.slane %v5093_v25, 4  ;;  %v5100_v61 = vsel %vm4952_vm11, %v4839_v36, -inf }
 0x2ed   : > { %v5073_v18 = vrot.slane %v5072_v0, 4  ;;  %v5067_v35 = vmax.f32 %v5065_v15, %v5066_v14  ;;  %v5080_v53 = vrot.slane %v5079_v28, 4  ;;  %v5086_v24 = vsel %vm4952_vm11, %v4831_v52, -inf }
 0x2ee   : > { %v5101_v21 = vrot.slane %v5100_v61, 4  ;;  %v5087_v4 = vrot.slane %v5086_v24, 4  ;;  %v5095_v8 = vmax.f32 %v5093_v25, %v5094_v62  ;;  %v5107_v43 = vsel %vm4952_vm11, %v4846_v39, -inf }
 0x2ef   : > { %v5074_v34 = vmax.f32 %v5072_v0, %v5073_v18  ;;  %v5068_v38 = vrot.slane %v5067_v35, 2  ;;  %v5081_v5 = vmax.f32 %v5079_v28, %v5080_v53  ;;  %v5108_v10 = vrot.slane %v5107_v43, 4 }
 0x2f0   : > { %v5102_v32 = vmax.f32 %v5100_v61, %v5101_v21  ;;  %v5088_v50 = vmax.f32 %v5086_v24, %v5087_v4  ;;  %v5096_v57 = vrot.slane %v5095_v8, 2  ;;  %v5114_v49 = vsel %vm4952_vm11, %v4847_v40, -inf }
 0x2f1   : > { %v5075_v26 = vrot.slane %v5074_v34, 2  ;;  %v5069_v54 = vmax.f32 %v5067_v35, %v5068_v38  ;;  %v5082_v12 = vrot.slane %v5081_v5, 2  ;;  %v5109_v7 = vmax.f32 %v5107_v43, %v5108_v10 }
 0x2f2   : > { %v5103_v31 = vrot.slane %v5102_v32, 2  ;;  %v5089_v48 = vrot.slane %v5088_v50, 2  ;;  %v5097_v45 = vmax.f32 %v5095_v8, %v5096_v57  ;;  %v5115_v9 = vrot.slane %v5114_v49, 4 }
 0x2f3   : > { %v5076_v47 = vmax.f32 %v5074_v34, %v5075_v26  ;;  %v5070_v20 = vrot.slane %v5069_v54, 1  ;;  %v5083_v56 = vmax.f32 %v5081_v5, %v5082_v12  ;;  %v5110_v27 = vrot.slane %v5109_v7, 2 }
 0x2f4   : > { %v5104_v33 = vmax.f32 %v5102_v32, %v5103_v31  ;;  %v5090_v39 = vmax.f32 %v5088_v50, %v5089_v48  ;;  %v5098_v15 = vrot.slane %v5097_v45, 1  ;;  %v5116_v25 = vmax.f32 %v5114_v49, %v5115_v9 }
 0x2f5   : > { %v5077_v36 = vrot.slane %v5076_v47, 1  ;;  %v5071_v52 = vmax.f32 %v5069_v54, %v5070_v20  ;;  %v5084_v14 = vrot.slane %v5083_v56, 1  ;;  %v5111_v40 = vmax.f32 %v5109_v7, %v5110_v27 }
 0x2f6   : > { %v5105_v0 = vrot.slane %v5104_v33, 1  ;;  %v5091_v28 = vrot.slane %v5090_v39, 1  ;;  %v5099_v62 = vmax.f32 %v5097_v45, %v5098_v15  ;;  %v5117_v61 = vrot.slane %v5116_v25, 2 }
 0x2f7   : > { %v5078_v18 = vmax.f32 %v5076_v47, %v5077_v36  ;;  %v5085_v35 = vmax.f32 %v5083_v56, %v5084_v14  ;;  %v5112_v24 = vrot.slane %v5111_v40, 1  ;;  %v4863_v21 = vcombine.high %v9115_v22, %v9115_v22 }
 0x2f8   : > { %v5106_v53 = vmax.f32 %v5104_v33, %v5105_v0  ;;  %v5092_v34 = vmax.f32 %v5090_v39, %v5091_v28  ;;  %v5118_v4 = vmax.f32 %v5116_v25, %v5117_v61  ;;  %v4871_v8 = vcombine.high %v9106_v23, %v9106_v23 }
 0x2f9   : > { %v4878_v43 = vrot.slane %v4733_v6, %v8966_v55  ;;  %v5113_v38 = vmax.f32 %v5111_v40, %v5112_v24  ;;  %v5297_v5 = vsel %vm4287_vm3, %v5085_v35, %v5071_v52  ;;  %v5121_v32 = vsel %vm4952_vm11, %v9102_v16, -inf }
 0x2fa   : > { %v5128_v10 = vsel %vm4952_vm11, %v4855_v30, -inf  ;;  %v5119_v26 = vrot.slane %v5118_v4, 1  ;;  %v5298_v50 = vsel %vm4289_vm4, %v5099_v62, %v5297_v5  ;;  %v5304_v57 = vsel %vm4287_vm3, %v5092_v34, %v5078_v18 }
 0x2fb   : > { %v4879_v49 = vcombine.high %v4878_v43, %v4878_v43  ;;  %v5299_v54 = vsel %vm4291_vm5, %v5113_v38, %v5298_v50  ;;  %v5305_v12 = vsel %vm4289_vm4, %v5106_v53, %v5304_v57  ;;  %v5122_v42 = vrot.slane %v5121_v32, 4 }
 0x2fc   : > { %v5129_v6 = vrot.slane %v5128_v10, 4  ;;  %v5120_v31 = vmax.f32 %v5118_v4, %v5119_v26  ;;  %v5135_v7 = vsel %vm4952_vm11, %v9115_v22, -inf  ;;  %v5142_v16 = vsel %vm4952_vm11, %v4863_v21, -inf }
 0x2fd   : > { %v5149_v30 = vsel %vm4952_vm11, %v9106_v23, -inf  ;;  %v5123_v47 = vmax.f32 %v5121_v32, %v5122_v42  ;;  %v5136_v45 = vrot.slane %v5135_v7, 4  ;;  %v5143_v9 = vrot.slane %v5142_v16, 4 }
 0x2fe   : > { %v5130_v48 = vmax.f32 %v5128_v10, %v5129_v6  ;;  %v5306_v20 = vsel %vm4291_vm5, %v5120_v31, %v5305_v12  ;;  %v5150_v56 = vrot.slane %v5149_v30, 4  ;;  %v5156_v33 = vsel %vm4952_vm11, %v4871_v8, -inf }
 0x2ff   : > { %v5163_v27 = vsel %vm4952_vm11, %v4878_v43, -inf  ;;  %v5124_v36 = vrot.slane %v5123_v47, 2  ;;  %v5137_v15 = vmax.f32 %v5135_v7, %v5136_v45  ;;  %v5144_v22 = vmax.f32 %v5142_v16, %v5143_v9 }
 0x300   : > { %v5131_v39 = vrot.slane %v5130_v48, 2  ;;  %v5151_v25 = vmax.f32 %v5149_v30, %v5150_v56  ;;  %v5157_v52 = vrot.slane %v5156_v33, 4  ;;  %v5164_v14 = vrot.slane %v5163_v27, 4 }
 0x301   : > { %v5170_v23 = vsel %vm4952_vm11, %v4879_v49, -inf  ;;  %v5125_v0 = vmax.f32 %v5123_v47, %v5124_v36  ;;  %v5138_v18 = vrot.slane %v5137_v15, 2  ;;  %v5145_v28 = vrot.slane %v5144_v22, 2 }
 0x302   : > { %v5132_v40 = vmax.f32 %v5130_v48, %v5131_v39  ;;  %v5152_v62 = vrot.slane %v5151_v25, 2  ;;  %v5158_v61 = vmax.f32 %v5156_v33, %v5157_v52  ;;  %v5165_v35 = vmax.f32 %v5163_v27, %v5164_v14  ;;  %v9168_v27 = vld [vmem:[%s9736_s5 + $0x118] sm:$0xff] }
 0x303   : > { %v5171_v53 = vrot.slane %v5170_v23, 4  ;;  %v5126_v24 = vrot.slane %v5125_v0, 1  ;;  %v5139_v34 = vmax.f32 %v5137_v15, %v5138_v18  ;;  %v5146_v4 = vmax.f32 %v5144_v22, %v5145_v28 }
 0x304   : > { %v5133_v21 = vrot.slane %v5132_v40, 1  ;;  %v5153_v8 = vmax.f32 %v5151_v25, %v5152_v62  ;;  %v5159_v43 = vrot.slane %v5158_v61, 2  ;;  %v5166_v38 = vrot.slane %v5165_v35, 2 }
 0x305   : > { %v5172_v5 = vmax.f32 %v5170_v23, %v5171_v53  ;;  %v5127_v32 = vmax.f32 %v5125_v0, %v5126_v24  ;;  %v5140_v26 = vrot.slane %v5139_v34, 1  ;;  %v5147_v50 = vrot.slane %v5146_v4, 1 }
 0x306   : > { %v5134_v10 = vmax.f32 %v5132_v40, %v5133_v21  ;;  %v5154_v57 = vrot.slane %v5153_v8, 1  ;;  %v5160_v49 = vmax.f32 %v5158_v61, %v5159_v43  ;;  %v5167_v12 = vmax.f32 %v5165_v35, %v5166_v38 }
 0x307   : > { %v5173_v42 = vrot.slane %v5172_v5, 2  ;;  %v5141_v6 = vmax.f32 %v5139_v34, %v5140_v26  ;;  %v5148_v31 = vmax.f32 %v5146_v4, %v5147_v50  ;;  %v5300_v7 = vsel %vm4293_vm6, %v5127_v32, %v5299_v54 }
 0x308   : > { %v5307_v16 = vsel %vm4293_vm6, %v5134_v10, %v5306_v20  ;;  %v5155_v30 = vmax.f32 %v5153_v8, %v5154_v57  ;;  %v5161_v47 = vrot.slane %v5160_v49, 1  ;;  %v5168_v48 = vrot.slane %v5167_v12, 1  ;;  %v9163_v20 = vld [vmem:[%s9736_s5 + $0x110] sm:$0xff] }
 0x309   : > { %v5174_v45 = vmax.f32 %v5172_v5, %v5173_v42  ;;  %v5301_v9 = vsel %vm4295_vm7, %v5141_v6, %v5300_v7  ;;  %v5308_v56 = vsel %vm4295_vm7, %v5148_v31, %v5307_v16  ;;  %v4742_v33 = vrot.slane %v4734_v44, %v8966_v55 }
 0x30a   : > { %v4749_v54 = vrot.slane %v4735_v41, %v8966_v55  ;;  %v5162_v36 = vmax.f32 %v5160_v49, %v5161_v47  ;;  %v5169_v39 = vmax.f32 %v5167_v12, %v5168_v48  ;;  %v5302_v44 = vsel %vm4297_vm8, %v5155_v30, %v5301_v9 }
 0x30b   : > { %v5175_v15 = vrot.slane %v5174_v45, 1  ;;  %v4750_v22 = vcombine.high %v4742_v33, %v4742_v33  ;;  %v4886_v58 = vrot.slane %v4742_v33, %v8966_v55  ;;  %v7255_v23 = vpack.c.bf16 %v9168_v27, %v9163_v20  ;;  %v5432_v20 = vld [vmem:[%s9736_s5 + $0x1c8] sm:$0xff]  ;;  %v9279_v27 = vld [vmem:[#allocation4 + $0x18] sm:$0xfe] }
 0x30c   : > { %v4751_v25 = vcombine.high %v4749_v54, %v4749_v54  ;;  %v4902_v11 = vrot.slane %v4749_v54, %v8966_v55  ;;  %v9174_v52 = vsel %vm4299_vm9, %v5169_v39, %v5302_v44  ;;  %v5309_v14 = vsel %vm4297_vm8, %v5162_v36, %v5308_v56 }
 0x30d   : > { %v5176_v41 = vmax.f32 %v5174_v45, %v5175_v15  ;;  %v4887_v0 = vcombine.high %v4886_v58, %v4886_v58  ;;  %v4894_v40 = vrot.slane %v4750_v22, %v8966_v55  ;;  %v5177_v61 = vsel %vm4952_vm11, %v4886_v58, -inf }
 0x30e   : > { %v4903_v18 = vcombine.high %v4902_v11, %v4902_v11  ;;  %v4910_v28 = vrot.slane %v4751_v25, %v8966_v55  ;;  %v5205_v35 = vsel %vm4952_vm11, %v4902_v11, -inf  ;;  %v5487_v53 = vrot.slane %v9083_v3, 7 }
 0x30f   : > { %v9182_v62 = vsel %vm4299_vm9, %v5176_v41, %v5309_v14  ;;  %v4895_v24 = vcombine.high %v4894_v40, %v4894_v40  ;;  %v5178_v34 = vrot.slane %v5177_v61, 4  ;;  %v5184_v4 = vsel %vm4952_vm11, %v4887_v0, -inf }
 0x310   : > { %v4911_v21 = vcombine.high %v4910_v28, %v4910_v28  ;;  %v5185_v8 = vrot.slane %v5184_v4, 4  ;;  %v5191_v43 = vsel %vm4952_vm11, %v4894_v40, -inf  ;;  %v5206_v38 = vrot.slane %v5205_v35, 4 }
 0x311   : > { %v5212_v55 = vsel %vm4952_vm11, %v4903_v18, -inf  ;;  %v5179_v5 = vmax.f32 %v5177_v61, %v5178_v34  ;;  %v5192_v32 = vrot.slane %v5191_v43, 4  ;;  %v5198_v10 = vsel %vm4952_vm11, %v4895_v24, -inf }
 0x312   : > { %v5213_v26 = vrot.slane %v5212_v55, 4  ;;  %v5186_v50 = vmax.f32 %v5184_v4, %v5185_v8  ;;  %v5199_v57 = vrot.slane %v5198_v10, 4  ;;  %v5207_v49 = vmax.f32 %v5205_v35, %v5206_v38 }
 0x313   : > { %v5219_v12 = vsel %vm4952_vm11, %v4910_v28, -inf  ;;  %v5180_v42 = vrot.slane %v5179_v5, 2  ;;  %v5193_v6 = vmax.f32 %v5191_v43, %v5192_v32  ;;  %v5226_v48 = vsel %vm4952_vm11, %v4911_v21, -inf }
 0x314   : > { %v5214_v31 = vmax.f32 %v5212_v55, %v5213_v26  ;;  %v5220_v7 = vrot.slane %v5219_v12, 4  ;;  %v5187_v16 = vrot.slane %v5186_v50, 2  ;;  %v5200_v30 = vmax.f32 %v5198_v10, %v5199_v57 }
 0x315   : > { %v5208_v47 = vrot.slane %v5207_v49, 2  ;;  %v5181_v45 = vmax.f32 %v5179_v5, %v5180_v42  ;;  %v5194_v9 = vrot.slane %v5193_v6, 2  ;;  %v5227_v15 = vrot.slane %v5226_v48, 4 }
 0x316   : > { %v5215_v56 = vrot.slane %v5214_v31, 2  ;;  %v5221_v33 = vmax.f32 %v5219_v12, %v5220_v7  ;;  %v5188_v54 = vmax.f32 %v5186_v50, %v5187_v16  ;;  %v5201_v36 = vrot.slane %v5200_v30, 2  ;;  %v5427_v12 = vld [vmem:[%s9736_s5 + $0x1a0] sm:$0xff] }
 0x317   : > { %v5209_v39 = vmax.f32 %v5207_v49, %v5208_v47  ;;  %v5182_v44 = vrot.slane %v5181_v45, 1  ;;  %v5195_v22 = vmax.f32 %v5193_v6, %v5194_v9  ;;  %v5228_v0 = vmax.f32 %v5226_v48, %v5227_v15  ;;  %v5414_v15 = vld [vmem:[%s9736_s5 + $0x138] sm:$0xff] }
 0x318   : > { %v5216_v25 = vmax.f32 %v5214_v31, %v5215_v56  ;;  %v5222_v58 = vrot.slane %v5221_v33, 2  ;;  %v5189_v11 = vrot.slane %v5188_v54, 1  ;;  %v5202_v41 = vmax.f32 %v5200_v30, %v5201_v36 }
 0x319   : > { %v5210_v14 = vrot.slane %v5209_v39, 1  ;;  %v5196_v40 = vrot.slane %v5195_v22, 1  ;;  %v5351_v61 = vrot.slane %v9083_v3, 1  ;;  %v5183_v35 = vmax.f32 %v5181_v45, %v5182_v44  ;;  %v5429_v3 = vld [vmem:[%s9736_s5 + $0x1b0] sm:$0xff]  ;;  %v5431_v44 = vld [vmem:[%s9736_s5 + $0x1c0] sm:$0xff] }
 0x31a   : > { %v5217_v18 = vrot.slane %v5216_v25, 1  ;;  %v5223_v28 = vmax.f32 %v5221_v33, %v5222_v58  ;;  %v5190_v24 = vmax.f32 %v5188_v54, %v5189_v11  ;;  %v5203_v21 = vrot.slane %v5202_v41, 1  ;;  %v5415_v11 = vld [vmem:[%s9736_s5 + $0x140] sm:$0xff] }
 0x31b   : > { %v5229_v34 = vrot.slane %v5228_v0, 2  ;;  %v5197_v4 = vmax.f32 %v5195_v22, %v5196_v40  ;;  %v5211_v8 = vmax.f32 %v5209_v39, %v5210_v14  ;;  %v5488_v38 = vsel %vm5482_vm12, %v5486_v17, %v5487_v53  ;;  %v5413_v39 = vld [vmem:[%s9736_s5 + $0x130] sm:$0xff] }
 0x31c   : > { %v5224_v43 = vrot.slane %v5223_v28, 1  ;;  %v5204_v55 = vmax.f32 %v5202_v41, %v5203_v21  ;;  %v5218_v5 = vmax.f32 %v5216_v25, %v5217_v18  ;;  %5607 = vmatprep.mubr.f32.mxu1 %v5488_v38  ;;  %v5484_v10 = vrot.slane %v9080_v2, 7  ;;  %v5416_v41 = vld [vmem:[%s9736_s5 + $0x148] sm:$0xff]  ;;  %v5433_v14 = vld [vmem:[%s9736_s5 + $0x1d0] sm:$0xff]  ;;  %v5434_v18 = vld [vmem:[%s9736_s5 + $0x1d8] sm:$0xff] }
 0x31d   : > { %v5230_v32 = vmax.f32 %v5228_v0, %v5229_v34  ;;  %v5311_v50 = vsel %vm4287_vm3, %v5197_v4, %v5183_v35  ;;  %v5350_v57 = vrot.slane %v9080_v2, 1  ;;  %v5354_v49 = vrot.slane %v9182_v62, 1 }
 0x31e   : > { %v5225_v26 = vmax.f32 %v5223_v28, %v5224_v43  ;;  %v5312_v42 = vsel %vm4289_vm4, %v5211_v8, %v5311_v50  ;;  %v5314_v6 = vsel %vm4287_vm3, %v5204_v55, %v5190_v24  ;;  %v5485_v31 = vsel %vm5482_vm12, %v5483_v59, %v5484_v10 }
 0x31f   : > { %v5231_v17 = vrot.slane %v5230_v32, 1  ;;  %v5315_v7 = vsel %vm4289_vm4, %v5218_v5, %v5314_v6  ;;  %5608 = vmatmul.mubr.f32.vlgmr.msra.gmra.mrb[0].mxu1 %v5485_v31  ;;  %v5503_v16 = vrot.slane %v9182_v62, 7  ;;  %v5352_v30 = vrot.slane %v9174_v52, 1 }
 0x320   : > { %v5313_v2 = vsel %vm4291_vm5, %v5225_v26, %v5312_v42  ;;  %7252 = vmatpush3.bf16.msra.mxu1 %v7251_v29  ;;  %v7257_v48 = vpack.c.bf16 %v5428_v13, %v5427_v12  ;;  %v5501_v37 = vrot.slane %v9174_v52, 7  ;;  %v9225_v59 = vsel %vm5349_vm13, %v5351_v61, %v5354_v49  ;;  %v5417_v42 = vld [vmem:[%s9736_s5 + $0x150] sm:$0xff] }
 0x321   : > { %v5232_v47 = vmax.f32 %v5230_v32, %v5231_v17  ;;  %5327 = vst [vmem:[#allocation4 + $0x30] sm:$0xf] %v5313_v2  ;;  %7254 = vmatprep.subr.bf16.mxu1 %v7253_v51  ;;  %v5504_v45 = vsel %vm5482_vm12, %v5487_v53, %v5503_v16  ;;  %v5492_v29 = vrot.slane %v5351_v61, 7  ;;  %v5493_v9 = vrot.slane %v9225_v59, 7  ;;  %v5430_v53 = vld [vmem:[%s9736_s5 + $0x1b8] sm:$0xff] }
 0x322   : > { %v9243_v46 = vsel %vm5349_vm13, %v5350_v57, %v5352_v30  ;;  %5612 = vmatprep.mubr.f32.mxu1 %v5504_v45  ;;  %v5502_v51 = vsel %vm5482_vm12, %v5484_v10, %v5501_v37  ;;  %v5489_v56 = vrot.slane %v5350_v57, 7  ;;  %v7259_v36 = vpack.c.bf16 %v5412_v63, %v5411_v19  ;;  %v5436_v45 = vld [vmem:[%s9736_s5 + $0x1e8] sm:$0xff] }
 0x323   : > { %v5316_v60 = vsel %vm4291_vm5, %v5232_v47, %v5315_v7  ;;  %v5490_v33 = vrot.slane %v9243_v46, 7  ;;  %5613 = vmatmul.mubr.f32.gmra.mrb[2].mxu1 %v5502_v51  ;;  %v9259_v54 = vsel %vm5482_vm12, %v5492_v29, %v5493_v9  ;;  %v7261_v25 = vpack.c.bf16 %v5430_v53, %v5429_v3  ;;  %v5418_v47 = vld [vmem:[%s9736_s5 + $0x158] sm:$0xff] }
 0x324   : > { %5328 = vst [vmem:[#allocation4 + $0x38] sm:$0xf] %v5316_v60  ;;  %7256 = vmatpush3.bf16.msra.mxu1 %v7255_v23  ;;  %v5339_v23 = vld [vmem:[#allocation4 + $0x10] sm:$0xfe]  ;;  %v5367_v58 = vrot.slane %v9174_v52, 2  ;;  %v7263_v40 = vpack.c.bf16 %v5414_v15, %v5413_v39  ;;  %v5369_v61 = vrot.slane %v9182_v62, 2  ;;  %v7265_v4 = vpack.c.bf16 %v5432_v20, %v5431_v44 }
 0x325   : > { %v9274_v22 = vsel %vm5482_vm12, %v5489_v56, %v5490_v33  ;;  %7258 = vmatprep.subr.bf16.mxu1 %v7257_v48  ;;  %v5366_v24 = vrot.slane %v9279_v27, 2  ;;  %v5365_v21 = vrot.slane %v5339_v23, 2  ;;  %v7267_v8 = vpack.c.bf16 %v5416_v41, %v5415_v11  ;;  %v5435_v48 = vld [vmem:[%s9736_s5 + $0x1e0] sm:$0xff]  ;;  %v5437_v15 = vld [vmem:[%s9736_s5 + $0x1f0] sm:$0xff]  ;;  %v5438_v44 = vld [vmem:[%s9736_s5 + $0x1f8] sm:$0xff] }
 0x326   : > { %v7269_v5 = vpack.c.bf16 %v5434_v18, %v5433_v14  ;;  %v7271_v56 = vpack.c.bf16 %v5418_v47, %v5417_v42  ;;  %v7273_v52 = vpack.c.bf16 %v5436_v45, %v5435_v48  ;;  %v7277_v20 = vpack.c.bf16 %v5438_v44, %v5437_v15  ;;  %v5421_v23 = vld [vmem:[%s9736_s5 + $0x170] sm:$0xff]  ;;  %v5455_v11 = vld [vmem:[%s9736_s5 + $0x280] sm:$0xff]  ;;  %v5456_v41 = vld [vmem:[%s9736_s5 + $0x288] sm:$0xff] }
 0x327   : > { %v5368_v26 = vsel %vm5364_vm14, %v5365_v21, %v5367_v58  ;;  %v5495_v13 = vrot.slane %v5365_v21, 7  ;;  %v9315_v6 = vsel %vm5364_vm14, %v5366_v24, %v5369_v61  ;;  %v5440_v18 = vld [vmem:[%s9736_s5 + $0x208] sm:$0xff]  ;;  %v5458_v21 = vld [vmem:[%s9736_s5 + $0x298] sm:$0xff]  ;;  %v5463_v27 = vld [vmem:[%s9736_s5 + $0x2c0] sm:$0xff] }
 0x328   : > { %v5335_v0 = vld [vmem:[#allocation4 + $0x30] sm:$0x7]  ;;  %7260 = vmatpush3.bf16.msra.mxu1 %v7259_v36  ;;  %v5496_v31 = vrot.slane %v5368_v26, 7  ;;  %v5420_v36 = vld [vmem:[%s9736_s5 + $0x168] sm:$0xff]  ;;  %v5454_v44 = vld [vmem:[%s9736_s5 + $0x278] sm:$0xff] }
 0x329   : > { %v9294_v28 = vld [vmem:[#allocation4 + $0x30] sm:$0xf]  ;;  %7262 = vmatprep.subr.bf16.mxu1 %v7261_v25  ;;  %v5513_v55 = vrot.slane %v5335_v0, 7  ;;  %v7281_v0 = vpack.c.bf16 %v5456_v41, %v5455_v11  ;;  %v5448_v45 = vld [vmem:[%s9736_s5 + $0x248] sm:$0xff] }
 0x32a   : > { %v5356_v35 = vrot.slane %v9294_v28, 1  ;;  %v5341_v34 = vld [vmem:[#allocation4 + $0x30] sm:$0x1f]  ;;  %v9345_v60 = vsel %vm5482_vm12, %v5495_v13, %v5496_v31  ;;  %v5443_v13 = vld [vmem:[%s9736_s5 + $0x220] sm:$0xff] }
 0x32b   : > { %v5371_v43 = vrot.slane %v5341_v34, 2  ;;  %v5336_v38 = vld [vmem:[#allocation4 + $0x38] sm:$0x7]  ;;  %v5514_v29 = vsel %vm5482_vm12, %v5501_v37, %v5513_v55  ;;  %v5460_v55 = vld [vmem:[%s9736_s5 + $0x2a8] sm:$0xff]  ;;  %v5453_v15 = vld [vmem:[%s9736_s5 + $0x270] sm:$0xff] }
 0x32c   : > { %v9299_v32 = vld [vmem:[#allocation4 + $0x38] sm:$0xf]  ;;  %v9304_v10 = vsel %vm5349_vm13, %v5352_v30, %v5356_v35  ;;  %v5515_v50 = vrot.slane %v5336_v38, 7  ;;  %7264 = vmatpush3.bf16.msra.mxu1 %v7263_v40  ;;  %v5439_v40 = vld [vmem:[%s9736_s5 + $0x200] sm:$0xff]  ;;  %v5517_v42 = vrot.slane %v5356_v35, 7  ;;  %v5445_v35 = vld [vmem:[%s9736_s5 + $0x230] sm:$0xff] }
 0x32d   : > { %v5358_v57 = vrot.slane %v9299_v32, 1  ;;  %v5505_v12 = vrot.slane %v9304_v10, 7  ;;  %v5342_v17 = vld [vmem:[#allocation4 + $0x38] sm:$0x1f]  ;;  %v5372_v7 = vsel %vm5364_vm14, %v5367_v58, %v5371_v43  ;;  %7266 = vmatprep.subr.bf16.mxu1 %v7265_v4  ;;  %v5521_v63 = vrot.slane %v5371_v43, 7  ;;  %v5459_v38 = vld [vmem:[%s9736_s5 + $0x2a0] sm:$0xff] }
 0x32e   : > { %v5373_v2 = vrot.slane %v5342_v17, 2  ;;  %v5516_v30 = vsel %vm5482_vm12, %v5503_v16, %v5515_v50  ;;  %v5509_v3 = vrot.slane %v5372_v7, 7  ;;  %v5422_v58 = vld [vmem:[%s9736_s5 + $0x178] sm:$0xff]  ;;  %v7283_v34 = vpack.c.bf16 %v5440_v18, %v5439_v40  ;;  %v5444_v17 = vld [vmem:[%s9736_s5 + $0x228] sm:$0xff]  ;;  %v6558_v18 = vld [vmem:[%s9740_s9] sm:$0xff] }
 0x32f   : > { %v9335_v19 = vsel %vm5349_vm13, %v5354_v49, %v5358_v57  ;;  %v5506_v16 = vsel %vm5482_vm12, %v5490_v33, %v5505_v12  ;;  %5617 = vmatprep.mubr.f32.mxu1 %v5516_v30  ;;  %v5499_v49 = vrot.slane %v9315_v6, 7  ;;  %v5419_v33 = vld [vmem:[%s9736_s5 + $0x160] sm:$0xff]  ;;  %v7279_v14 = vpack.c.bf16 %v5422_v58, %v5421_v23  ;;  %v5442_v43 = vld [vmem:[%s9736_s5 + $0x218] sm:$0xff]  ;;  %v5789_v23 = vld [vmem:[%s9738_s7 + $0x8] sm:$0xff] }
 0x330   : > { %v5507_v46 = vrot.slane %v9335_v19, 7  ;;  %v5374_v62 = vsel %vm5364_vm14, %v5369_v61, %v5373_v2  ;;  %5618 = vmatmul.mubr.f32.gmra.mrb[4].mxu1 %v5514_v29  ;;  %v5523_v53 = vrot.slane %v5373_v2, 7  ;;  %v9365_v39 = vsel %vm5482_vm12, %v5496_v31, %v5509_v3  ;;  %v5457_v61 = vld [vmem:[%s9736_s5 + $0x290] sm:$0xff]  ;;  %v5462_v32 = vld [vmem:[%s9736_s5 + $0x2b8] sm:$0xff] }
 0x331   : > { %v5511_v51 = vrot.slane %v5374_v62, 7  ;;  %5687 = vmatprep.mubr.f32.mxu1 %v9259_v54  ;;  %7268 = vmatpush3.bf16.msra.mxu1 %v7267_v8  ;;  %v7275_v25 = vpack.c.bf16 %v5420_v36, %v5419_v33  ;;  %v7285_v4 = vpack.c.bf16 %v5458_v21, %v5457_v61  ;;  %v5441_v8 = vld [vmem:[%s9736_s5 + $0x210] sm:$0xff]  ;;  %v7289_v50 = vpack.c.bf16 %v5460_v55, %v5459_v38  ;;  %v5446_v7 = vld [vmem:[%s9736_s5 + $0x238] sm:$0xff]  ;;  %v5467_v62 = vld [vmem:[%s9736_s5 + $0x2e0] sm:$0xff] }
 0x332   : > { %v5508_v37 = vsel %vm5482_vm12, %v5493_v9, %v5507_v46  ;;  %7270 = vmatprep.subr.bf16.mxu1 %v7269_v5  ;;  %v9371_v9 = vsel %vm5482_vm12, %v5509_v3, %v5521_v63  ;;  %v5519_v5 = vrot.slane %v5358_v57, 7  ;;  %v7287_v26 = vpack.c.bf16 %v5442_v43, %v5441_v8  ;;  %v5465_v19 = vld [vmem:[%s9736_s5 + $0x2d0] sm:$0xff]  ;;  %v5466_v6 = vld [vmem:[%s9736_s5 + $0x2d8] sm:$0xff]  ;;  %v6559_v61 = vld [vmem:[%s9740_s9 + $0x8] sm:$0xff] }
 0x333   : > { %v9362_v54 = vsel %vm5482_vm12, %v5499_v49, %v5511_v51  ;;  %v9368_v59 = vsel %vm5482_vm12, %v5511_v51, %v5523_v53  ;;  %v5498_v31 = vrot.slane %v5366_v24, 7  ;;  %v7291_v2 = vpack.c.bf16 %v5444_v17, %v5443_v13  ;;  %v5464_v24 = vld [vmem:[%s9736_s5 + $0x2c8] sm:$0xff]  ;;  %v5449_v29 = vld [vmem:[%s9736_s5 + $0x250] sm:$0xff]  ;;  %v5451_v53 = vld [vmem:[%s9736_s5 + $0x260] sm:$0xff] }
 0x334   : > { %v5520_v57 = vsel %vm5482_vm12, %v5507_v46, %v5519_v5  ;;  %v5518_v30 = vsel %vm5482_vm12, %v5505_v12, %v5517_v42  ;;  %v7295_v48 = vpack.c.bf16 %v5446_v7, %v5445_v35  ;;  %v7297_v10 = vpack.c.bf16 %v5464_v24, %v5463_v27  ;;  %v5447_v12 = vld [vmem:[%s9736_s5 + $0x240] sm:$0xff]  ;;  %v5450_v46 = vld [vmem:[%s9736_s5 + $0x258] sm:$0xff]  ;;  %v6560_v21 = vld [vmem:[%s9740_s9 + $0x10] sm:$0xff] }
 0x335   : > { %7272 = vmatpush3.bf16.msra.mxu1 %v7271_v56  ;;  %v5500_v47 = vsel %vm5482_vm12, %v5498_v31, %v5499_v49  ;;  %v7301_v63 = vpack.c.bf16 %v5466_v6, %v5465_v19  ;;  %v5468_v49 = vld [vmem:[%s9736_s5 + $0x2e8] sm:$0xff]  ;;  %v7303_v51 = vpack.c.bf16 %v5450_v46, %v5449_v29  ;;  %v7532_v58 = vmov 0.0|0.0   ;;  %v6561_v8 = vld [vmem:[%s9740_s9 + $0x18] sm:$0xff]  ;;  %v6562_v55 = vld [vmem:[%s9740_s9 + $0x20] sm:$0xff] }
 0x336   : > { %7274 = vmatprep.subr.bf16.mxu1 %v7273_v52  ;;  %v7305_v3 = vpack.c.bf16 %v5468_v49, %v5467_v62  ;;  %v5452_v56 = vld [vmem:[%s9736_s5 + $0x268] sm:$0xff]  ;;  %v5469_v52 = vld [vmem:[%s9736_s5 + $0x2f0] sm:$0xff]  ;;  %7343 = vmatprep.subr.bf16.mxu0 %v7532_v58  ;;  %v7347_v38 = vpack.c.bf16 %v6561_v8, %v6560_v21  ;;  %v6565_v13 = vld [vmem:[%s9740_s9 + $0x38] sm:$0xff] }
 0x337   : > { %v7307_v33 = vpack.c.bf16 %v5452_v56, %v5451_v53  ;;  %v6563_v5 = vld [vmem:[%s9740_s9 + $0x28] sm:$0xff]  ;;  %v6566_v42 = vld [vmem:[%s9740_s9 + $0x40] sm:$0xff]  ;;  %v6568_v35 = vld [vmem:[%s9740_s9 + $0x50] sm:$0xff] }
 0x338   : > { %v6569_v7 = vld [vmem:[%s9740_s9 + $0x58] sm:$0xff]  ;;  %v5865_v56 = vld [vmem:[%s9738_s7 + $0x10] sm:$0xff] }
 0x339   : > { %7276 = vmatpush3.bf16.msra.mxu1 %v7275_v25  ;;  %v7311_v25 = vpack.c.bf16 %v5454_v44, %v5453_v15  ;;  %v6173_v8 = vld [vmem:[%s9738_s7 + $0x50] sm:$0xff] }
 0x33a   : > { %7278 = vmatprep.subr.bf16.mxu1 %v7277_v20  ;;  %v5788_v20 = vld [vmem:[%s9738_s7] sm:$0xff] }
 0x33d   : > { %7280 = vmatpush3.bf16.msra.mxu1 %v7279_v14 }
 0x33e   : > { %7282 = vmatprep.subr.bf16.mxu1 %v7281_v0 }
 0x340   : > { %5688 = vmatmul.mubr.f32.vlgmr.msra.gmra.mrb[6].mxu1 %v9274_v22  ;;  %v5461_v22 = vld [vmem:[%s9736_s5 + $0x2b0] sm:$0xff] }
 0x341   : > { %5692 = vmatprep.mubr.f32.mxu1 %v5508_v37  ;;  %7284 = vmatpush3.bf16.msra.mxu1 %v7283_v34  ;;  %v7293_v28 = vpack.c.bf16 %v5462_v32, %v5461_v22  ;;  %v5470_v37 = vld [vmem:[%s9736_s5 + $0x2f8] sm:$0xff]  ;;  %v6821_v34 = vld [vmem:[%s9737_s6] ss:$0 sm:$0xff]  ;;  %v6567_v22 = vld [vmem:[%s9740_s9 + $0x48] sm:$0xff] }
 0x342   : > { %7286 = vmatprep.subr.bf16.mxu1 %v7285_v4  ;;  %v7309_v36 = vpack.c.bf16 %v5470_v37, %v5469_v52  ;;  %v7344_v4 = vpack.c.bf16 %v6559_v61, %v6558_v18  ;;  %v7356_v31 = vpack.c.bf16 %v6567_v22, %v6566_v42  ;;  %v5866_v52 = vld [vmem:[%s9738_s7 + $0x18] sm:$0xff]  ;;  %v6097_v18 = vld [vmem:[%s9738_s7 + $0x40] sm:$0xff]  ;;  %v6098_v61 = vld [vmem:[%s9738_s7 + $0x48] sm:$0xff] }
 0x343   : > { %v7317_v15 = vpack.c.bf16 %v5866_v52, %v5865_v56  ;;  %v7326_v21 = vpack.c.bf16 %v6098_v61, %v6097_v18  ;;  %v6326_v42 = vld [vmem:[%s9738_s7 + $0x78] sm:$0xff] }
 0x344   : > { %5693 = vmatmul.mubr.f32.gmra.mrb[8].mxu1 %v5506_v16  ;;  %v7299_v16 = vpack.c.bf16 %v5448_v45, %v5447_v12  ;;  %7345 = vmatpush3.bf16.msra.mxu0 %v7344_v4  ;;  %v6570_v12 = vld [vmem:[%s9740_s9 + $0x60] sm:$0xff]  ;;  %v6571_v45 = vld [vmem:[%s9740_s9 + $0x68] sm:$0xff] }
 0x345   : > { %5697 = vmatprep.mubr.f32.mxu1 %v5520_v57  ;;  %7288 = vmatpush3.bf16.msra.mxu1 %v7287_v26  ;;  %v7350_v26 = vpack.c.bf16 %v6563_v5, %v6562_v55  ;;  %v6249_v5 = vld [vmem:[%s9738_s7 + $0x60] sm:$0xff] }
 0x346   : > { %7290 = vmatprep.subr.bf16.mxu1 %v7289_v50  ;;  %7346 = vmatprep.subr.bf16.mxu0 %v7532_v58  ;;  %v6564_v50 = vld [vmem:[%s9740_s9 + $0x30] sm:$0xff] }
 0x347   : > { %v7353_v17 = vpack.c.bf16 %v6565_v13, %v6564_v50 }
 0x348   : > { %5698 = vmatmul.mubr.f32.gmra.mrb[10].mxu1 %v5518_v30  ;;  %7348 = vmatpush3.bf16.msra.mxu0 %v7347_v38 }
 0x349   : > { %7292 = vmatpush3.bf16.msra.mxu1 %v7291_v2  ;;  %5767 = vmatprep.mubr.f32.mxu1 %v5500_v47  ;;  %v7359_v47 = vpack.c.bf16 %v6569_v7, %v6568_v35  ;;  %v6481_v7 = vld [vmem:[%s9738_s7 + $0x90] sm:$0xff] }
 0x34a   : > { %7294 = vmatprep.subr.bf16.mxu1 %v7293_v28  ;;  %7349 = vmatprep.subr.bf16.mxu0 %v7532_v58 }
 0x34c   : > { %7351 = vmatpush3.bf16.msra.mxu0 %v7350_v26  ;;  %v6250_v26 = vld [vmem:[%s9738_s7 + $0x68] sm:$0xff] }
 0x34d   : > { %7296 = vmatpush3.bf16.msra.mxu1 %v7295_v48  ;;  %7352 = vmatprep.subr.bf16.mxu0 %v7532_v58  ;;  %v7332_v50 = vpack.c.bf16 %v6250_v26, %v6249_v5 }
 0x34e   : > { %7298 = vmatprep.subr.bf16.mxu1 %v7297_v10 }
 0x350   : > { %7354 = vmatpush3.bf16.msra.mxu0 %v7353_v17  ;;  %v6325_v17 = vld [vmem:[%s9738_s7 + $0x70] sm:$0xff] }
 0x351   : > { %7300 = vmatpush3.bf16.msra.mxu1 %v7299_v16  ;;  %7355 = vmatprep.subr.bf16.mxu0 %v7532_v58  ;;  %v7335_v22 = vpack.c.bf16 %v6326_v42, %v6325_v17 }
 0x352   : > { %7302 = vmatprep.subr.bf16.mxu1 %v7301_v63  ;;  %v7362_v63 = vpack.c.bf16 %v6571_v45, %v6570_v12  ;;  %v5783_v45 = vld [vmem:[%s9739_s8] sm:$0x1] }
 0x354   : > { %7357 = vmatpush3.bf16.msra.mxu0 %v7356_v31  ;;  %v6406_v31 = vld [vmem:[%s9738_s7 + $0x88] sm:$0xff] }
 0x355   : > { %7304 = vmatpush3.bf16.msra.mxu1 %v7303_v51  ;;  %7358 = vmatprep.subr.bf16.mxu0 %v7532_v58 }
 0x356   : > { %7306 = vmatprep.subr.bf16.mxu1 %v7305_v3 }
 0x358   : > { %7360 = vmatpush3.bf16.msra.mxu0 %v7359_v47 }
 0x359   : > { %7308 = vmatpush3.bf16.msra.mxu1 %v7307_v33  ;;  %7361 = vmatprep.subr.bf16.mxu0 %v7532_v58 }
 0x35a   : > { %7310 = vmatprep.subr.bf16.mxu1 %v7309_v36 }
 0x35c   : > { %7363 = vmatpush3.bf16.msra.mxu0 %v7362_v63 }
 0x35d   : > { %7312 = vmatpush3.bf16.msra.mxu1 %v7311_v25  ;;  %7364 = vmatprep.subr.bf16.mxu0 %v7532_v58 }
 0x35e   : > { %7313 = vmatprep.subr.bf16.mxu1 %v7532_v58 }
 0x360   : > { %5768 = vmatmul.mubr.f32.vlgmr.msra.gmra.mrb[12].mxu1 %v9345_v60  ;;  %v7314_v60 = vpack.c.bf16 %v5789_v23, %v5788_v20 }
 0x361   : > { %5772 = vmatprep.mubr.f32.mxu1 %v9362_v54 }
 0x362   : > { %7315 = vmatpush3.bf16.msra.mxu1 %v7314_v60 }
 0x363   : > { %7316 = vmatprep.subr.bf16.mxu1 %v7532_v58 }
 0x364   : > { %5773 = vmatmul.mubr.f32.gmra.mrb[14].mxu1 %v9365_v39 }
 0x365   : > { %5777 = vmatprep.mubr.f32.mxu1 %v9368_v59 }
 0x368   : > { %5778 = vmatmul.mubr.f32.gmra.mrb[16].mxu1 %v9371_v9 }
 0x369   : > { %7013 = vmatprep.mubr.msk.f32.mxu1 %vm7533_vm15, %v7529_v1 }
 0x3f2   : > { %v6868_v54 = vpop.f32.mrb[0].mxu1 }
 0x3f3   : > { %v6869_v39 = vpop.f32.mrb[1].mxu1 }
 0x3f4   : > { %v6870_v59 = vadd.f32 %v6869_v39, %v6868_v54  ;;  %v5941_v39 = vld [vmem:[%s9738_s7 + $0x20] sm:$0xff] }
 0x3f6   : > { %v6871_v9 = vpop.f32.mrb[2].mxu1  ;;  %v5610_v2 = vadd.f32 %v6870_v59, %v6821_v34  ;;  %v5942_v59 = vld [vmem:[%s9738_s7 + $0x28] sm:$0xff] }
 0x3f7   : > { %v6872_v11 = vpop.f32.mrb[3].mxu1 }
 0x3f8   : > { %v6873_v41 = vadd.f32 %v6872_v11, %v6871_v9  ;;  %v7320_v9 = vpack.c.bf16 %v5942_v59, %v5941_v39 }
 0x3fa   : > { %v5615_v48 = vadd.f32 %v6873_v41, %v6821_v34  ;;  %v6017_v41 = vld [vmem:[%s9738_s7 + $0x30] sm:$0xff] }
 0x403   : > { %v6874_v14 = vpop.f32.mrb[4].mxu1 }
 0x404   : > { %v6875_v0 = vpop.f32.mrb[5].mxu1 }
 0x405   : > { %v6876_v40 = vadd.f32 %v6875_v0, %v6874_v14  ;;  %v6018_v14 = vld [vmem:[%s9738_s7 + $0x38] sm:$0xff] }
 0x406   : > { %v7323_v0 = vpack.c.bf16 %v6018_v14, %v6017_v41 }
 0x407   : > { %v5620_v43 = vadd.f32 %v6876_v40, %v6821_v34 }
 0x413   : > { %v6909_v32 = vpop.f32.mrb[6].mxu1 }
 0x414   : > { %v6910_v57 = vpop.f32.mrb[7].mxu1 }
 0x415   : > { %v6911_v28 = vadd.f32 %v6910_v57, %v6909_v32  ;;  %v6405_v57 = vld [vmem:[%s9738_s7 + $0x80] sm:$0xff] }
 0x417   : > { %v5690_v30 = vadd.f32 %v6911_v28, %v5610_v2  ;;  %v6912_v27 = vpop.f32.mrb[8].mxu1  ;;  %v7338_v2 = vpack.c.bf16 %v6406_v31, %v6405_v57 }
 0x418   : > { %v6913_v24 = vpop.f32.mrb[9].mxu1 }
 0x419   : > { %v6914_v10 = vadd.f32 %v6913_v24, %v6912_v27 }
 0x41b   : > { %v5695_v19 = vadd.f32 %v6914_v10, %v5615_v48  ;;  %v6915_v6 = vpop.f32.mrb[10].mxu1  ;;  %v6572_v48 = vld [vmem:[%s9740_s9 + $0x70] sm:$0xff]  ;;  %v6573_v10 = vld [vmem:[%s9740_s9 + $0x78] sm:$0xff] }
 0x41c   : > { %v6916_v16 = vpop.f32.mrb[11].mxu1  ;;  %v7365_v12 = vpack.c.bf16 %v6573_v10, %v6572_v48 }
 0x41d   : > { %v6917_v29 = vadd.f32 %v6916_v16, %v6915_v6 }
 0x41e   : > { %7366 = vmatpush3.bf16.msra.mxu0 %v7365_v12 }
 0x41f   : > { %v5700_v46 = vadd.f32 %v6917_v29, %v5620_v43  ;;  %v6174_v43 = vld [vmem:[%s9738_s7 + $0x58] sm:$0xff]  ;;  %7367 = vmatprep.subr.bf16.mxu0 %v7532_v58  ;;  %v6646_v29 = vld [vmem:[%s9742_s11] sm:$0xff] }
 0x420   : > { %v7329_v38 = vpack.c.bf16 %v6174_v43, %v6173_v8 }
 0x433   : > { %v6950_v62 = vpop.f32.mrb[12].mxu1 }
 0x434   : > { %v6951_v49 = vpop.f32.mrb[13].mxu1 }
 0x435   : > { %v6952_v51 = vadd.f32 %v6951_v49, %v6950_v62  ;;  %v6574_v62 = vld [vmem:[%s9741_s10] sm:$0x1] }
 0x437   : > { %v5770_v3 = vadd.f32 %v6952_v51, %v5690_v30  ;;  %v6953_v53 = vpop.f32.mrb[14].mxu1  ;;  %v6482_v30 = vld [vmem:[%s9738_s7 + $0x98] sm:$0xff] }
 0x438   : > { %v6954_v37 = vpop.f32.mrb[15].mxu1  ;;  %v7341_v27 = vpack.c.bf16 %v6482_v30, %v6481_v7 }
 0x439   : > { %v5785_v33 = vrot.slane %v5770_v3, 1  ;;  %v6955_v36 = vadd.f32 %v6954_v37, %v6953_v53 }
 0x43b   : > { %v5787_v44 = vmax.f32 %v5770_v3, %v5785_v33  ;;  %v5775_v25 = vadd.f32 %v6955_v36, %v5695_v19  ;;  %v6956_v20 = vpop.f32.mrb[16].mxu1 }
 0x43c   : > { %v6957_v23 = vpop.f32.mrb[17].mxu1 }
 0x43d   : > { %v6958_v60 = vadd.f32 %v6957_v23, %v6956_v20  ;;  %7014 = vmatmul.mubr.msk.f32.vlgmr.msra.gmra.mrb[18].mxu1 %vm5790_vm0, %v5787_v44  ;;  %v5867_v11 = vrot.slane %v5787_v44, 2  ;;  %v5943_v40 = vrot.slane %v5787_v44, 4  ;;  %v6019_v34 = vrot.slane %v5787_v44, 6 }
 0x43e   : > { %7318 = vmatpush3.bf16.msra.mxu1 %v7317_v15  ;;  %7020 = vmatprep.mubr.msk.f32.mxu1 %vm7533_vm15, %v7529_v1  ;;  %v6094_v4 = vrot.slane %v5775_v25, 1 }
 0x43f   : > { %v9574_v54 = vadd.f32 %v6958_v60, %v5700_v46  ;;  %7319 = vmatprep.subr.bf16.mxu1 %v7532_v58 }
 0x440   : > { %v6096_v55 = vmax.f32 %v5775_v25, %v6094_v4 }
 0x441   : > { %v6402_v35 = vrot.slane %v9574_v54, 1 }
 0x442   : > { %v6175_v13 = vrot.slane %v6096_v55, 2  ;;  %v6251_v32 = vrot.slane %v6096_v55, 4  ;;  %v6327_v28 = vrot.slane %v6096_v55, 6 }
 0x443   : > { %v6404_v24 = vmax.f32 %v9574_v54, %v6402_v35 }
 0x445   : > { %7021 = vmatmul.mubr.msk.f32.vlgmr.msra.gmra.mrb[18].mxu1 %vm5790_vm0, %v5867_v11  ;;  %v6483_v47 = vrot.slane %v6404_v24, 2 }
 0x446   : > { %7321 = vmatpush3.bf16.msra.mxu1 %v7320_v9  ;;  %7027 = vmatprep.mubr.msk.f32.mxu1 %vm7533_vm15, %v7529_v1 }
 0x447   : > { %7322 = vmatprep.subr.bf16.mxu1 %v7532_v58 }
 0x44d   : > { %7028 = vmatmul.mubr.msk.f32.vlgmr.msra.gmra.mrb[18].mxu1 %vm5790_vm0, %v5943_v40 }
 0x44e   : > { %7324 = vmatpush3.bf16.msra.mxu1 %v7323_v0  ;;  %7034 = vmatprep.mubr.msk.f32.mxu1 %vm7533_vm15, %v7529_v1 }
 0x44f   : > { %7325 = vmatprep.subr.bf16.mxu1 %v7532_v58 }
 0x455   : > { %7035 = vmatmul.mubr.msk.f32.vlgmr.msra.gmra.mrb[18].mxu1 %vm5790_vm0, %v6019_v34 }
 0x456   : > { %7327 = vmatpush3.bf16.msra.mxu1 %v7326_v21  ;;  %7041 = vmatprep.mubr.msk.f32.mxu1 %vm7533_vm15, %v7529_v1 }
 0x457   : > { %7328 = vmatprep.subr.bf16.mxu1 %v7532_v58 }
 0x45d   : > { %7042 = vmatmul.mubr.msk.f32.vlgmr.msra.gmra.mrb[18].mxu1 %vm5790_vm0, %v6096_v55 }
 0x45e   : > { %7330 = vmatpush3.bf16.msra.mxu1 %v7329_v38  ;;  %7048 = vmatprep.mubr.msk.f32.mxu1 %vm7533_vm15, %v7529_v1 }
 0x45f   : > { %7331 = vmatprep.subr.bf16.mxu1 %v7532_v58 }
 0x465   : > { %7049 = vmatmul.mubr.msk.f32.vlgmr.msra.gmra.mrb[18].mxu1 %vm5790_vm0, %v6175_v13 }
 0x466   : > { %7333 = vmatpush3.bf16.msra.mxu1 %v7332_v50  ;;  %7055 = vmatprep.mubr.msk.f32.mxu1 %vm7533_vm15, %v7529_v1 }
 0x467   : > { %7334 = vmatprep.subr.bf16.mxu1 %v7532_v58 }
 0x46d   : > { %7056 = vmatmul.mubr.msk.f32.vlgmr.msra.gmra.mrb[18].mxu1 %vm5790_vm0, %v6251_v32 }
 0x46e   : > { %7336 = vmatpush3.bf16.msra.mxu1 %v7335_v22  ;;  %7062 = vmatprep.mubr.msk.f32.mxu1 %vm7533_vm15, %v7529_v1 }
 0x46f   : > { %7337 = vmatprep.subr.bf16.mxu1 %v7532_v58 }
 0x475   : > { %7063 = vmatmul.mubr.msk.f32.vlgmr.msra.gmra.mrb[18].mxu1 %vm5790_vm0, %v6327_v28 }
 0x476   : > { %7339 = vmatpush3.bf16.msra.mxu1 %v7338_v2  ;;  %7069 = vmatprep.mubr.msk.f32.mxu1 %vm7533_vm15, %v7529_v1 }
 0x477   : > { %7340 = vmatprep.subr.bf16.mxu1 %v7532_v58  ;;  %v6647_v58 = vld [vmem:[%s9742_s11 + $0x8] sm:$0xff] }
 0x478   : > { %v7368_v46 = vpack.c.bf16 %v6647_v58, %v6646_v29 }
 0x47d   : > { %7070 = vmatmul.mubr.msk.f32.vlgmr.msra.gmra.mrb[18].mxu1 %vm5790_vm0, %v6404_v24 }
 0x47e   : > { %7342 = vmatpush3.bf16.msra.mxu1 %v7341_v27  ;;  %7076 = vmatprep.mubr.msk.f32.mxu1 %vm7533_vm15, %v7529_v1 }
 0x485   : > { %7077 = vmatmul.mubr.msk.f32.vlgmr.msra.gmra.mrb[18].mxu1 %vm5790_vm0, %v6483_v47 }
 0x558   : > { %v6552_v19 = vpop.f32.mrb[18].mxu1 }
 0x559   : > { %v7380_v6 = vadd.f32 %v6552_v19, %v5783_v45  ;;  %v7078_v16 = vpop.f32.mrb[19].mxu1 }
 0x55b   : > { %v6557_v63 = vmax.f32 %v7380_v6, 0.0 }
 0x55d   : > { %7112 = vmatmul.mubr.f32.vlgmr.msra.gmra.mrb[10].mxu0 %v6557_v63 }
 0x55e   : > { %7118 = vmatprep.mubr.msk.f32.mxu0 %vm7533_vm15, %v7529_v1  ;;  %7369 = vmatpush3.bf16.msra.mxu0 %v7368_v46  ;;  %v6648_v1 = vld [vmem:[%s9743_s12] sm:$0x1] }
 0x630   : > { %v6641_v49 = vpop.f32.mrb[10].mxu0 }
 0x631   : > { %v6642_v51 = vadd.f32 %v6641_v49, %v6574_v62  ;;  %v7113_v3 = vpop.f32.mrb[11].mxu0 }
 0x633   : > { %v6645_v53 = vmax.f32 %v6642_v51, 0.0 }
 0x635   : > { %7119 = vmatmul.mubr.msk.f32.vlgmr.msra.gmra.mrb[12].mxu0 %vm5790_vm0, %v6645_v53 }
 0x708   : > { %v6718_v56 = vpop.f32.mrb[12].mxu0 }
 0x709   : > { %v6719_v52 = vadd.f32 %v6718_v56, %v6648_v1  ;;  %v7120_v37 = vpop.f32.mrb[13].mxu0 }
 0x70b   : > { %6723 = vst.msk [vmem:[%s432_s30] sm:$0x1] %vm6722_vm1, %v6719_v52 }
 0x70c   : > { %7477 = shalt.err (!%p7474_p3)
}
 0x70d   : > { %s7478_s27 = scalar_lea.hbm %s9689_s21, 16  ;;  %s7482_s16 = scalar_lea.hbm %s9744_s13, 32 }
 0x70e   : > { %p7479_p4 = scmp.ne.s32.totalorder %s9689_s21, %s7478_s27  ;;  %p7483_p9 = scmp.lt.u32.totalorder %s9689_s21, %s9744_s13 }
 0x70f   : > { %p7484_p10 = scmp.lt.u32.totalorder %s7482_s16, %s7478_s27  ;;  %p7486_p12 = scmp.lt.u32.totalorder %s7478_s27, %s9689_s21 }
 0x710   : > { %p7480_p7 = pnand %p7479_p4, %p7643_p5 }
 0x711   : > { %p7485_p11 = por %p7484_p10, %p7483_p9 }
 0x712   : > { %p7481_p8 = pneg %p7480_p7 }
 0x713   : > { %p7487_p13 = por %p7486_p12, %p7485_p11 }
 0x715   : > { %p7488_p0 = pnand %p7487_p13, %p7481_p8 }
 0x717   : > { %7491 = shalt.err (!%p7488_p0)
}
 0x718   : > { %7410 = dma.vmem_to_hbm [thread:$0]  (%p7643_p5), %s9691_s15, 16, %s9689_s21, %s6725_s22  }
 0x719 PF: > { %p7416_p1 = scmp.ge.s32.totalorder %s7526_s28, 2  ;;  %s6749_s0 = sand.u32 1, %s7514_s25  }
 0x71a   : > { %s6750_s17 = scalar_lea.sflag [#allocation6], %s6749_s0 }
 0x71b   : > { %p7413_p2 = pnand %p7416_p1, %p7647_p6 }
 0x71d   : > { %7509 = dma.done.wait (!%p7413_p2), %s6750_s17, 16  }
 0x71e   : > { %7511 = vsyncadd (!%p7413_p2), %s6750_s17, 4294967280  ;;  %s9752_s24 = sld [smem:[#allocation8_spill]]  ;;  %s9753_s27 = sld [smem:[#allocation9_spill]] }
 0x71f   : > { %p23_p3 = scmp.ge.s32.totalorder %s7630_s14, 4   ;;  %s9754_s25 = smov %s7518_s26 }
 0x720   : > { %s9756_s28 = smov %s7630_s14 }
 0x721   :  { %25 = sbr.rel (!%p23_p3) target bundleno = 5 (0x5), region = 109 }
 0x724   : > { %s9755_s26 = smov %s9752_s24 }
 0x728   :  { %6754 = vsyncpa [#allocation6], 1 }
 0x729   :  { %6756 = vsyncpa [#allocation6 + $0x1], 1 }

</bundles_post_ra>
